<compile_context>
chip_gen: v7x
topology: tpu7x:2x2x1
jax: 0.10.0
libtpu: 0.0.40
codegen_flags: <defaults>
</compile_context>

<pallas_src>
import functools

import jax
import jax.numpy as jnp
import numpy as np
from jax import lax
from jax.experimental import pallas as pl
from jax.experimental.pallas import tpu as pltpu


def _round_up(n, m):
    return ((n + m - 1) // m) * m


# -----------------------------------------------------------------------------
# Kernel 1: M-tiled fused (X @ W + b) with optional ReLU.
#   x tile (TM, K) bf16, W (K, N) bf16 resident, b (1, N) f32, out (TM, N).
# -----------------------------------------------------------------------------
def _matmul_bias_kernel(x_ref, w_ref, b_ref, o_ref, *, relu: bool):
    acc = jnp.dot(x_ref[...], w_ref[...], preferred_element_type=jnp.float32)
    acc = acc + b_ref[...]                     # (1, N) broadcasts over rows
    if relu:
        acc = jnp.maximum(acc, 0.0)
    o_ref[...] = acc.astype(o_ref.dtype)


def pallas_matmul_bias(x, w, b2d, *, relu, out_dtype=jnp.bfloat16, tm=256):
    M, K = x.shape
    Kw, N = w.shape
    assert K == Kw and b2d.shape == (1, N)
    TM = min(tm, max(8, _round_up(M, 8)))
    Mp = _round_up(M, TM)
    if Mp != M:
        x = jnp.zeros((Mp, K), x.dtype).at[:M].set(x)
    out = pl.pallas_call(
        functools.partial(_matmul_bias_kernel, relu=relu),
        out_shape=jax.ShapeDtypeStruct((Mp, N), out_dtype),
        grid=(Mp // TM,),
        in_specs=[
            pl.BlockSpec((TM, K), lambda i: (i, 0)),
            pl.BlockSpec((K, N), lambda i: (0, 0)),   # weight stays resident
            pl.BlockSpec((1, N), lambda i: (0, 0)),   # bias stays resident
        ],
        out_specs=pl.BlockSpec((TM, N), lambda i: (i, 0)),
        compiler_params=pltpu.CompilerParams(
            dimension_semantics=("parallel",)),
    )(x, w, b2d)
    return out[:M] if Mp != M else out


# -----------------------------------------------------------------------------
# Kernel 2: fused MLP head:  out = ReLU(X @ W1 + b1) @ W2 + b2   (one launch).
# -----------------------------------------------------------------------------
def _fused_mlp_kernel(x_ref, w1_ref, b1_ref, w2_ref, b2_ref, o_ref):
    h = jnp.dot(x_ref[...], w1_ref[...], preferred_element_type=jnp.float32)
    h = jnp.maximum(h + b1_ref[...], 0.0)
    out = jnp.dot(h.astype(w2_ref.dtype), w2_ref[...],
                  preferred_element_type=jnp.float32)
    o_ref[...] = out + b2_ref[...]


def pallas_fused_mlp(x, w1, b1, w2, b2, *, tm=256):
    M, K1 = x.shape
    _, H = w1.shape
    _, N2 = w2.shape
    TM = min(tm, max(8, _round_up(M, 8)))
    Mp = _round_up(M, TM)
    if Mp != M:
        x = jnp.zeros((Mp, K1), x.dtype).at[:M].set(x)
    out = pl.pallas_call(
        _fused_mlp_kernel,
        out_shape=jax.ShapeDtypeStruct((Mp, N2), jnp.float32),
        grid=(Mp // TM,),
        in_specs=[
            pl.BlockSpec((TM, K1), lambda i: (i, 0)),
            pl.BlockSpec((K1, H), lambda i: (0, 0)),
            pl.BlockSpec((1, H), lambda i: (0, 0)),
            pl.BlockSpec((H, N2), lambda i: (0, 0)),
            pl.BlockSpec((1, N2), lambda i: (0, 0)),
        ],
        out_specs=pl.BlockSpec((TM, N2), lambda i: (i, 0)),
        compiler_params=pltpu.CompilerParams(
            dimension_semantics=("parallel",)),
    )(x, w1, b1, w2, b2)
    return out[:M] if Mp != M else out


# -----------------------------------------------------------------------------
# NHWC im2col glue: strided slices + one lane-dense concat (no 5-D transpose).
# Feature order (kh, kw, c) matches the prepped conv weights.
# TODO(synk): fold the patch gather into the Pallas kernel (strided in-kernel
# reads / manual DMA) to remove the materialized im2col tensor entirely.
# -----------------------------------------------------------------------------
def im2col_nhwc(x, kh, kw, stride):
    n, h, w, c = x.shape
    oh = (h - kh) // stride + 1
    ow = (w - kw) // stride + 1
    cols = []
    for i in range(kh):
        for j in range(kw):
            cols.append(x[:, i:i + stride * oh:stride,
                          j:j + stride * ow:stride, :])
    patches = jnp.concatenate(cols, axis=-1)            # (n, oh, ow, kh*kw*c)
    return patches.reshape(n * oh * ow, kh * kw * c), oh, ow


def conv2d_pallas(x, w2d, b2d, *, kh, kw, stride, relu):
    """NHWC conv, PyTorch 'VALID' semantics.  w2d: (kh*kw*c, oc) prepped."""
    n = x.shape[0]
    patches, oh, ow = im2col_nhwc(x, kh, kw, stride)
    y = pallas_matmul_bias(patches, w2d, b2d, relu=relu,
                           out_dtype=jnp.bfloat16)
    return y.reshape(n, oh, ow, w2d.shape[1])           # stays NHWC


# -----------------------------------------------------------------------------
# Parameter init (torch layout) and one-time repack to kernel-ready layout.
# -----------------------------------------------------------------------------
def init_torch_params(out_dim, key):
    def uinit(k, shape, fan_in):
        bound = 1.0 / jnp.sqrt(fan_in)
        return jax.random.uniform(k, shape, jnp.float32, -bound, bound)

    ks = jax.random.split(key, 10)
    p = {}
    p["c1_w"] = uinit(ks[0], (32, 4, 8, 8), 4 * 8 * 8)
    p["c1_b"] = uinit(ks[1], (32,), 4 * 8 * 8)
    p["c2_w"] = uinit(ks[2], (64, 32, 4, 4), 32 * 4 * 4)
    p["c2_b"] = uinit(ks[3], (64,), 32 * 4 * 4)
    p["c3_w"] = uinit(ks[4], (64, 64, 3, 3), 64 * 3 * 3)
    p["c3_b"] = uinit(ks[5], (64,), 64 * 3 * 3)
    p["f1_w"] = uinit(ks[6], (256, 3136), 3136)          # torch Linear: (out, in)
    p["f1_b"] = uinit(ks[7], (256,), 3136)
    p["f2_w"] = uinit(ks[8], (out_dim, 256), 256)
    p["f2_b"] = uinit(ks[9], (out_dim,), 256)
    return p


def prep_params(p, out_dim):
    """One-time repack: done at init, never per forward step."""
    def conv_prep(w, b):
        oc, c, kh, kw = w.shape
        # feature index (i*kw + j)*c + cc  ==  im2col_nhwc order
        w2d = jnp.transpose(w, (2, 3, 1, 0)).reshape(kh * kw * c, oc)
        return w2d.astype(jnp.bfloat16), b.reshape(1, oc).astype(jnp.float32)

    q = {}
    q["c1_w"], q["c1_b"] = conv_prep(p["c1_w"], p["c1_b"])
    q["c2_w"], q["c2_b"] = conv_prep(p["c2_w"], p["c2_b"])
    q["c3_w"], q["c3_b"] = conv_prep(p["c3_w"], p["c3_b"])

    # fc1: torch column index = c*49 + h*7 + w;  our flatten is NHWC (h, w, c).
    f1 = p["f1_w"].reshape(256, 64, 7, 7).transpose(0, 2, 3, 1).reshape(256, 3136)
    q["f1_w"] = f1.T.astype(jnp.bfloat16)                # (3136, 256)
    q["f1_b"] = p["f1_b"].reshape(1, 256).astype(jnp.float32)

    # fc2: pad out_dim -> 128 lanes for unmasked stores (sliced after kernel).
    n2 = _round_up(max(out_dim, 128), 128)
    w2 = jnp.zeros((256, n2), jnp.float32).at[:, :out_dim].set(p["f2_w"].T)
    b2 = jnp.zeros((1, n2), jnp.float32).at[0, :out_dim].set(p["f2_b"])
    q["f2_w"] = w2.astype(jnp.bfloat16)
    q["f2_b"] = b2
    return q


def network_forward(params, x, out_dim):
    # x: (N, 4, 84, 84) f32 (torch layout).  Single entry transpose -> NHWC bf16.
    h = jnp.transpose(x, (0, 2, 3, 1)).astype(jnp.bfloat16)
    h = conv2d_pallas(h, params["c1_w"], params["c1_b"],
                      kh=8, kw=8, stride=4, relu=True)     # (N,20,20,32)
    h = conv2d_pallas(h, params["c2_w"], params["c2_b"],
                      kh=4, kw=4, stride=2, relu=True)      # (N,9,9,64)
    h = conv2d_pallas(h, params["c3_w"], params["c3_b"],
                      kh=3, kw=3, stride=1, relu=False)     # (N,7,7,64), no ReLU
    n = h.shape[0]
    flat = h.reshape(n, 7 * 7 * 64)                         # NHWC flatten
    out = pallas_fused_mlp(flat, params["f1_w"], params["f1_b"],
                           params["f2_w"], params["f2_b"])  # (N, 128) f32
    return out[:, :out_dim]


# -----------------------------------------------------------------------------
# Pure-JAX reference (torch semantics) for correctness check.
# -----------------------------------------------------------------------------
def reference_forward(p, x):
    def conv(h, w, b, stride):
        y = lax.conv_general_dilated(h, w, (stride, stride), "VALID",
                                     dimension_numbers=("NCHW", "OIHW", "NCHW"))
        return y + b.reshape(1, -1, 1, 1)
    h = jax.nn.relu(conv(x, p["c1_w"], p["c1_b"], 4))
    h = jax.nn.relu(conv(h, p["c2_w"], p["c2_b"], 2))
    h = conv(h, p["c3_w"], p["c3_b"], 1)
    flat = h.reshape(h.shape[0], -1)                        # NCHW flatten (torch)
    h = jax.nn.relu(flat @ p["f1_w"].T + p["f1_b"])
    return h @ p["f2_w"].T + p["f2_b"]


if __name__ == "__main__":
    out_dim = 6
    key = jax.random.PRNGKey(0)
    kx, kp = jax.random.split(key)

    # Linear(3136, 256) implies 84x84 spatial input (64*7*7 = 3136).
    x = jax.random.normal(kx, (2, 4, 84, 84), jnp.float32)
    torch_params = init_torch_params(out_dim, kp)
    params = prep_params(torch_params, out_dim)

    fwd = jax.jit(functools.partial(network_forward, out_dim=out_dim))
    y = fwd(params, x)
    jax.block_until_ready(y)
    assert y.shape == (2, out_dim)

    y_ref = jax.jit(reference_forward)(torch_params, x)
    jax.block_until_ready(y_ref)
    err = float(np.max(np.abs(np.asarray(y, np.float32) - np.asarray(y_ref))))
    assert err < 5e-2, f"mismatch vs reference: max abs err {err}"

    print("KERNEL_OK")
</pallas_src>

<mosaic_0001>
module attributes {stable_mosaic.version = 11 : i64} {
  func.func @_matmul_bias_kernel(%arg0: i32, %arg1: memref<256x256xbf16, #tpu.memory_space<vmem>>, %arg2: memref<256x32xbf16, #tpu.memory_space<vmem>>, %arg3: memref<1x32xf32, #tpu.memory_space<vmem>>, %arg4: memref<256x32xbf16, #tpu.memory_space<vmem>>) attributes {dimension_semantics = [#tpu.dimension_semantics<parallel>], iteration_bounds = array<i64: 4>, scalar_prefetch = 0 : i64, scratch_operands = 0 : i64, tpu.core_type = #tpu.core_type<tc>, window_params = [{transform_indices = @transform_0, window_bounds = array<i64: 256, 256>}, {pipeline_mode = #tpu.pipeline_mode<synchronous>, transform_indices = @transform_1, window_bounds = array<i64: 256, 32>}, {pipeline_mode = #tpu.pipeline_mode<synchronous>, transform_indices = @transform_2, window_bounds = array<i64: 1, 32>}, {transform_indices = @transform_3, window_bounds = array<i64: 256, 32>}]} {
    %c0 = arith.constant 0 : index
    %c0_0 = arith.constant 0 : index
    %0 = vector.load %arg1[%c0, %c0_0] : memref<256x256xbf16, #tpu.memory_space<vmem>>, vector<256x256xbf16>
    %c0_1 = arith.constant 0 : index
    %c0_2 = arith.constant 0 : index
    %1 = vector.load %arg2[%c0_1, %c0_2] : memref<256x32xbf16, #tpu.memory_space<vmem>>, vector<256x32xbf16>
    %cst = arith.constant dense<0.000000e+00> : vector<256x32xf32>
    %2 = tpu.matmul %0, %1, %cst {dimension_numbers = #tpu.dot_dimension_numbers<[1], [0], [0], [1], [0, 0, 1, 1], [], []>} : vector<256x256xbf16>, vector<256x32xbf16>, vector<256x32xf32> -> vector<256x32xf32>
    %c0_3 = arith.constant 0 : index
    %c0_4 = arith.constant 0 : index
    %3 = vector.load %arg3[%c0_3, %c0_4] : memref<1x32xf32, #tpu.memory_space<vmem>>, vector<1x32xf32>
    %4 = vector.broadcast %3 : vector<1x32xf32> to vector<256x32xf32>
    %5 = arith.addf %2, %4 : vector<256x32xf32>
    %cst_5 = arith.constant 0.000000e+00 : f32
    %6 = vector.broadcast %cst_5 : f32 to vector<256x32xf32>
    %7 = arith.maximumf %5, %6 : vector<256x32xf32>
    %8 = arith.truncf %7 : vector<256x32xf32> to vector<256x32xbf16>
    %c0_6 = arith.constant 0 : index
    %c0_7 = arith.constant 0 : index
    %9 = vector.load %arg4[%c0_6, %c0_7] : memref<256x32xbf16, #tpu.memory_space<vmem>>, vector<256x32xbf16>
    tpu.vector_store %arg4[%c0_6, %c0_7], %8 {strides = array<i32>} : memref<256x32xbf16, #tpu.memory_space<vmem>>, vector<256x32xbf16>,
    return
  }
  func.func @transform_0(%arg0: i32) -> (i32, i32) {
    %c0_i32 = arith.constant 0 : i32
    %c0_i32_0 = arith.constant 0 : i32
    return %arg0, %c0_i32 : i32, i32
  }
  func.func @transform_1(%arg0: i32) -> (i32, i32) {
    %c0_i32 = arith.constant 0 : i32
    %c0_i32_0 = arith.constant 0 : i32
    %c0_i32_1 = arith.constant 0 : i32
    return %c0_i32, %c0_i32_0 : i32, i32
  }
  func.func @transform_2(%arg0: i32) -> (i32, i32) {
    %c0_i32 = arith.constant 0 : i32
    %c0_i32_0 = arith.constant 0 : i32
    %c0_i32_1 = arith.constant 0 : i32
    return %c0_i32, %c0_i32_0 : i32, i32
  }
  func.func @transform_3(%arg0: i32) -> (i32, i32) {
    %c0_i32 = arith.constant 0 : i32
    %c0_i32_0 = arith.constant 0 : i32
    return %arg0, %c0_i32 : i32, i32
  }
}

module attributes {stable_mosaic.version = 11 : i64} {
  func.func @_matmul_bias_kernel(%arg0: i32, %arg1: memref<168x512xbf16, #tpu.memory_space<vmem>>, %arg2: memref<512x64xbf16, #tpu.memory_space<vmem>>, %arg3: memref<1x64xf32, #tpu.memory_space<vmem>>, %arg4: memref<168x64xbf16, #tpu.memory_space<vmem>>) attributes {dimension_semantics = [#tpu.dimension_semantics<parallel>], iteration_bounds = array<i64: 1>, scalar_prefetch = 0 : i64, scratch_operands = 0 : i64, tpu.core_type = #tpu.core_type<tc>, window_params = [{transform_indices = @transform_0, window_bounds = array<i64: 168, 512>}, {pipeline_mode = #tpu.pipeline_mode<synchronous>, transform_indices = @transform_1, window_bounds = array<i64: 512, 64>}, {pipeline_mode = #tpu.pipeline_mode<synchronous>, transform_indices = @transform_2, window_bounds = array<i64: 1, 64>}, {transform_indices = @transform_3, window_bounds = array<i64: 168, 64>}]} {
    %c0 = arith.constant 0 : index
    %c0_0 = arith.constant 0 : index
    %0 = vector.load %arg1[%c0, %c0_0] : memref<168x512xbf16, #tpu.memory_space<vmem>>, vector<168x512xbf16>
    %c0_1 = arith.constant 0 : index
    %c0_2 = arith.constant 0 : index
    %1 = vector.load %arg2[%c0_1, %c0_2] : memref<512x64xbf16, #tpu.memory_space<vmem>>, vector<512x64xbf16>
    %cst = arith.constant dense<0.000000e+00> : vector<168x64xf32>
    %2 = tpu.matmul %0, %1, %cst {dimension_numbers = #tpu.dot_dimension_numbers<[1], [0], [0], [1], [0, 0, 1, 1], [], []>} : vector<168x512xbf16>, vector<512x64xbf16>, vector<168x64xf32> -> vector<168x64xf32>
    %c0_3 = arith.constant 0 : index
    %c0_4 = arith.constant 0 : index
    %3 = vector.load %arg3[%c0_3, %c0_4] : memref<1x64xf32, #tpu.memory_space<vmem>>, vector<1x64xf32>
    %4 = vector.broadcast %3 : vector<1x64xf32> to vector<168x64xf32>
    %5 = arith.addf %2, %4 : vector<168x64xf32>
    %cst_5 = arith.constant 0.000000e+00 : f32
    %6 = vector.broadcast %cst_5 : f32 to vector<168x64xf32>
    %7 = arith.maximumf %5, %6 : vector<168x64xf32>
    %8 = arith.truncf %7 : vector<168x64xf32> to vector<168x64xbf16>
    %c0_6 = arith.constant 0 : index
    %c0_7 = arith.constant 0 : index
    %9 = vector.load %arg4[%c0_6, %c0_7] : memref<168x64xbf16, #tpu.memory_space<vmem>>, vector<168x64xbf16>
    tpu.vector_store %arg4[%c0_6, %c0_7], %8 {strides = array<i32>} : memref<168x64xbf16, #tpu.memory_space<vmem>>, vector<168x64xbf16>,
    return
  }
  func.func @transform_0(%arg0: i32) -> (i32, i32) {
    %c0_i32 = arith.constant 0 : i32
    %c0_i32_0 = arith.constant 0 : i32
    return %arg0, %c0_i32 : i32, i32
  }
  func.func @transform_1(%arg0: i32) -> (i32, i32) {
    %c0_i32 = arith.constant 0 : i32
    %c0_i32_0 = arith.constant 0 : i32
    %c0_i32_1 = arith.constant 0 : i32
    return %c0_i32, %c0_i32_0 : i32, i32
  }
  func.func @transform_2(%arg0: i32) -> (i32, i32) {
    %c0_i32 = arith.constant 0 : i32
    %c0_i32_0 = arith.constant 0 : i32
    %c0_i32_1 = arith.constant 0 : i32
    return %c0_i32, %c0_i32_0 : i32, i32
  }
  func.func @transform_3(%arg0: i32) -> (i32, i32) {
    %c0_i32 = arith.constant 0 : i32
    %c0_i32_0 = arith.constant 0 : i32
    return %arg0, %c0_i32 : i32, i32
  }
}

module attributes {stable_mosaic.version = 11 : i64} {
  func.func @_matmul_bias_kernel(%arg0: i32, %arg1: memref<104x576xbf16, #tpu.memory_space<vmem>>, %arg2: memref<576x64xbf16, #tpu.memory_space<vmem>>, %arg3: memref<1x64xf32, #tpu.memory_space<vmem>>, %arg4: memref<104x64xbf16, #tpu.memory_space<vmem>>) attributes {dimension_semantics = [#tpu.dimension_semantics<parallel>], iteration_bounds = array<i64: 1>, scalar_prefetch = 0 : i64, scratch_operands = 0 : i64, tpu.core_type = #tpu.core_type<tc>, window_params = [{transform_indices = @transform_0, window_bounds = array<i64: 104, 576>}, {pipeline_mode = #tpu.pipeline_mode<synchronous>, transform_indices = @transform_1, window_bounds = array<i64: 576, 64>}, {pipeline_mode = #tpu.pipeline_mode<synchronous>, transform_indices = @transform_2, window_bounds = array<i64: 1, 64>}, {transform_indices = @transform_3, window_bounds = array<i64: 104, 64>}]} {
    %c0 = arith.constant 0 : index
    %c0_0 = arith.constant 0 : index
    %0 = vector.load %arg1[%c0, %c0_0] : memref<104x576xbf16, #tpu.memory_space<vmem>>, vector<104x576xbf16>
    %c0_1 = arith.constant 0 : index
    %c0_2 = arith.constant 0 : index
    %1 = vector.load %arg2[%c0_1, %c0_2] : memref<576x64xbf16, #tpu.memory_space<vmem>>, vector<576x64xbf16>
    %cst = arith.constant dense<0.000000e+00> : vector<104x64xf32>
    %2 = tpu.matmul %0, %1, %cst {dimension_numbers = #tpu.dot_dimension_numbers<[1], [0], [0], [1], [0, 0, 1, 1], [], []>} : vector<104x576xbf16>, vector<576x64xbf16>, vector<104x64xf32> -> vector<104x64xf32>
    %c0_3 = arith.constant 0 : index
    %c0_4 = arith.constant 0 : index
    %3 = vector.load %arg3[%c0_3, %c0_4] : memref<1x64xf32, #tpu.memory_space<vmem>>, vector<1x64xf32>
    %4 = vector.broadcast %3 : vector<1x64xf32> to vector<104x64xf32>
    %5 = arith.addf %2, %4 : vector<104x64xf32>
    %6 = arith.truncf %5 : vector<104x64xf32> to vector<104x64xbf16>
    %c0_5 = arith.constant 0 : index
    %c0_6 = arith.constant 0 : index
    %7 = vector.load %arg4[%c0_5, %c0_6] : memref<104x64xbf16, #tpu.memory_space<vmem>>, vector<104x64xbf16>
    tpu.vector_store %arg4[%c0_5, %c0_6], %6 {strides = array<i32>} : memref<104x64xbf16, #tpu.memory_space<vmem>>, vector<104x64xbf16>,
    return
  }
  func.func @transform_0(%arg0: i32) -> (i32, i32) {
    %c0_i32 = arith.constant 0 : i32
    %c0_i32_0 = arith.constant 0 : i32
    return %arg0, %c0_i32 : i32, i32
  }
  func.func @transform_1(%arg0: i32) -> (i32, i32) {
    %c0_i32 = arith.constant 0 : i32
    %c0_i32_0 = arith.constant 0 : i32
    %c0_i32_1 = arith.constant 0 : i32
    return %c0_i32, %c0_i32_0 : i32, i32
  }
  func.func @transform_2(%arg0: i32) -> (i32, i32) {
    %c0_i32 = arith.constant 0 : i32
    %c0_i32_0 = arith.constant 0 : i32
    %c0_i32_1 = arith.constant 0 : i32
    return %c0_i32, %c0_i32_0 : i32, i32
  }
  func.func @transform_3(%arg0: i32) -> (i32, i32) {
    %c0_i32 = arith.constant 0 : i32
    %c0_i32_0 = arith.constant 0 : i32
    return %arg0, %c0_i32 : i32, i32
  }
}

module attributes {stable_mosaic.version = 11 : i64} {
  func.func @_fused_mlp_kernel(%arg0: i32, %arg1: memref<8x3136xbf16, #tpu.memory_space<vmem>>, %arg2: memref<3136x256xbf16, #tpu.memory_space<vmem>>, %arg3: memref<1x256xf32, #tpu.memory_space<vmem>>, %arg4: memref<256x128xbf16, #tpu.memory_space<vmem>>, %arg5: memref<1x128xf32, #tpu.memory_space<vmem>>, %arg6: memref<8x128xf32, #tpu.memory_space<vmem>>) attributes {dimension_semantics = [#tpu.dimension_semantics<parallel>], iteration_bounds = array<i64: 1>, scalar_prefetch = 0 : i64, scratch_operands = 0 : i64, tpu.core_type = #tpu.core_type<tc>, window_params = [{transform_indices = @transform_0, window_bounds = array<i64: 8, 3136>}, {pipeline_mode = #tpu.pipeline_mode<synchronous>, transform_indices = @transform_1, window_bounds = array<i64: 3136, 256>}, {pipeline_mode = #tpu.pipeline_mode<synchronous>, transform_indices = @transform_2, window_bounds = array<i64: 1, 256>}, {pipeline_mode = #tpu.pipeline_mode<synchronous>, transform_indices = @transform_3, window_bounds = array<i64: 256, 128>}, {pipeline_mode = #tpu.pipeline_mode<synchronous>, transform_indices = @transform_4, window_bounds = array<i64: 1, 128>}, {transform_indices = @transform_5, window_bounds = array<i64: 8, 128>}]} {
    %c0 = arith.constant 0 : index
    %c0_0 = arith.constant 0 : index
    %0 = vector.load %arg1[%c0, %c0_0] : memref<8x3136xbf16, #tpu.memory_space<vmem>>, vector<8x3136xbf16>
    %c0_1 = arith.constant 0 : index
    %c0_2 = arith.constant 0 : index
    %1 = vector.load %arg2[%c0_1, %c0_2] : memref<3136x256xbf16, #tpu.memory_space<vmem>>, vector<3136x256xbf16>
    %cst = arith.constant dense<0.000000e+00> : vector<8x256xf32>
    %2 = tpu.matmul %0, %1, %cst {dimension_numbers = #tpu.dot_dimension_numbers<[1], [0], [0], [1], [0, 0, 1, 1], [], []>} : vector<8x3136xbf16>, vector<3136x256xbf16>, vector<8x256xf32> -> vector<8x256xf32>
    %c0_3 = arith.constant 0 : index
    %c0_4 = arith.constant 0 : index
    %3 = vector.load %arg3[%c0_3, %c0_4] : memref<1x256xf32, #tpu.memory_space<vmem>>, vector<1x256xf32>
    %4 = vector.broadcast %3 : vector<1x256xf32> to vector<8x256xf32>
    %5 = arith.addf %2, %4 : vector<8x256xf32>
    %cst_5 = arith.constant 0.000000e+00 : f32
    %6 = vector.broadcast %cst_5 : f32 to vector<8x256xf32>
    %7 = arith.maximumf %5, %6 : vector<8x256xf32>
    %8 = arith.truncf %7 : vector<8x256xf32> to vector<8x256xbf16>
    %c0_6 = arith.constant 0 : index
    %c0_7 = arith.constant 0 : index
    %9 = vector.load %arg4[%c0_6, %c0_7] : memref<256x128xbf16, #tpu.memory_space<vmem>>, vector<256x128xbf16>
    %cst_8 = arith.constant dense<0.000000e+00> : vector<8x128xf32>
    %10 = tpu.matmul %8, %9, %cst_8 {dimension_numbers = #tpu.dot_dimension_numbers<[1], [0], [0], [1], [0, 0, 1, 1], [], []>} : vector<8x256xbf16>, vector<256x128xbf16>, vector<8x128xf32> -> vector<8x128xf32>
    %c0_9 = arith.constant 0 : index
    %c0_10 = arith.constant 0 : index
    %11 = vector.load %arg5[%c0_9, %c0_10] : memref<1x128xf32, #tpu.memory_space<vmem>>, vector<1x128xf32>
    %12 = vector.broadcast %11 : vector<1x128xf32> to vector<8x128xf32>
    %13 = arith.addf %10, %12 : vector<8x128xf32>
    %c0_11 = arith.constant 0 : index
    %c0_12 = arith.constant 0 : index
    %14 = vector.load %arg6[%c0_11, %c0_12] : memref<8x128xf32, #tpu.memory_space<vmem>>, vector<8x128xf32>
    tpu.vector_store %arg6[%c0_11, %c0_12], %13 {strides = array<i32>} : memref<8x128xf32, #tpu.memory_space<vmem>>, vector<8x128xf32>,
    return
  }
  func.func @transform_0(%arg0: i32) -> (i32, i32) {
    %c0_i32 = arith.constant 0 : i32
    %c0_i32_0 = arith.constant 0 : i32
    return %arg0, %c0_i32 : i32, i32
  }
  func.func @transform_1(%arg0: i32) -> (i32, i32) {
    %c0_i32 = arith.constant 0 : i32
    %c0_i32_0 = arith.constant 0 : i32
    %c0_i32_1 = arith.constant 0 : i32
    return %c0_i32, %c0_i32_0 : i32, i32
  }
  func.func @transform_2(%arg0: i32) -> (i32, i32) {
    %c0_i32 = arith.constant 0 : i32
    %c0_i32_0 = arith.constant 0 : i32
    %c0_i32_1 = arith.constant 0 : i32
    return %c0_i32, %c0_i32_0 : i32, i32
  }
  func.func @transform_3(%arg0: i32) -> (i32, i32) {
    %c0_i32 = arith.constant 0 : i32
    %c0_i32_0 = arith.constant 0 : i32
    %c0_i32_1 = arith.constant 0 : i32
    return %c0_i32, %c0_i32_0 : i32, i32
  }
  func.func @transform_4(%arg0: i32) -> (i32, i32) {
    %c0_i32 = arith.constant 0 : i32
    %c0_i32_0 = arith.constant 0 : i32
    %c0_i32_1 = arith.constant 0 : i32
    return %c0_i32, %c0_i32_0 : i32, i32
  }
  func.func @transform_5(%arg0: i32) -> (i32, i32) {
    %c0_i32 = arith.constant 0 : i32
    %c0_i32_0 = arith.constant 0 : i32
    return %arg0, %c0_i32 : i32, i32
  }
}

</mosaic_0001>

<bundles_post_ra>
// kernel: network_forward.4
= control target key start
LH: loop header
LB: loop body
LE: loop exit
PB: predicated region body
PF: predicated region fallthrough
CT: control target
= control target key end

     0   :  { %s1269_s12 = smov 0   ;;  %s1475_s0 = inlined_call_operand.vmem [shape: bf16[1024,256], index: 0, kind: input, shape index: {}]   ;;  %s1476_s1 = inlined_call_operand.vmem [shape: bf16[256,32], index: 1, kind: input, shape index: {}]   ;;  %s1477_s2 = inlined_call_operand.vmem [shape: f32[1,32], index: 2, kind: input, shape index: {}]   ;;  %s1478_s3 = inlined_call_operand.vmem [shape: bf16[1024,32], index: 3, kind: output, shape index: {}]  }
   0x1 LB: > { %s915_s13 = sadd.s32 4294967295, %s1247_s12   ;;  %p919_p0 = scmp.ge.s32.totalorder %s1247_s12, 1  ;;  %s1247_s12 = sphi %s1269_s12, %s13_s12  }
   0x2   : > { %p139_p1 = scmp.lt.s32.totalorder %s1247_s12, 5 }
   0x4   : > { %p140_p2 = pnand %p919_p0, %p139_p1 }
   0x5   : > { %v1177_v0 = vld [vmem:[%s1476_s1 + $0x40] sm:$0xff] (!%p140_p2)   ;;  %s920_s16 = sshll.u32 (!%p140_p2), %s915_s13, 5  ;;  %v1179_v2 = vld [vmem:[%s1476_s1 + $0x48] sm:$0xff] (!%p140_p2)   ;;  %v1181_v4 = vld [vmem:[%s1476_s1 + $0x50] sm:$0xff] (!%p140_p2)   ;;  %vm826_vm0 = vcmask (!%p140_p2), 257024  }
   0x6   : > { %143 = sbr.rel (%p140_p2) target bundleno = 318 (0x13e), region = 32  ;;  %v1178_v1 = vld [vmem:[%s1476_s1] sm:$0xff] (!%p140_p2)   ;;  %1041 = vmatprep.subr.bf16.mxu0 (!%p140_p2), %v1177_v0  ;;  %1153 = vmatprep.subr.bf16.mxu1 (!%p140_p2), %v1177_v0  ;;  %v1180_v3 = vld [vmem:[%s1476_s1 + $0x8] sm:$0xff] (!%p140_p2)   ;;  %p165_p3 = scmp.lt.s32.totalorder (!%p140_p2), %s920_s16, 127  ;;  %v1182_v5 = vld [vmem:[%s1476_s1 + $0x10] sm:$0xff] (!%p140_p2)  }
   0x7   : > { %1042 = vmatpush3.bf16.msra.mxu0 (!%p140_p2), %v1178_v1  ;;  %1161 = vmatpush3.bf16.msra.mxu1 (!%p140_p2), %v1178_v1  ;;  %v1183_v6 = vld [vmem:[%s1476_s1 + $0x58] sm:$0xff] (!%p140_p2)   ;;  %v1185_v8 = vld [vmem:[%s1476_s1 + $0x60] sm:$0xff] (!%p140_p2)   ;;  %v1187_v10 = vld [vmem:[%s1476_s1 + $0x68] sm:$0xff] (!%p140_p2)  }
   0x8   : > { %1043 = vmatprep.subr.bf16.mxu0 (!%p140_p2), %v1179_v2  ;;  %1154 = vmatprep.subr.bf16.mxu1 (!%p140_p2), %v1179_v2  ;;  %v1184_v7 = vld [vmem:[%s1476_s1 + $0x18] sm:$0xff] (!%p140_p2)   ;;  %v1186_v9 = vld [vmem:[%s1476_s1 + $0x20] sm:$0xff] (!%p140_p2)   ;;  %v1188_v13 = vld [vmem:[%s1476_s1 + $0x28] sm:$0xff] (!%p140_p2)  }
   0x9   : > { %v1189_v14 = vld [vmem:[%s1476_s1 + $0x70] sm:$0xff] (!%p140_p2)   ;;  %v1191_v16 = vld [vmem:[%s1476_s1 + $0x78] sm:$0xff] (!%p140_p2)   ;;  %v1368_v50 = vld [vmem:[%s1477_s2] ss:$0 sm:$0xff] (!%p140_p2) }
   0xa   : > { %v1190_v15 = vld [vmem:[%s1476_s1 + $0x30] sm:$0xff] (!%p140_p2)   ;;  %v1192_v17 = vld [vmem:[%s1476_s1 + $0x38] sm:$0xff] (!%p140_p2)  }
   0xb   : > { %1044 = vmatpush3.bf16.msra.mxu0 (!%p140_p2), %v1180_v3  ;;  %1162 = vmatpush3.bf16.msra.mxu1 (!%p140_p2), %v1180_v3 }
   0xc   : > { %1045 = vmatprep.subr.bf16.mxu0 (!%p140_p2), %v1181_v4  ;;  %1155 = vmatprep.subr.bf16.mxu1 (!%p140_p2), %v1181_v4 }
   0xd   : > { %s1480_s16 = smov (!%p165_p3, %s920_s16), 127 }
   0xe   : > { %s1008_s4 = sshll.u32 %s1480_s16, 3  ;;  %s924_s28 = sshll.u32 %s1480_s16, 2 }
   0xf   : > { %1046 = vmatpush3.bf16.msra.mxu0 %v1182_v5  ;;  %1163 = vmatpush3.bf16.msra.mxu1 %v1182_v5  ;;  %s1310_s9 = scalar_lea.vmem %s1475_s0, %s1008_s4  ;;  %s1378_s4 = scalar_lea.vmem %s1478_s3, %s924_s28 }
  0x10   : > { %1047 = vmatprep.subr.bf16.mxu0 %v1183_v6  ;;  %1156 = vmatprep.subr.bf16.mxu1 %v1183_v6  ;;  %v1195_v11 = vld [vmem:[%s1310_s9 + $0x4] ss:$8 sps:$4 sm:$0xff]   ;;  %v1193_v18 = vld [vmem:[%s1310_s9] ss:$8 sps:$4 sm:$0xff]   ;;  %v1199_v20 = vld [vmem:[%s1310_s9 + $0x14] ss:$8 sps:$4 sm:$0xff]  }
  0x11   : > { %v1198_v12 = vld [vmem:[%s1310_s9 + $0x84] ss:$8 sps:$4 sm:$0xff]   ;;  %537 = vmatprep.mubr.bf16.mxu0 %v1195_v11  ;;  %v1196_v19 = vld [vmem:[%s1310_s9 + $0x80] ss:$8 sps:$4 sm:$0xff]   ;;  %v1201_v21 = vld [vmem:[%s1310_s9 + $0x94] ss:$8 sps:$4 sm:$0xff]  }
  0x12   : > { %601 = vmatprep.mubr.bf16.mxu1 %v1198_v12  ;;  %v1203_v22 = vld [vmem:[%s1310_s9 + $0x10] ss:$8 sps:$4 sm:$0xff]   ;;  %v1205_v24 = vld [vmem:[%s1310_s9 + $0x24] ss:$8 sps:$4 sm:$0xff]   ;;  %v1209_v26 = vld [vmem:[%s1310_s9 + $0x20] ss:$8 sps:$4 sm:$0xff]  }
  0x13   : > { %1048 = vmatpush3.bf16.msra.mxu0 %v1184_v7  ;;  %1164 = vmatpush3.bf16.msra.mxu1 %v1184_v7  ;;  %v1204_v23 = vld [vmem:[%s1310_s9 + $0x90] ss:$8 sps:$4 sm:$0xff]   ;;  %v1207_v25 = vld [vmem:[%s1310_s9 + $0xa4] ss:$8 sps:$4 sm:$0xff]   ;;  %v1210_v27 = vld [vmem:[%s1310_s9 + $0xa0] ss:$8 sps:$4 sm:$0xff]  }
  0x14   : > { %1049 = vmatprep.subr.bf16.mxu0 %v1185_v8  ;;  %1157 = vmatprep.subr.bf16.mxu1 %v1185_v8  ;;  %v1211_v28 = vld [vmem:[%s1310_s9 + $0x34] ss:$8 sps:$4 sm:$0xff]   ;;  %v1215_v30 = vld [vmem:[%s1310_s9 + $0x30] ss:$8 sps:$4 sm:$0xff]   ;;  %v1217_v32 = vld [vmem:[%s1310_s9 + $0x44] ss:$8 sps:$4 sm:$0xff]  }
  0x15   : > { %v1213_v29 = vld [vmem:[%s1310_s9 + $0xb4] ss:$8 sps:$4 sm:$0xff]   ;;  %v1216_v31 = vld [vmem:[%s1310_s9 + $0xb0] ss:$8 sps:$4 sm:$0xff]   ;;  %v1219_v33 = vld [vmem:[%s1310_s9 + $0xc4] ss:$8 sps:$4 sm:$0xff]  }
  0x16   : > { %v1221_v34 = vld [vmem:[%s1310_s9 + $0x40] ss:$8 sps:$4 sm:$0xff]   ;;  %v1223_v36 = vld [vmem:[%s1310_s9 + $0x54] ss:$8 sps:$4 sm:$0xff]   ;;  %v1227_v38 = vld [vmem:[%s1310_s9 + $0x50] ss:$8 sps:$4 sm:$0xff]  }
  0x17   : > { %1050 = vmatpush3.bf16.msra.mxu0 %v1186_v9  ;;  %1165 = vmatpush3.bf16.msra.mxu1 %v1186_v9  ;;  %v1222_v35 = vld [vmem:[%s1310_s9 + $0xc0] ss:$8 sps:$4 sm:$0xff]   ;;  %v1225_v37 = vld [vmem:[%s1310_s9 + $0xd4] ss:$8 sps:$4 sm:$0xff]   ;;  %v1228_v39 = vld [vmem:[%s1310_s9 + $0xd0] ss:$8 sps:$4 sm:$0xff]  }
  0x18   : > { %1051 = vmatprep.subr.bf16.mxu0 %v1187_v10  ;;  %1158 = vmatprep.subr.bf16.mxu1 %v1187_v10  ;;  %v1229_v40 = vld [vmem:[%s1310_s9 + $0x64] ss:$8 sps:$4 sm:$0xff]   ;;  %v1233_v42 = vld [vmem:[%s1310_s9 + $0x60] ss:$8 sps:$4 sm:$0xff]   ;;  %v1235_v44 = vld [vmem:[%s1310_s9 + $0x74] ss:$8 sps:$4 sm:$0xff]  }
  0x19   : > { %v1231_v41 = vld [vmem:[%s1310_s9 + $0xe4] ss:$8 sps:$4 sm:$0xff]   ;;  %v1234_v43 = vld [vmem:[%s1310_s9 + $0xe0] ss:$8 sps:$4 sm:$0xff]   ;;  %v1237_v45 = vld [vmem:[%s1310_s9 + $0xf4] ss:$8 sps:$4 sm:$0xff]  }
  0x1a   : > { %v1239_v46 = vld [vmem:[%s1310_s9 + $0x70] ss:$8 sps:$4 sm:$0xff]  }
  0x1b   : > { %1052 = vmatpush3.bf16.msra.mxu0 %v1188_v13  ;;  %1166 = vmatpush3.bf16.msra.mxu1 %v1188_v13  ;;  %v1240_v47 = vld [vmem:[%s1310_s9 + $0xf0] ss:$8 sps:$4 sm:$0xff]  }
  0x1c   : > { %1053 = vmatprep.subr.bf16.mxu0 %v1189_v14  ;;  %1159 = vmatprep.subr.bf16.mxu1 %v1189_v14 }
  0x1f   : > { %1054 = vmatpush3.bf16.msra.mxu0 %v1190_v15  ;;  %1167 = vmatpush3.bf16.msra.mxu1 %v1190_v15 }
  0x20   : > { %1055 = vmatprep.subr.bf16.mxu0 %v1191_v16  ;;  %1160 = vmatprep.subr.bf16.mxu1 %v1191_v16 }
  0x23   : > { %1056 = vmatpush3.bf16.msra.mxu0 %v1192_v17  ;;  %1168 = vmatpush3.bf16.msra.mxu1 %v1192_v17 }
  0x26   : > { %538 = vmatmul.mubr.bf16.vlgmr.msra.gmra.mrb[0].mxu0 %v1193_v18  ;;  %602 = vmatmul.mubr.bf16.vlgmr.msra.gmra.mrb[0].mxu1 %v1196_v19 }
  0x27   : > { %545 = vmatprep.mubr.bf16.mxu0 %v1199_v20  ;;  %609 = vmatprep.mubr.bf16.mxu1 %v1201_v21 }
  0x2e   : > { %546 = vmatmul.mubr.bf16.gmra.mrb[4].mxu0 %v1203_v22  ;;  %610 = vmatmul.mubr.bf16.gmra.mrb[4].mxu1 %v1204_v23 }
  0x2f   : > { %553 = vmatprep.mubr.bf16.mxu0 %v1205_v24  ;;  %617 = vmatprep.mubr.bf16.mxu1 %v1207_v25 }
  0x36   : > { %554 = vmatmul.mubr.bf16.gmra.mrb[8].mxu0 %v1209_v26  ;;  %618 = vmatmul.mubr.bf16.gmra.mrb[8].mxu1 %v1210_v27 }
  0x37   : > { %561 = vmatprep.mubr.bf16.mxu0 %v1211_v28  ;;  %625 = vmatprep.mubr.bf16.mxu1 %v1213_v29 }
  0x3e   : > { %562 = vmatmul.mubr.bf16.gmra.mrb[12].mxu0 %v1215_v30  ;;  %626 = vmatmul.mubr.bf16.gmra.mrb[12].mxu1 %v1216_v31 }
  0x3f   : > { %569 = vmatprep.mubr.bf16.mxu0 %v1217_v32  ;;  %633 = vmatprep.mubr.bf16.mxu1 %v1219_v33 }
  0x46   : > { %570 = vmatmul.mubr.bf16.gmra.mrb[16].mxu0 %v1221_v34  ;;  %634 = vmatmul.mubr.bf16.gmra.mrb[16].mxu1 %v1222_v35 }
  0x47   : > { %577 = vmatprep.mubr.bf16.mxu0 %v1223_v36  ;;  %641 = vmatprep.mubr.bf16.mxu1 %v1225_v37 }
  0x4e   : > { %578 = vmatmul.mubr.bf16.gmra.mrb[20].mxu0 %v1227_v38  ;;  %642 = vmatmul.mubr.bf16.gmra.mrb[20].mxu1 %v1228_v39 }
  0x4f   : > { %585 = vmatprep.mubr.bf16.mxu0 %v1229_v40  ;;  %649 = vmatprep.mubr.bf16.mxu1 %v1231_v41 }
  0x56   : > { %586 = vmatmul.mubr.bf16.gmra.mrb[24].mxu0 %v1233_v42  ;;  %650 = vmatmul.mubr.bf16.gmra.mrb[24].mxu1 %v1234_v43 }
  0x57   : > { %593 = vmatprep.mubr.bf16.mxu0 %v1235_v44  ;;  %657 = vmatprep.mubr.bf16.mxu1 %v1237_v45 }
  0x5e   : > { %594 = vmatmul.mubr.bf16.gmra.mrb[28].mxu0 %v1239_v46  ;;  %658 = vmatmul.mubr.bf16.gmra.mrb[28].mxu1 %v1240_v47 }
  0xf9   : > { %v1057_v48 = vpop.f32.mrb[0].mxu0  ;;  %v1105_v49 = vpop.f32.mrb[0].mxu1 }
  0xfa   : > { %v1058_v51 = vpop.f32.mrb[1].mxu0  ;;  %v1106_v52 = vpop.f32.mrb[1].mxu1 }
  0xfb   : > { %v1059_v53 = vadd.f32 %v1058_v51, %v1057_v48  ;;  %v1107_v54 = vadd.f32 %v1106_v52, %v1105_v49  ;;  %v1060_v55 = vpop.f32.mrb[2].mxu0  ;;  %v1108_v56 = vpop.f32.mrb[2].mxu1 }
  0xfc   : > { %v1061_v57 = vpop.f32.mrb[3].mxu0  ;;  %v1109_v58 = vpop.f32.mrb[3].mxu1 }
  0xfd   : > { %v540_v59 = vadd.f32 %v1059_v53, %v1368_v50  ;;  %v604_v60 = vadd.f32 %v1107_v54, %v1368_v50  ;;  %v1062_v61 = vadd.f32 %v1061_v57, %v1060_v55  ;;  %v1110_v62 = vadd.f32 %v1109_v58, %v1108_v56 }
  0xff   : > { %v666_v63 = vmax.f32 %v540_v59, 0.0  ;;  %v682_v0 = vmax.f32 %v604_v60, 0.0  ;;  %v543_v1 = vadd.f32 %v1062_v61, %v1368_v50  ;;  %v607_v2 = vadd.f32 %v1110_v62, %v1368_v50 }
 0x101   : > { %v1009_v3 = vpack.c.bf16 %v666_v63, %v666_v63  ;;  %v1025_v4 = vpack.c.bf16 %v682_v0, %v682_v0  ;;  %v667_v5 = vmax.f32 %v543_v1, 0.0  ;;  %v683_v6 = vmax.f32 %v607_v2, 0.0  ;;  %v1063_v7 = vpop.f32.mrb[4].mxu0  ;;  %v1111_v8 = vpop.f32.mrb[4].mxu1 }
 0x102   : > { %v1064_v9 = vpop.f32.mrb[5].mxu0  ;;  %v1112_v10 = vpop.f32.mrb[5].mxu1 }
 0x103   : > { %827 = vst.msk [vmem:[%s1378_s4] sm:$0xf] %vm826_vm0, %v1009_v3  ;;  %843 = vst.msk [vmem:[%s1378_s4 + $0x40] sm:$0xf] %vm826_vm0, %v1025_v4  ;;  %v1010_v11 = vpack.c.bf16 %v667_v5, %v667_v5  ;;  %v1026_v12 = vpack.c.bf16 %v683_v6, %v683_v6  ;;  %v1065_v13 = vadd.f32 %v1064_v9, %v1063_v7  ;;  %v1066_v15 = vpop.f32.mrb[6].mxu0  ;;  %v1114_v16 = vpop.f32.mrb[6].mxu1 }
 0x104   : > { %v1113_v14 = vadd.f32 %v1112_v10, %v1111_v8  ;;  %v1067_v17 = vpop.f32.mrb[7].mxu0  ;;  %v1115_v18 = vpop.f32.mrb[7].mxu1 }
 0x105   : > { %828 = vst.msk [vmem:[%s1378_s4 + $0x4] sm:$0xf] %vm826_vm0, %v1010_v11  ;;  %844 = vst.msk [vmem:[%s1378_s4 + $0x44] sm:$0xf] %vm826_vm0, %v1026_v12  ;;  %v548_v19 = vadd.f32 %v1065_v13, %v1368_v50  ;;  %v1068_v21 = vadd.f32 %v1067_v17, %v1066_v15  ;;  %v1116_v22 = vadd.f32 %v1115_v18, %v1114_v16 }
 0x106   : > { %v612_v20 = vadd.f32 %v1113_v14, %v1368_v50 }
 0x107   : > { %v668_v23 = vmax.f32 %v548_v19, 0.0  ;;  %v551_v25 = vadd.f32 %v1068_v21, %v1368_v50  ;;  %v615_v26 = vadd.f32 %v1116_v22, %v1368_v50 }
 0x108   : > { %v684_v24 = vmax.f32 %v612_v20, 0.0 }
 0x109   : > { %v1011_v27 = vpack.c.bf16 %v668_v23, %v668_v23  ;;  %v669_v29 = vmax.f32 %v551_v25, 0.0  ;;  %v685_v30 = vmax.f32 %v615_v26, 0.0  ;;  %v1069_v31 = vpop.f32.mrb[8].mxu0  ;;  %v1117_v32 = vpop.f32.mrb[8].mxu1 }
 0x10a   : > { %v1027_v28 = vpack.c.bf16 %v684_v24, %v684_v24  ;;  %v1070_v33 = vpop.f32.mrb[9].mxu0  ;;  %v1118_v34 = vpop.f32.mrb[9].mxu1 }
 0x10b   : > { %829 = vst.msk [vmem:[%s1378_s4 + $0x8] sm:$0xf] %vm826_vm0, %v1011_v27  ;;  %v1012_v35 = vpack.c.bf16 %v669_v29, %v669_v29  ;;  %v1028_v36 = vpack.c.bf16 %v685_v30, %v685_v30  ;;  %v1071_v37 = vadd.f32 %v1070_v33, %v1069_v31  ;;  %v1119_v38 = vadd.f32 %v1118_v34, %v1117_v32  ;;  %v1072_v39 = vpop.f32.mrb[10].mxu0  ;;  %v1120_v40 = vpop.f32.mrb[10].mxu1 }
 0x10c   : > { %845 = vst.msk [vmem:[%s1378_s4 + $0x48] sm:$0xf] %vm826_vm0, %v1027_v28  ;;  %v1073_v41 = vpop.f32.mrb[11].mxu0  ;;  %v1121_v42 = vpop.f32.mrb[11].mxu1 }
 0x10d   : > { %830 = vst.msk [vmem:[%s1378_s4 + $0xc] sm:$0xf] %vm826_vm0, %v1012_v35  ;;  %846 = vst.msk [vmem:[%s1378_s4 + $0x4c] sm:$0xf] %vm826_vm0, %v1028_v36  ;;  %v556_v43 = vadd.f32 %v1071_v37, %v1368_v50  ;;  %v620_v44 = vadd.f32 %v1119_v38, %v1368_v50  ;;  %v1074_v45 = vadd.f32 %v1073_v41, %v1072_v39 }
 0x10e   : > { %v1122_v46 = vadd.f32 %v1121_v42, %v1120_v40 }
 0x10f   : > { %v670_v47 = vmax.f32 %v556_v43, 0.0  ;;  %v686_v48 = vmax.f32 %v620_v44, 0.0  ;;  %v559_v49 = vadd.f32 %v1074_v45, %v1368_v50 }
 0x110   : > { %v623_v51 = vadd.f32 %v1122_v46, %v1368_v50 }
 0x111   : > { %v1013_v52 = vpack.c.bf16 %v670_v47, %v670_v47  ;;  %v1029_v53 = vpack.c.bf16 %v686_v48, %v686_v48  ;;  %v671_v54 = vmax.f32 %v559_v49, 0.0  ;;  %v1075_v56 = vpop.f32.mrb[12].mxu0  ;;  %v1123_v57 = vpop.f32.mrb[12].mxu1 }
 0x112   : > { %v687_v55 = vmax.f32 %v623_v51, 0.0  ;;  %v1076_v58 = vpop.f32.mrb[13].mxu0  ;;  %v1124_v59 = vpop.f32.mrb[13].mxu1 }
 0x113   : > { %831 = vst.msk [vmem:[%s1378_s4 + $0x10] sm:$0xf] %vm826_vm0, %v1013_v52  ;;  %847 = vst.msk [vmem:[%s1378_s4 + $0x50] sm:$0xf] %vm826_vm0, %v1029_v53  ;;  %v1014_v60 = vpack.c.bf16 %v671_v54, %v671_v54  ;;  %v1077_v62 = vadd.f32 %v1076_v58, %v1075_v56  ;;  %v1125_v63 = vadd.f32 %v1124_v59, %v1123_v57  ;;  %v1078_v0 = vpop.f32.mrb[14].mxu0  ;;  %v1126_v1 = vpop.f32.mrb[14].mxu1 }
 0x114   : > { %v1030_v61 = vpack.c.bf16 %v687_v55, %v687_v55  ;;  %v1079_v2 = vpop.f32.mrb[15].mxu0  ;;  %v1127_v3 = vpop.f32.mrb[15].mxu1 }
 0x115   : > { %832 = vst.msk [vmem:[%s1378_s4 + $0x14] sm:$0xf] %vm826_vm0, %v1014_v60  ;;  %v564_v4 = vadd.f32 %v1077_v62, %v1368_v50  ;;  %v628_v5 = vadd.f32 %v1125_v63, %v1368_v50  ;;  %v1080_v6 = vadd.f32 %v1079_v2, %v1078_v0  ;;  %v1128_v7 = vadd.f32 %v1127_v3, %v1126_v1 }
 0x116   : > { %848 = vst.msk [vmem:[%s1378_s4 + $0x54] sm:$0xf] %vm826_vm0, %v1030_v61 }
 0x117   : > { %v672_v8 = vmax.f32 %v564_v4, 0.0  ;;  %v688_v9 = vmax.f32 %v628_v5, 0.0  ;;  %v567_v10 = vadd.f32 %v1080_v6, %v1368_v50  ;;  %v631_v11 = vadd.f32 %v1128_v7, %v1368_v50 }
 0x119   : > { %v1015_v12 = vpack.c.bf16 %v672_v8, %v672_v8  ;;  %v1031_v13 = vpack.c.bf16 %v688_v9, %v688_v9  ;;  %v673_v14 = vmax.f32 %v567_v10, 0.0  ;;  %v689_v15 = vmax.f32 %v631_v11, 0.0  ;;  %v1081_v16 = vpop.f32.mrb[16].mxu0  ;;  %v1129_v17 = vpop.f32.mrb[16].mxu1 }
 0x11a   : > { %v1082_v18 = vpop.f32.mrb[17].mxu0  ;;  %v1130_v19 = vpop.f32.mrb[17].mxu1 }
 0x11b   : > { %833 = vst.msk [vmem:[%s1378_s4 + $0x18] sm:$0xf] %vm826_vm0, %v1015_v12  ;;  %849 = vst.msk [vmem:[%s1378_s4 + $0x58] sm:$0xf] %vm826_vm0, %v1031_v13  ;;  %v1016_v20 = vpack.c.bf16 %v673_v14, %v673_v14  ;;  %v1032_v21 = vpack.c.bf16 %v689_v15, %v689_v15  ;;  %v1083_v22 = vadd.f32 %v1082_v18, %v1081_v16  ;;  %v1084_v24 = vpop.f32.mrb[18].mxu0  ;;  %v1132_v25 = vpop.f32.mrb[18].mxu1 }
 0x11c   : > { %v1131_v23 = vadd.f32 %v1130_v19, %v1129_v17  ;;  %v1085_v26 = vpop.f32.mrb[19].mxu0  ;;  %v1133_v27 = vpop.f32.mrb[19].mxu1 }
 0x11d   : > { %834 = vst.msk [vmem:[%s1378_s4 + $0x1c] sm:$0xf] %vm826_vm0, %v1016_v20  ;;  %850 = vst.msk [vmem:[%s1378_s4 + $0x5c] sm:$0xf] %vm826_vm0, %v1032_v21  ;;  %v572_v28 = vadd.f32 %v1083_v22, %v1368_v50  ;;  %v1086_v30 = vadd.f32 %v1085_v26, %v1084_v24  ;;  %v1134_v31 = vadd.f32 %v1133_v27, %v1132_v25 }
 0x11e   : > { %v636_v29 = vadd.f32 %v1131_v23, %v1368_v50 }
 0x11f   : > { %v674_v32 = vmax.f32 %v572_v28, 0.0  ;;  %v575_v34 = vadd.f32 %v1086_v30, %v1368_v50  ;;  %v639_v35 = vadd.f32 %v1134_v31, %v1368_v50 }
 0x120   : > { %v690_v33 = vmax.f32 %v636_v29, 0.0 }
 0x121   : > { %v1017_v36 = vpack.c.bf16 %v674_v32, %v674_v32  ;;  %v675_v38 = vmax.f32 %v575_v34, 0.0  ;;  %v691_v39 = vmax.f32 %v639_v35, 0.0  ;;  %v1087_v40 = vpop.f32.mrb[20].mxu0  ;;  %v1135_v41 = vpop.f32.mrb[20].mxu1 }
 0x122   : > { %v1033_v37 = vpack.c.bf16 %v690_v33, %v690_v33  ;;  %v1088_v42 = vpop.f32.mrb[21].mxu0  ;;  %v1136_v43 = vpop.f32.mrb[21].mxu1 }
 0x123   : > { %835 = vst.msk [vmem:[%s1378_s4 + $0x20] sm:$0xf] %vm826_vm0, %v1017_v36  ;;  %v1018_v44 = vpack.c.bf16 %v675_v38, %v675_v38  ;;  %v1034_v45 = vpack.c.bf16 %v691_v39, %v691_v39  ;;  %v1089_v46 = vadd.f32 %v1088_v42, %v1087_v40  ;;  %v1137_v47 = vadd.f32 %v1136_v43, %v1135_v41  ;;  %v1090_v48 = vpop.f32.mrb[22].mxu0  ;;  %v1138_v49 = vpop.f32.mrb[22].mxu1 }
 0x124   : > { %851 = vst.msk [vmem:[%s1378_s4 + $0x60] sm:$0xf] %vm826_vm0, %v1033_v37  ;;  %v1091_v51 = vpop.f32.mrb[23].mxu0  ;;  %v1139_v52 = vpop.f32.mrb[23].mxu1 }
 0x125   : > { %836 = vst.msk [vmem:[%s1378_s4 + $0x24] sm:$0xf] %vm826_vm0, %v1018_v44  ;;  %852 = vst.msk [vmem:[%s1378_s4 + $0x64] sm:$0xf] %vm826_vm0, %v1034_v45  ;;  %v580_v53 = vadd.f32 %v1089_v46, %v1368_v50  ;;  %v644_v54 = vadd.f32 %v1137_v47, %v1368_v50  ;;  %v1092_v55 = vadd.f32 %v1091_v51, %v1090_v48 }
 0x126   : > { %v1140_v56 = vadd.f32 %v1139_v52, %v1138_v49 }
 0x127   : > { %v676_v57 = vmax.f32 %v580_v53, 0.0  ;;  %v692_v58 = vmax.f32 %v644_v54, 0.0  ;;  %v583_v59 = vadd.f32 %v1092_v55, %v1368_v50 }
 0x128   : > { %v647_v60 = vadd.f32 %v1140_v56, %v1368_v50 }
 0x129   : > { %v1019_v61 = vpack.c.bf16 %v676_v57, %v676_v57  ;;  %v1035_v62 = vpack.c.bf16 %v692_v58, %v692_v58  ;;  %v677_v63 = vmax.f32 %v583_v59, 0.0  ;;  %v1093_v1 = vpop.f32.mrb[24].mxu0  ;;  %v1141_v2 = vpop.f32.mrb[24].mxu1 }
 0x12a   : > { %v693_v0 = vmax.f32 %v647_v60, 0.0  ;;  %v1094_v3 = vpop.f32.mrb[25].mxu0  ;;  %v1142_v4 = vpop.f32.mrb[25].mxu1 }
 0x12b   : > { %837 = vst.msk [vmem:[%s1378_s4 + $0x28] sm:$0xf] %vm826_vm0, %v1019_v61  ;;  %853 = vst.msk [vmem:[%s1378_s4 + $0x68] sm:$0xf] %vm826_vm0, %v1035_v62  ;;  %v1020_v5 = vpack.c.bf16 %v677_v63, %v677_v63  ;;  %v1095_v7 = vadd.f32 %v1094_v3, %v1093_v1  ;;  %v1143_v8 = vadd.f32 %v1142_v4, %v1141_v2  ;;  %v1096_v9 = vpop.f32.mrb[26].mxu0  ;;  %v1144_v10 = vpop.f32.mrb[26].mxu1 }
 0x12c   : > { %v1036_v6 = vpack.c.bf16 %v693_v0, %v693_v0  ;;  %v1097_v11 = vpop.f32.mrb[27].mxu0  ;;  %v1145_v12 = vpop.f32.mrb[27].mxu1 }
 0x12d   : > { %838 = vst.msk [vmem:[%s1378_s4 + $0x2c] sm:$0xf] %vm826_vm0, %v1020_v5  ;;  %v588_v13 = vadd.f32 %v1095_v7, %v1368_v50  ;;  %v652_v14 = vadd.f32 %v1143_v8, %v1368_v50  ;;  %v1098_v15 = vadd.f32 %v1097_v11, %v1096_v9  ;;  %v1146_v16 = vadd.f32 %v1145_v12, %v1144_v10 }
 0x12e   : > { %854 = vst.msk [vmem:[%s1378_s4 + $0x6c] sm:$0xf] %vm826_vm0, %v1036_v6 }
 0x12f   : > { %v678_v17 = vmax.f32 %v588_v13, 0.0  ;;  %v694_v18 = vmax.f32 %v652_v14, 0.0  ;;  %v591_v19 = vadd.f32 %v1098_v15, %v1368_v50  ;;  %v655_v20 = vadd.f32 %v1146_v16, %v1368_v50 }
 0x131   : > { %v1021_v21 = vpack.c.bf16 %v678_v17, %v678_v17  ;;  %v1037_v22 = vpack.c.bf16 %v694_v18, %v694_v18  ;;  %v679_v23 = vmax.f32 %v591_v19, 0.0  ;;  %v695_v24 = vmax.f32 %v655_v20, 0.0  ;;  %v1099_v25 = vpop.f32.mrb[28].mxu0  ;;  %v1147_v26 = vpop.f32.mrb[28].mxu1 }
 0x132   : > { %v1100_v27 = vpop.f32.mrb[29].mxu0  ;;  %v1148_v28 = vpop.f32.mrb[29].mxu1 }
 0x133   : > { %839 = vst.msk [vmem:[%s1378_s4 + $0x30] sm:$0xf] %vm826_vm0, %v1021_v21  ;;  %855 = vst.msk [vmem:[%s1378_s4 + $0x70] sm:$0xf] %vm826_vm0, %v1037_v22  ;;  %v1022_v29 = vpack.c.bf16 %v679_v23, %v679_v23  ;;  %v1038_v30 = vpack.c.bf16 %v695_v24, %v695_v24  ;;  %v1101_v31 = vadd.f32 %v1100_v27, %v1099_v25  ;;  %v1102_v33 = vpop.f32.mrb[30].mxu0  ;;  %v1150_v34 = vpop.f32.mrb[30].mxu1 }
 0x134   : > { %v1149_v32 = vadd.f32 %v1148_v28, %v1147_v26  ;;  %v1103_v35 = vpop.f32.mrb[31].mxu0  ;;  %v1151_v36 = vpop.f32.mrb[31].mxu1 }
 0x135   : > { %840 = vst.msk [vmem:[%s1378_s4 + $0x34] sm:$0xf] %vm826_vm0, %v1022_v29  ;;  %856 = vst.msk [vmem:[%s1378_s4 + $0x74] sm:$0xf] %vm826_vm0, %v1038_v30  ;;  %v596_v37 = vadd.f32 %v1101_v31, %v1368_v50  ;;  %v1104_v39 = vadd.f32 %v1103_v35, %v1102_v33  ;;  %v1152_v40 = vadd.f32 %v1151_v36, %v1150_v34 }
 0x136   : > { %v660_v38 = vadd.f32 %v1149_v32, %v1368_v50 }
 0x137   : > { %v680_v41 = vmax.f32 %v596_v37, 0.0  ;;  %v599_v43 = vadd.f32 %v1104_v39, %v1368_v50  ;;  %v663_v44 = vadd.f32 %v1152_v40, %v1368_v50 }
 0x138   : > { %v696_v42 = vmax.f32 %v660_v38, 0.0 }
 0x139   : > { %v1023_v45 = vpack.c.bf16 %v680_v41, %v680_v41  ;;  %v681_v47 = vmax.f32 %v599_v43, 0.0  ;;  %v697_v48 = vmax.f32 %v663_v44, 0.0 }
 0x13a   : > { %v1039_v46 = vpack.c.bf16 %v696_v42, %v696_v42 }
 0x13b   : > { %841 = vst.msk [vmem:[%s1378_s4 + $0x38] sm:$0xf] %vm826_vm0, %v1023_v45  ;;  %v1024_v49 = vpack.c.bf16 %v681_v47, %v681_v47  ;;  %v1040_v51 = vpack.c.bf16 %v697_v48, %v697_v48 }
 0x13c   : > { %857 = vst.msk [vmem:[%s1378_s4 + $0x78] sm:$0xf] %vm826_vm0, %v1039_v46 }
 0x13d   : > { %842 = vst.msk [vmem:[%s1378_s4 + $0x3c] sm:$0xf] %vm826_vm0, %v1024_v49  ;;  %858 = vst.msk [vmem:[%s1378_s4 + $0x7c] sm:$0xf] %vm826_vm0, %v1040_v51 }
 0x13e PF: > { %s13_s12 = sadd.s32 1, %s1247_s12  }
 0x13f   : > { %p10_p4 = scmp.ge.s32.totalorder %s13_s12, 6  }
 0x141   :  { %12 = sbr.rel (!%p10_p4) target bundleno = 1 (0x1), region = 62 }

// kernel: network_forward.5
= control target key start
LH: loop header
LB: loop body
LE: loop exit
PB: predicated region body
PF: predicated region fallthrough
CT: control target
= control target key end

     0   :  { %vm880_vm0 = vcmask 519168   ;;  %s1637_s1 = inlined_call_operand.vmem [shape: bf16[512,64], index: 1, kind: input, shape index: {}]   ;;  %s1638_s0 = inlined_call_operand.vmem [shape: bf16[168,512], index: 0, kind: input, shape index: {}]   ;;  %s1639_s2 = inlined_call_operand.vmem [shape: f32[1,64], index: 2, kind: input, shape index: {}]   ;;  %s1640_s3 = inlined_call_operand.vmem [shape: bf16[168,64], index: 3, kind: output, shape index: {}]  }
   0x1   :  { %v1189_v0 = vld [vmem:[%s1637_s1 + $0x40] sm:$0xff]   ;;  %v1193_v4 = vld [vmem:[%s1637_s1 + $0x48] sm:$0xff]   ;;  %v1197_v8 = vld [vmem:[%s1637_s1 + $0x50] sm:$0xff]  }
   0x2   :  { %v1190_v1 = vld [vmem:[%s1637_s1 + $0xc0] sm:$0xff]   ;;  %1025 = vmatprep.subr.bf16.mxu0 %v1189_v0  ;;  %v1194_v5 = vld [vmem:[%s1637_s1 + $0xc8] sm:$0xff]   ;;  %v1198_v9 = vld [vmem:[%s1637_s1 + $0xd0] sm:$0xff]  }
   0x3   :  { %v1191_v2 = vld [vmem:[%s1637_s1] sm:$0xff]   ;;  %1107 = vmatprep.subr.bf16.mxu1 %v1190_v1  ;;  %v1195_v6 = vld [vmem:[%s1637_s1 + $0x8] sm:$0xff]   ;;  %v1199_v10 = vld [vmem:[%s1637_s1 + $0x10] sm:$0xff]  }
   0x4   :  { %v1192_v3 = vld [vmem:[%s1637_s1 + $0x80] sm:$0xff]   ;;  %1026 = vmatpush3.bf16.msra.mxu0 %v1191_v2  ;;  %v1196_v7 = vld [vmem:[%s1637_s1 + $0x88] sm:$0xff]   ;;  %v1200_v11 = vld [vmem:[%s1637_s1 + $0x90] sm:$0xff]  }
   0x5   :  { %1108 = vmatpush3.bf16.msra.mxu1 %v1192_v3  ;;  %1027 = vmatprep.subr.bf16.mxu0 %v1193_v4  ;;  %v1201_v12 = vld [vmem:[%s1637_s1 + $0x58] sm:$0xff]   ;;  %v1205_v16 = vld [vmem:[%s1637_s1 + $0x60] sm:$0xff]   ;;  %v1209_v20 = vld [vmem:[%s1637_s1 + $0x68] sm:$0xff]  }
   0x6   :  { %1109 = vmatprep.subr.bf16.mxu1 %v1194_v5  ;;  %v1202_v13 = vld [vmem:[%s1637_s1 + $0xd8] sm:$0xff]   ;;  %v1206_v17 = vld [vmem:[%s1637_s1 + $0xe0] sm:$0xff]   ;;  %v1210_v21 = vld [vmem:[%s1637_s1 + $0xe8] sm:$0xff]  }
   0x7   :  { %v1203_v14 = vld [vmem:[%s1637_s1 + $0x18] sm:$0xff]   ;;  %v1207_v18 = vld [vmem:[%s1637_s1 + $0x20] sm:$0xff]   ;;  %v1211_v22 = vld [vmem:[%s1637_s1 + $0x28] sm:$0xff]  }
   0x8   :  { %1028 = vmatpush3.bf16.msra.mxu0 %v1195_v6  ;;  %v1204_v15 = vld [vmem:[%s1637_s1 + $0x98] sm:$0xff]   ;;  %v1208_v19 = vld [vmem:[%s1637_s1 + $0xa0] sm:$0xff]   ;;  %v1212_v23 = vld [vmem:[%s1637_s1 + $0xa8] sm:$0xff]  }
   0x9   :  { %1110 = vmatpush3.bf16.msra.mxu1 %v1196_v7  ;;  %1029 = vmatprep.subr.bf16.mxu0 %v1197_v8  ;;  %v1213_v24 = vld [vmem:[%s1637_s1 + $0x70] sm:$0xff]   ;;  %v1217_v28 = vld [vmem:[%s1637_s1 + $0x78] sm:$0xff]   ;;  %v55_v6 = vld [vmem:[%s1638_s0 + $0x140] sm:$0xff] }
   0xa   :  { %1111 = vmatprep.subr.bf16.mxu1 %v1198_v9  ;;  %v1214_v25 = vld [vmem:[%s1637_s1 + $0xf0] sm:$0xff]   ;;  %v1218_v29 = vld [vmem:[%s1637_s1 + $0xf8] sm:$0xff]   ;;  %v56_v7 = vld [vmem:[%s1638_s0 + $0x148] sm:$0xff] }
   0xb   :  { %v1215_v26 = vld [vmem:[%s1637_s1 + $0x30] sm:$0xff]   ;;  %v1219_v30 = vld [vmem:[%s1637_s1 + $0x38] sm:$0xff]  }
   0xc   :  { %1030 = vmatpush3.bf16.msra.mxu0 %v1199_v10  ;;  %v1216_v27 = vld [vmem:[%s1637_s1 + $0xb0] sm:$0xff]   ;;  %v1220_v31 = vld [vmem:[%s1637_s1 + $0xb8] sm:$0xff]   ;;  %v948_v10 = vcombine.high %v55_v6, %v55_v6 }
   0xd   :  { %1112 = vmatpush3.bf16.msra.mxu1 %v1200_v11  ;;  %1031 = vmatprep.subr.bf16.mxu0 %v1201_v12  ;;  %v1221_v32 = vld [vmem:[%s1638_s0] ss:$16 sps:$4 sm:$0xff]   ;;  %v1223_v33 = vld [vmem:[%s1638_s0 + $0x4] ss:$16 sps:$4 sm:$0xff]   ;;  %v1224_v34 = vld [vmem:[%s1638_s0 + $0x8] ss:$16 sps:$4 sm:$0xff]   ;;  %v950_v11 = vcombine.high %v56_v7, %v56_v7  ;;  %v947_v12 = vcombine.low %v55_v6, %v55_v6 }
   0xe   :  { %1113 = vmatprep.subr.bf16.mxu1 %v1202_v13  ;;  %v1226_v35 = vld [vmem:[%s1638_s0 + $0xc] ss:$16 sps:$4 sm:$0xff]   ;;  %566 = vmatprep.mubr.bf16.mxu0 %v1223_v33  ;;  %v1227_v36 = vld [vmem:[%s1638_s0 + $0x24] ss:$16 sps:$4 sm:$0xff]   ;;  %v1231_v38 = vld [vmem:[%s1638_s0 + $0x20] ss:$16 sps:$4 sm:$0xff]   ;;  %v949_v13 = vcombine.low %v56_v7, %v56_v7 }
   0xf   :  { %686 = vmatprep.mubr.bf16.mxu1 %v1226_v35  ;;  %v1229_v37 = vld [vmem:[%s1638_s0 + $0x2c] ss:$16 sps:$4 sm:$0xff]   ;;  %v1232_v39 = vld [vmem:[%s1638_s0 + $0x28] ss:$16 sps:$4 sm:$0xff]   ;;  %v1233_v40 = vld [vmem:[%s1638_s0 + $0x44] ss:$16 sps:$4 sm:$0xff]  }
  0x10   :  { %1032 = vmatpush3.bf16.msra.mxu0 %v1203_v14  ;;  %v1235_v41 = vld [vmem:[%s1638_s0 + $0x4c] ss:$16 sps:$4 sm:$0xff]   ;;  %v1237_v42 = vld [vmem:[%s1638_s0 + $0x40] ss:$16 sps:$4 sm:$0xff]   ;;  %v1238_v43 = vld [vmem:[%s1638_s0 + $0x48] ss:$16 sps:$4 sm:$0xff]  }
  0x11   :  { %1114 = vmatpush3.bf16.msra.mxu1 %v1204_v15  ;;  %1033 = vmatprep.subr.bf16.mxu0 %v1205_v16  ;;  %v1239_v44 = vld [vmem:[%s1638_s0 + $0x64] ss:$16 sps:$4 sm:$0xff]   ;;  %v1241_v45 = vld [vmem:[%s1638_s0 + $0x6c] ss:$16 sps:$4 sm:$0xff]   ;;  %v1243_v46 = vld [vmem:[%s1638_s0 + $0x60] ss:$16 sps:$4 sm:$0xff]  }
  0x12   :  { %1115 = vmatprep.subr.bf16.mxu1 %v1206_v17  ;;  %v1244_v47 = vld [vmem:[%s1638_s0 + $0x68] ss:$16 sps:$4 sm:$0xff]   ;;  %v1245_v48 = vld [vmem:[%s1638_s0 + $0x84] ss:$16 sps:$4 sm:$0xff]   ;;  %v1247_v49 = vld [vmem:[%s1638_s0 + $0x8c] ss:$16 sps:$4 sm:$0xff]  }
  0x13   :  { %v1249_v50 = vld [vmem:[%s1638_s0 + $0x80] ss:$16 sps:$4 sm:$0xff]   ;;  %v1250_v51 = vld [vmem:[%s1638_s0 + $0x88] ss:$16 sps:$4 sm:$0xff]   ;;  %v1251_v52 = vld [vmem:[%s1638_s0 + $0xa4] ss:$16 sps:$4 sm:$0xff]  }
  0x14   :  { %1034 = vmatpush3.bf16.msra.mxu0 %v1207_v18  ;;  %v1253_v53 = vld [vmem:[%s1638_s0 + $0xac] ss:$16 sps:$4 sm:$0xff]   ;;  %v1255_v54 = vld [vmem:[%s1638_s0 + $0xa0] ss:$16 sps:$4 sm:$0xff]   ;;  %v1256_v55 = vld [vmem:[%s1638_s0 + $0xa8] ss:$16 sps:$4 sm:$0xff]  }
  0x15   :  { %1116 = vmatpush3.bf16.msra.mxu1 %v1208_v19  ;;  %1035 = vmatprep.subr.bf16.mxu0 %v1209_v20  ;;  %v1257_v56 = vld [vmem:[%s1638_s0 + $0xc4] ss:$16 sps:$4 sm:$0xff]   ;;  %v1259_v57 = vld [vmem:[%s1638_s0 + $0xcc] ss:$16 sps:$4 sm:$0xff]   ;;  %v1261_v58 = vld [vmem:[%s1638_s0 + $0xc0] ss:$16 sps:$4 sm:$0xff]  }
  0x16   :  { %1117 = vmatprep.subr.bf16.mxu1 %v1210_v21  ;;  %v1262_v59 = vld [vmem:[%s1638_s0 + $0xc8] ss:$16 sps:$4 sm:$0xff]   ;;  %v1263_v60 = vld [vmem:[%s1638_s0 + $0xe4] ss:$16 sps:$4 sm:$0xff]   ;;  %v1265_v61 = vld [vmem:[%s1638_s0 + $0xec] ss:$16 sps:$4 sm:$0xff]  }
  0x17   :  { %v1267_v62 = vld [vmem:[%s1638_s0 + $0xe0] ss:$16 sps:$4 sm:$0xff]   ;;  %v1268_v63 = vld [vmem:[%s1638_s0 + $0xe8] ss:$16 sps:$4 sm:$0xff]   ;;  %v1269_v0 = vld [vmem:[%s1638_s0 + $0x104] ss:$16 sps:$4 sm:$0xff]  }
  0x18   :  { %1036 = vmatpush3.bf16.msra.mxu0 %v1211_v22  ;;  %v1271_v1 = vld [vmem:[%s1638_s0 + $0x10c] ss:$16 sps:$4 sm:$0xff]   ;;  %v1273_v2 = vld [vmem:[%s1638_s0 + $0x100] ss:$16 sps:$4 sm:$0xff]   ;;  %v1274_v3 = vld [vmem:[%s1638_s0 + $0x108] ss:$16 sps:$4 sm:$0xff]  }
  0x19   :  { %1118 = vmatpush3.bf16.msra.mxu1 %v1212_v23  ;;  %1037 = vmatprep.subr.bf16.mxu0 %v1213_v24  ;;  %v1275_v4 = vld [vmem:[%s1638_s0 + $0x124] ss:$16 sps:$4 sm:$0xff]   ;;  %v1277_v5 = vld [vmem:[%s1638_s0 + $0x12c] ss:$16 sps:$4 sm:$0xff]   ;;  %v1279_v8 = vld [vmem:[%s1638_s0 + $0x120] ss:$16 sps:$4 sm:$0xff]  }
  0x1a   :  { %1119 = vmatprep.subr.bf16.mxu1 %v1214_v25  ;;  %v1280_v9 = vld [vmem:[%s1638_s0 + $0x128] ss:$16 sps:$4 sm:$0xff]   ;;  %v1530_v16 = vld [vmem:[%s1639_s2] ss:$0 sm:$0xff] }
  0x1c   :  { %1038 = vmatpush3.bf16.msra.mxu0 %v1215_v26 }
  0x1d   :  { %1120 = vmatpush3.bf16.msra.mxu1 %v1216_v27  ;;  %1039 = vmatprep.subr.bf16.mxu0 %v1217_v28 }
  0x1e   :  { %1121 = vmatprep.subr.bf16.mxu1 %v1218_v29 }
  0x20   :  { %1040 = vmatpush3.bf16.msra.mxu0 %v1219_v30 }
  0x21   :  { %1122 = vmatpush3.bf16.msra.mxu1 %v1220_v31 }
  0x23   :  { %567 = vmatmul.mubr.bf16.vlgmr.msra.gmra.mrb[0].mxu0 %v1221_v32 }
  0x24   :  { %687 = vmatmul.mubr.bf16.vlgmr.msra.gmra.mrb[0].mxu1 %v1224_v34  ;;  %574 = vmatprep.mubr.bf16.mxu0 %v1227_v36 }
  0x25   :  { %694 = vmatprep.mubr.bf16.mxu1 %v1229_v37 }
  0x2b   :  { %575 = vmatmul.mubr.bf16.gmra.mrb[4].mxu0 %v1231_v38 }
  0x2c   :  { %695 = vmatmul.mubr.bf16.gmra.mrb[4].mxu1 %v1232_v39  ;;  %582 = vmatprep.mubr.bf16.mxu0 %v1233_v40 }
  0x2d   :  { %702 = vmatprep.mubr.bf16.mxu1 %v1235_v41 }
  0x33   :  { %583 = vmatmul.mubr.bf16.gmra.mrb[8].mxu0 %v1237_v42 }
  0x34   :  { %703 = vmatmul.mubr.bf16.gmra.mrb[8].mxu1 %v1238_v43  ;;  %590 = vmatprep.mubr.bf16.mxu0 %v1239_v44 }
  0x35   :  { %710 = vmatprep.mubr.bf16.mxu1 %v1241_v45 }
  0x3b   :  { %591 = vmatmul.mubr.bf16.gmra.mrb[12].mxu0 %v1243_v46 }
  0x3c   :  { %711 = vmatmul.mubr.bf16.gmra.mrb[12].mxu1 %v1244_v47  ;;  %598 = vmatprep.mubr.bf16.mxu0 %v1245_v48 }
  0x3d   :  { %718 = vmatprep.mubr.bf16.mxu1 %v1247_v49 }
  0x43   :  { %599 = vmatmul.mubr.bf16.gmra.mrb[16].mxu0 %v1249_v50 }
  0x44   :  { %719 = vmatmul.mubr.bf16.gmra.mrb[16].mxu1 %v1250_v51  ;;  %606 = vmatprep.mubr.bf16.mxu0 %v1251_v52 }
  0x45   :  { %726 = vmatprep.mubr.bf16.mxu1 %v1253_v53 }
  0x4b   :  { %607 = vmatmul.mubr.bf16.gmra.mrb[20].mxu0 %v1255_v54 }
  0x4c   :  { %727 = vmatmul.mubr.bf16.gmra.mrb[20].mxu1 %v1256_v55  ;;  %614 = vmatprep.mubr.bf16.mxu0 %v1257_v56 }
  0x4d   :  { %734 = vmatprep.mubr.bf16.mxu1 %v1259_v57 }
  0x53   :  { %615 = vmatmul.mubr.bf16.gmra.mrb[24].mxu0 %v1261_v58 }
  0x54   :  { %735 = vmatmul.mubr.bf16.gmra.mrb[24].mxu1 %v1262_v59  ;;  %622 = vmatprep.mubr.bf16.mxu0 %v1263_v60 }
  0x55   :  { %742 = vmatprep.mubr.bf16.mxu1 %v1265_v61 }
  0x5b   :  { %623 = vmatmul.mubr.bf16.gmra.mrb[28].mxu0 %v1267_v62 }
  0x5c   :  { %743 = vmatmul.mubr.bf16.gmra.mrb[28].mxu1 %v1268_v63  ;;  %630 = vmatprep.mubr.bf16.mxu0 %v1269_v0 }
  0x5d   :  { %750 = vmatprep.mubr.bf16.mxu1 %v1271_v1 }
  0x63   :  { %631 = vmatmul.mubr.bf16.gmra.mrb[32].mxu0 %v1273_v2 }
  0x64   :  { %751 = vmatmul.mubr.bf16.gmra.mrb[32].mxu1 %v1274_v3  ;;  %638 = vmatprep.mubr.bf16.mxu0 %v1275_v4 }
  0x65   :  { %758 = vmatprep.mubr.bf16.mxu1 %v1277_v5 }
  0x6b   :  { %639 = vmatmul.mubr.bf16.gmra.mrb[36].mxu0 %v1279_v8 }
  0x6c   :  { %759 = vmatmul.mubr.bf16.gmra.mrb[36].mxu1 %v1280_v9  ;;  %646 = vmatprep.mubr.bf16.mxu0 %v948_v10 }
  0x6d   :  { %766 = vmatprep.mubr.bf16.mxu1 %v950_v11 }
  0x73   :  { %647 = vmatmul.mubr.bf16.gmra.mrb[40].mxu0 %v947_v12 }
  0x74   :  { %767 = vmatmul.mubr.bf16.gmra.mrb[40].mxu1 %v949_v13 }
  0xf6   :  { %v1041_v14 = vpop.f32.mrb[0].mxu0 }
  0xf7   :  { %v1123_v15 = vpop.f32.mrb[0].mxu1  ;;  %v1042_v17 = vpop.f32.mrb[1].mxu0 }
  0xf8   :  { %v1043_v18 = vadd.f32 %v1042_v17, %v1041_v14  ;;  %v1124_v19 = vpop.f32.mrb[1].mxu1  ;;  %v1044_v20 = vpop.f32.mrb[2].mxu0 }
  0xf9   :  { %v1125_v21 = vadd.f32 %v1124_v19, %v1123_v15  ;;  %v1126_v22 = vpop.f32.mrb[2].mxu1  ;;  %v1045_v23 = vpop.f32.mrb[3].mxu0 }
  0xfa   :  { %v569_v24 = vadd.f32 %v1043_v18, %v1530_v16  ;;  %v1046_v25 = vadd.f32 %v1045_v23, %v1044_v20  ;;  %v1127_v26 = vpop.f32.mrb[3].mxu1 }
  0xfb   :  { %v1128_v27 = vadd.f32 %v1127_v26, %v1126_v22 }
  0xfc   :  { %v689_v28 = vadd.f32 %v1125_v21, %v569_v24  ;;  %v572_v29 = vadd.f32 %v1046_v25, %v1530_v16 }
  0xfe   :  { %v774_v30 = vmax.f32 %v689_v28, 0.0  ;;  %v692_v31 = vadd.f32 %v1128_v27, %v572_v29  ;;  %v1047_v32 = vpop.f32.mrb[4].mxu0 }
  0xff   :  { %v1129_v33 = vpop.f32.mrb[4].mxu1  ;;  %v1048_v34 = vpop.f32.mrb[5].mxu0 }
 0x100   :  { %v1004_v35 = vpack.c.bf16 %v774_v30, %v774_v30  ;;  %v775_v36 = vmax.f32 %v692_v31, 0.0  ;;  %v1049_v37 = vadd.f32 %v1048_v34, %v1047_v32  ;;  %v1130_v38 = vpop.f32.mrb[5].mxu1  ;;  %v1050_v39 = vpop.f32.mrb[6].mxu0 }
 0x101   :  { %v1131_v40 = vadd.f32 %v1130_v38, %v1129_v33  ;;  %v1132_v41 = vpop.f32.mrb[6].mxu1  ;;  %v1051_v42 = vpop.f32.mrb[7].mxu0 }
 0x102   :  { %881 = vst.msk [vmem:[%s1640_s3] sm:$0xf] %vm880_vm0, %v1004_v35  ;;  %v1005_v43 = vpack.c.bf16 %v775_v36, %v775_v36  ;;  %v577_v44 = vadd.f32 %v1049_v37, %v1530_v16  ;;  %v1052_v45 = vadd.f32 %v1051_v42, %v1050_v39  ;;  %v1133_v46 = vpop.f32.mrb[7].mxu1 }
 0x103   :  { %v1134_v47 = vadd.f32 %v1133_v46, %v1132_v41 }
 0x104   :  { %882 = vst.msk [vmem:[%s1640_s3 + $0x4] sm:$0xf] %vm880_vm0, %v1005_v43  ;;  %v697_v48 = vadd.f32 %v1131_v40, %v577_v44  ;;  %v580_v49 = vadd.f32 %v1052_v45, %v1530_v16 }
 0x106   :  { %v776_v50 = vmax.f32 %v697_v48, 0.0  ;;  %v700_v51 = vadd.f32 %v1134_v47, %v580_v49  ;;  %v1053_v52 = vpop.f32.mrb[8].mxu0 }
 0x107   :  { %v1135_v53 = vpop.f32.mrb[8].mxu1  ;;  %v1054_v54 = vpop.f32.mrb[9].mxu0 }
 0x108   :  { %v1006_v55 = vpack.c.bf16 %v776_v50, %v776_v50  ;;  %v777_v56 = vmax.f32 %v700_v51, 0.0  ;;  %v1055_v57 = vadd.f32 %v1054_v54, %v1053_v52  ;;  %v1136_v58 = vpop.f32.mrb[9].mxu1  ;;  %v1056_v59 = vpop.f32.mrb[10].mxu0 }
 0x109   :  { %v1137_v60 = vadd.f32 %v1136_v58, %v1135_v53  ;;  %v1138_v61 = vpop.f32.mrb[10].mxu1  ;;  %v1057_v62 = vpop.f32.mrb[11].mxu0 }
 0x10a   :  { %883 = vst.msk [vmem:[%s1640_s3 + $0x8] sm:$0xf] %vm880_vm0, %v1006_v55  ;;  %v1007_v63 = vpack.c.bf16 %v777_v56, %v777_v56  ;;  %v585_v0 = vadd.f32 %v1055_v57, %v1530_v16  ;;  %v1058_v1 = vadd.f32 %v1057_v62, %v1056_v59  ;;  %v1139_v2 = vpop.f32.mrb[11].mxu1 }
 0x10b   :  { %v1140_v3 = vadd.f32 %v1139_v2, %v1138_v61 }
 0x10c   :  { %884 = vst.msk [vmem:[%s1640_s3 + $0xc] sm:$0xf] %vm880_vm0, %v1007_v63  ;;  %v705_v4 = vadd.f32 %v1137_v60, %v585_v0  ;;  %v588_v5 = vadd.f32 %v1058_v1, %v1530_v16 }
 0x10e   :  { %v778_v6 = vmax.f32 %v705_v4, 0.0  ;;  %v708_v7 = vadd.f32 %v1140_v3, %v588_v5  ;;  %v1059_v8 = vpop.f32.mrb[12].mxu0 }
 0x10f   :  { %v1141_v9 = vpop.f32.mrb[12].mxu1  ;;  %v1060_v10 = vpop.f32.mrb[13].mxu0 }
 0x110   :  { %v1008_v11 = vpack.c.bf16 %v778_v6, %v778_v6  ;;  %v779_v12 = vmax.f32 %v708_v7, 0.0  ;;  %v1061_v13 = vadd.f32 %v1060_v10, %v1059_v8  ;;  %v1142_v14 = vpop.f32.mrb[13].mxu1  ;;  %v1062_v15 = vpop.f32.mrb[14].mxu0 }
 0x111   :  { %v1143_v17 = vadd.f32 %v1142_v14, %v1141_v9  ;;  %v1144_v18 = vpop.f32.mrb[14].mxu1  ;;  %v1063_v19 = vpop.f32.mrb[15].mxu0 }
 0x112   :  { %885 = vst.msk [vmem:[%s1640_s3 + $0x10] sm:$0xf] %vm880_vm0, %v1008_v11  ;;  %v1009_v20 = vpack.c.bf16 %v779_v12, %v779_v12  ;;  %v593_v21 = vadd.f32 %v1061_v13, %v1530_v16  ;;  %v1064_v22 = vadd.f32 %v1063_v19, %v1062_v15  ;;  %v1145_v23 = vpop.f32.mrb[15].mxu1 }
 0x113   :  { %v1146_v24 = vadd.f32 %v1145_v23, %v1144_v18 }
 0x114   :  { %886 = vst.msk [vmem:[%s1640_s3 + $0x14] sm:$0xf] %vm880_vm0, %v1009_v20  ;;  %v713_v25 = vadd.f32 %v1143_v17, %v593_v21  ;;  %v596_v26 = vadd.f32 %v1064_v22, %v1530_v16 }
 0x116   :  { %v780_v27 = vmax.f32 %v713_v25, 0.0  ;;  %v716_v28 = vadd.f32 %v1146_v24, %v596_v26  ;;  %v1065_v29 = vpop.f32.mrb[16].mxu0 }
 0x117   :  { %v1147_v30 = vpop.f32.mrb[16].mxu1  ;;  %v1066_v31 = vpop.f32.mrb[17].mxu0 }
 0x118   :  { %v1010_v32 = vpack.c.bf16 %v780_v27, %v780_v27  ;;  %v781_v33 = vmax.f32 %v716_v28, 0.0  ;;  %v1067_v34 = vadd.f32 %v1066_v31, %v1065_v29  ;;  %v1148_v35 = vpop.f32.mrb[17].mxu1  ;;  %v1068_v36 = vpop.f32.mrb[18].mxu0 }
 0x119   :  { %v1149_v37 = vadd.f32 %v1148_v35, %v1147_v30  ;;  %v1150_v38 = vpop.f32.mrb[18].mxu1  ;;  %v1069_v39 = vpop.f32.mrb[19].mxu0 }
 0x11a   :  { %887 = vst.msk [vmem:[%s1640_s3 + $0x18] sm:$0xf] %vm880_vm0, %v1010_v32  ;;  %v1011_v40 = vpack.c.bf16 %v781_v33, %v781_v33  ;;  %v601_v41 = vadd.f32 %v1067_v34, %v1530_v16  ;;  %v1070_v42 = vadd.f32 %v1069_v39, %v1068_v36  ;;  %v1151_v43 = vpop.f32.mrb[19].mxu1 }
 0x11b   :  { %v1152_v44 = vadd.f32 %v1151_v43, %v1150_v38 }
 0x11c   :  { %888 = vst.msk [vmem:[%s1640_s3 + $0x1c] sm:$0xf] %vm880_vm0, %v1011_v40  ;;  %v721_v45 = vadd.f32 %v1149_v37, %v601_v41  ;;  %v604_v46 = vadd.f32 %v1070_v42, %v1530_v16 }
 0x11e   :  { %v782_v47 = vmax.f32 %v721_v45, 0.0  ;;  %v724_v48 = vadd.f32 %v1152_v44, %v604_v46  ;;  %v1071_v49 = vpop.f32.mrb[20].mxu0 }
 0x11f   :  { %v1153_v50 = vpop.f32.mrb[20].mxu1  ;;  %v1072_v51 = vpop.f32.mrb[21].mxu0 }
 0x120   :  { %v1012_v52 = vpack.c.bf16 %v782_v47, %v782_v47  ;;  %v783_v53 = vmax.f32 %v724_v48, 0.0  ;;  %v1073_v54 = vadd.f32 %v1072_v51, %v1071_v49  ;;  %v1154_v55 = vpop.f32.mrb[21].mxu1  ;;  %v1074_v56 = vpop.f32.mrb[22].mxu0 }
 0x121   :  { %v1155_v57 = vadd.f32 %v1154_v55, %v1153_v50  ;;  %v1156_v58 = vpop.f32.mrb[22].mxu1  ;;  %v1075_v59 = vpop.f32.mrb[23].mxu0 }
 0x122   :  { %889 = vst.msk [vmem:[%s1640_s3 + $0x20] sm:$0xf] %vm880_vm0, %v1012_v52  ;;  %v1013_v60 = vpack.c.bf16 %v783_v53, %v783_v53  ;;  %v609_v61 = vadd.f32 %v1073_v54, %v1530_v16  ;;  %v1076_v62 = vadd.f32 %v1075_v59, %v1074_v56  ;;  %v1157_v63 = vpop.f32.mrb[23].mxu1 }
 0x123   :  { %v1158_v0 = vadd.f32 %v1157_v63, %v1156_v58 }
 0x124   :  { %890 = vst.msk [vmem:[%s1640_s3 + $0x24] sm:$0xf] %vm880_vm0, %v1013_v60  ;;  %v729_v1 = vadd.f32 %v1155_v57, %v609_v61  ;;  %v612_v2 = vadd.f32 %v1076_v62, %v1530_v16 }
 0x126   :  { %v784_v3 = vmax.f32 %v729_v1, 0.0  ;;  %v732_v4 = vadd.f32 %v1158_v0, %v612_v2  ;;  %v1077_v5 = vpop.f32.mrb[24].mxu0 }
 0x127   :  { %v1159_v6 = vpop.f32.mrb[24].mxu1  ;;  %v1078_v7 = vpop.f32.mrb[25].mxu0 }
 0x128   :  { %v1014_v8 = vpack.c.bf16 %v784_v3, %v784_v3  ;;  %v785_v9 = vmax.f32 %v732_v4, 0.0  ;;  %v1079_v10 = vadd.f32 %v1078_v7, %v1077_v5  ;;  %v1160_v11 = vpop.f32.mrb[25].mxu1  ;;  %v1080_v12 = vpop.f32.mrb[26].mxu0 }
 0x129   :  { %v1161_v13 = vadd.f32 %v1160_v11, %v1159_v6  ;;  %v1162_v14 = vpop.f32.mrb[26].mxu1  ;;  %v1081_v15 = vpop.f32.mrb[27].mxu0 }
 0x12a   :  { %891 = vst.msk [vmem:[%s1640_s3 + $0x28] sm:$0xf] %vm880_vm0, %v1014_v8  ;;  %v1015_v17 = vpack.c.bf16 %v785_v9, %v785_v9  ;;  %v617_v18 = vadd.f32 %v1079_v10, %v1530_v16  ;;  %v1082_v19 = vadd.f32 %v1081_v15, %v1080_v12  ;;  %v1163_v20 = vpop.f32.mrb[27].mxu1 }
 0x12b   :  { %v1164_v21 = vadd.f32 %v1163_v20, %v1162_v14 }
 0x12c   :  { %892 = vst.msk [vmem:[%s1640_s3 + $0x2c] sm:$0xf] %vm880_vm0, %v1015_v17  ;;  %v737_v22 = vadd.f32 %v1161_v13, %v617_v18  ;;  %v620_v23 = vadd.f32 %v1082_v19, %v1530_v16 }
 0x12e   :  { %v786_v24 = vmax.f32 %v737_v22, 0.0  ;;  %v740_v25 = vadd.f32 %v1164_v21, %v620_v23  ;;  %v1083_v26 = vpop.f32.mrb[28].mxu0 }
 0x12f   :  { %v1165_v27 = vpop.f32.mrb[28].mxu1  ;;  %v1084_v28 = vpop.f32.mrb[29].mxu0 }
 0x130   :  { %v1016_v29 = vpack.c.bf16 %v786_v24, %v786_v24  ;;  %v787_v30 = vmax.f32 %v740_v25, 0.0  ;;  %v1085_v31 = vadd.f32 %v1084_v28, %v1083_v26  ;;  %v1166_v32 = vpop.f32.mrb[29].mxu1  ;;  %v1086_v33 = vpop.f32.mrb[30].mxu0 }
 0x131   :  { %v1167_v34 = vadd.f32 %v1166_v32, %v1165_v27  ;;  %v1168_v35 = vpop.f32.mrb[30].mxu1  ;;  %v1087_v36 = vpop.f32.mrb[31].mxu0 }
 0x132   :  { %893 = vst.msk [vmem:[%s1640_s3 + $0x30] sm:$0xf] %vm880_vm0, %v1016_v29  ;;  %v1017_v37 = vpack.c.bf16 %v787_v30, %v787_v30  ;;  %v625_v38 = vadd.f32 %v1085_v31, %v1530_v16  ;;  %v1088_v39 = vadd.f32 %v1087_v36, %v1086_v33  ;;  %v1169_v40 = vpop.f32.mrb[31].mxu1 }
 0x133   :  { %v1170_v41 = vadd.f32 %v1169_v40, %v1168_v35 }
 0x134   :  { %894 = vst.msk [vmem:[%s1640_s3 + $0x34] sm:$0xf] %vm880_vm0, %v1017_v37  ;;  %v745_v42 = vadd.f32 %v1167_v34, %v625_v38  ;;  %v628_v43 = vadd.f32 %v1088_v39, %v1530_v16 }
 0x136   :  { %v788_v44 = vmax.f32 %v745_v42, 0.0  ;;  %v748_v45 = vadd.f32 %v1170_v41, %v628_v43  ;;  %v1089_v46 = vpop.f32.mrb[32].mxu0 }
 0x137   :  { %v1171_v47 = vpop.f32.mrb[32].mxu1  ;;  %v1090_v48 = vpop.f32.mrb[33].mxu0 }
 0x138   :  { %v1018_v49 = vpack.c.bf16 %v788_v44, %v788_v44  ;;  %v789_v50 = vmax.f32 %v748_v45, 0.0  ;;  %v1091_v51 = vadd.f32 %v1090_v48, %v1089_v46  ;;  %v1172_v52 = vpop.f32.mrb[33].mxu1  ;;  %v1092_v53 = vpop.f32.mrb[34].mxu0 }
 0x139   :  { %v1173_v54 = vadd.f32 %v1172_v52, %v1171_v47  ;;  %v1174_v55 = vpop.f32.mrb[34].mxu1  ;;  %v1093_v56 = vpop.f32.mrb[35].mxu0 }
 0x13a   :  { %895 = vst.msk [vmem:[%s1640_s3 + $0x38] sm:$0xf] %vm880_vm0, %v1018_v49  ;;  %v1019_v57 = vpack.c.bf16 %v789_v50, %v789_v50  ;;  %v633_v58 = vadd.f32 %v1091_v51, %v1530_v16  ;;  %v1094_v59 = vadd.f32 %v1093_v56, %v1092_v53  ;;  %v1175_v60 = vpop.f32.mrb[35].mxu1 }
 0x13b   :  { %v1176_v61 = vadd.f32 %v1175_v60, %v1174_v55 }
 0x13c   :  { %896 = vst.msk [vmem:[%s1640_s3 + $0x3c] sm:$0xf] %vm880_vm0, %v1019_v57  ;;  %v753_v62 = vadd.f32 %v1173_v54, %v633_v58  ;;  %v636_v63 = vadd.f32 %v1094_v59, %v1530_v16 }
 0x13e   :  { %v790_v0 = vmax.f32 %v753_v62, 0.0  ;;  %v756_v1 = vadd.f32 %v1176_v61, %v636_v63  ;;  %v1095_v2 = vpop.f32.mrb[36].mxu0 }
 0x13f   :  { %v1177_v3 = vpop.f32.mrb[36].mxu1  ;;  %v1096_v4 = vpop.f32.mrb[37].mxu0 }
 0x140   :  { %v1020_v5 = vpack.c.bf16 %v790_v0, %v790_v0  ;;  %v791_v6 = vmax.f32 %v756_v1, 0.0  ;;  %v1097_v7 = vadd.f32 %v1096_v4, %v1095_v2  ;;  %v1178_v8 = vpop.f32.mrb[37].mxu1  ;;  %v1098_v9 = vpop.f32.mrb[38].mxu0 }
 0x141   :  { %v1179_v10 = vadd.f32 %v1178_v8, %v1177_v3  ;;  %v1180_v11 = vpop.f32.mrb[38].mxu1  ;;  %v1099_v12 = vpop.f32.mrb[39].mxu0 }
 0x142   :  { %897 = vst.msk [vmem:[%s1640_s3 + $0x40] sm:$0xf] %vm880_vm0, %v1020_v5  ;;  %v1021_v13 = vpack.c.bf16 %v791_v6, %v791_v6  ;;  %v641_v14 = vadd.f32 %v1097_v7, %v1530_v16  ;;  %v1100_v15 = vadd.f32 %v1099_v12, %v1098_v9  ;;  %v1181_v17 = vpop.f32.mrb[39].mxu1 }
 0x143   :  { %v1182_v18 = vadd.f32 %v1181_v17, %v1180_v11 }
 0x144   :  { %898 = vst.msk [vmem:[%s1640_s3 + $0x44] sm:$0xf] %vm880_vm0, %v1021_v13  ;;  %v761_v19 = vadd.f32 %v1179_v10, %v641_v14  ;;  %v644_v20 = vadd.f32 %v1100_v15, %v1530_v16 }
 0x146   :  { %v792_v21 = vmax.f32 %v761_v19, 0.0  ;;  %v764_v22 = vadd.f32 %v1182_v18, %v644_v20  ;;  %v1101_v23 = vpop.f32.mrb[40].mxu0 }
 0x147   :  { %v1183_v24 = vpop.f32.mrb[40].mxu1  ;;  %v1102_v25 = vpop.f32.mrb[41].mxu0 }
 0x148   :  { %v1022_v26 = vpack.c.bf16 %v792_v21, %v792_v21  ;;  %v793_v27 = vmax.f32 %v764_v22, 0.0  ;;  %v1103_v28 = vadd.f32 %v1102_v25, %v1101_v23  ;;  %v1184_v29 = vpop.f32.mrb[41].mxu1  ;;  %v1104_v30 = vpop.f32.mrb[42].mxu0 }
 0x149   :  { %v1185_v31 = vadd.f32 %v1184_v29, %v1183_v24  ;;  %v1186_v32 = vpop.f32.mrb[42].mxu1  ;;  %v1105_v33 = vpop.f32.mrb[43].mxu0 }
 0x14a   :  { %899 = vst.msk [vmem:[%s1640_s3 + $0x48] sm:$0xf] %vm880_vm0, %v1022_v26  ;;  %v1023_v34 = vpack.c.bf16 %v793_v27, %v793_v27  ;;  %v649_v35 = vadd.f32 %v1103_v28, %v1530_v16  ;;  %v1187_v36 = vpop.f32.mrb[43].mxu1 }
 0x14c   :  { %900 = vst.msk [vmem:[%s1640_s3 + $0x4c] sm:$0xf] %vm880_vm0, %v1023_v34  ;;  %v769_v37 = vadd.f32 %v1185_v31, %v649_v35 }
 0x14e   :  { %v794_v38 = vmax.f32 %v769_v37, 0.0 }
 0x150   :  { %v1024_v39 = vpack.c.bf16 %v794_v38, %v794_v38 }
 0x152   :  { %901 = vst.msk [vmem:[%s1640_s3 + $0x50] sm:$0xf] %vm880_vm0, %v1024_v39 }

// kernel: network_forward.6
= control target key start
LH: loop header
LB: loop body
LE: loop exit
PB: predicated region body
PF: predicated region fallthrough
CT: control target
= control target key end

     0   :  { %v1234_v34 = vmov 0.0   ;;  %vm1235_vm0 = vmmov 0   ;;  %vm516_vm1 = vcmask 523264   ;;  %vm855_vm2 = vcmask 519168   ;;  %s1586_s1 = inlined_call_operand.vmem [shape: bf16[576,64], index: 1, kind: input, shape index: {}]   ;;  %s1587_s0 = inlined_call_operand.vmem [shape: bf16[104,576], index: 0, kind: input, shape index: {}]   ;;  %s1588_s2 = inlined_call_operand.vmem [shape: f32[1,64], index: 2, kind: input, shape index: {}]   ;;  %s1589_s3 = inlined_call_operand.vmem [shape: bf16[104,64], index: 3, kind: output, shape index: {}]  }
   0x1   :  { %v1151_v0 = vld [vmem:[%s1586_s1 + $0x40] sm:$0xff]   ;;  %v1155_v4 = vld [vmem:[%s1586_s1 + $0x48] sm:$0xff]   ;;  %v1159_v8 = vld [vmem:[%s1586_s1 + $0x50] sm:$0xff]  }
   0x2   :  { %v1152_v1 = vld [vmem:[%s1586_s1 + $0xc0] sm:$0xff]   ;;  %978 = vmatprep.subr.bf16.mxu0 %v1151_v0  ;;  %v1156_v5 = vld [vmem:[%s1586_s1 + $0xc8] sm:$0xff]   ;;  %v1160_v9 = vld [vmem:[%s1586_s1 + $0xd0] sm:$0xff]  }
   0x3   :  { %v1153_v2 = vld [vmem:[%s1586_s1] sm:$0xff]   ;;  %1036 = vmatprep.subr.bf16.mxu1 %v1152_v1  ;;  %v1157_v6 = vld [vmem:[%s1586_s1 + $0x8] sm:$0xff]   ;;  %v1161_v10 = vld [vmem:[%s1586_s1 + $0x10] sm:$0xff]  }
   0x4   :  { %v1154_v3 = vld [vmem:[%s1586_s1 + $0x80] sm:$0xff]   ;;  %979 = vmatpush3.bf16.msra.mxu0 %v1153_v2  ;;  %v1158_v7 = vld [vmem:[%s1586_s1 + $0x88] sm:$0xff]   ;;  %v1162_v11 = vld [vmem:[%s1586_s1 + $0x90] sm:$0xff]  }
   0x5   :  { %1037 = vmatpush3.bf16.msra.mxu1 %v1154_v3  ;;  %980 = vmatprep.subr.bf16.mxu0 %v1155_v4  ;;  %v1163_v12 = vld [vmem:[%s1586_s1 + $0x58] sm:$0xff]   ;;  %v1167_v16 = vld [vmem:[%s1586_s1 + $0x60] sm:$0xff]   ;;  %v1171_v20 = vld [vmem:[%s1586_s1 + $0x68] sm:$0xff]  }
   0x6   :  { %1038 = vmatprep.subr.bf16.mxu1 %v1156_v5  ;;  %v1164_v13 = vld [vmem:[%s1586_s1 + $0xd8] sm:$0xff]   ;;  %v1168_v17 = vld [vmem:[%s1586_s1 + $0xe0] sm:$0xff]   ;;  %v1172_v21 = vld [vmem:[%s1586_s1 + $0xe8] sm:$0xff]  }
   0x7   :  { %v1165_v14 = vld [vmem:[%s1586_s1 + $0x18] sm:$0xff]   ;;  %v1169_v18 = vld [vmem:[%s1586_s1 + $0x20] sm:$0xff]   ;;  %v1173_v22 = vld [vmem:[%s1586_s1 + $0x28] sm:$0xff]  }
   0x8   :  { %981 = vmatpush3.bf16.msra.mxu0 %v1157_v6  ;;  %v1166_v15 = vld [vmem:[%s1586_s1 + $0x98] sm:$0xff]   ;;  %v1170_v19 = vld [vmem:[%s1586_s1 + $0xa0] sm:$0xff]   ;;  %v1174_v23 = vld [vmem:[%s1586_s1 + $0xa8] sm:$0xff]  }
   0x9   :  { %1039 = vmatpush3.bf16.msra.mxu1 %v1158_v7  ;;  %982 = vmatprep.subr.bf16.mxu0 %v1159_v8  ;;  %v1175_v24 = vld [vmem:[%s1586_s1 + $0x70] sm:$0xff]   ;;  %v1179_v28 = vld [vmem:[%s1586_s1 + $0x78] sm:$0xff]   ;;  %v1188_v36 = vld [vmem:[%s1587_s0 + $0xc] ss:$20 sps:$4 sm:$0xff]  }
   0xa   :  { %1040 = vmatprep.subr.bf16.mxu1 %v1160_v9  ;;  %v1176_v25 = vld [vmem:[%s1586_s1 + $0xf0] sm:$0xff]   ;;  %v1180_v29 = vld [vmem:[%s1586_s1 + $0xf8] sm:$0xff]   ;;  %v1189_v37 = vld [vmem:[%s1586_s1 + $0x100] sm:$0xff]   ;;  %658 = vmatprep.mubr.bf16.mxu1 %v1188_v36 }
   0xb   :  { %v1177_v26 = vld [vmem:[%s1586_s1 + $0x30] sm:$0xff]   ;;  %v1181_v30 = vld [vmem:[%s1586_s1 + $0x38] sm:$0xff]   ;;  %v1190_v38 = vld [vmem:[%s1587_s0 + $0x2c] ss:$20 sps:$4 sm:$0xff]  }
   0xc   :  { %983 = vmatpush3.bf16.msra.mxu0 %v1161_v10  ;;  %v1178_v27 = vld [vmem:[%s1586_s1 + $0xb0] sm:$0xff]   ;;  %v1182_v31 = vld [vmem:[%s1586_s1 + $0xb8] sm:$0xff]   ;;  %v1200_v43 = vld [vmem:[%s1586_s1 + $0x108] sm:$0xff]  }
   0xd   :  { %1041 = vmatpush3.bf16.msra.mxu1 %v1162_v11  ;;  %984 = vmatprep.subr.bf16.mxu0 %v1163_v12  ;;  %v1183_v32 = vld [vmem:[%s1587_s0] ss:$20 sps:$4 sm:$0xff]   ;;  %v1185_v33 = vld [vmem:[%s1587_s0 + $0x4] ss:$20 sps:$4 sm:$0xff]   ;;  %v1186_v35 = vld [vmem:[%s1587_s0 + $0x8] ss:$20 sps:$4 sm:$0xff]  }
   0xe   :  { %1042 = vmatprep.subr.bf16.mxu1 %v1164_v13  ;;  %570 = vmatprep.mubr.bf16.mxu0 %v1185_v33  ;;  %v1192_v39 = vld [vmem:[%s1587_s0 + $0x34] ss:$20 sps:$4 sm:$0xff]   ;;  %v1195_v41 = vld [vmem:[%s1587_s0 + $0x30] ss:$20 sps:$4 sm:$0xff]   ;;  %v1202_v47 = vld [vmem:[%s1587_s0 + $0x58] ss:$20 sps:$4 sm:$0xff]  }
   0xf   :  { %v1194_v40 = vld [vmem:[%s1587_s0 + $0x28] ss:$20 sps:$4 sm:$0xff]   ;;  %v1209_v45 = vld [vmem:[%s1586_s1 + $0x110] sm:$0xff]   ;;  %v1205_v49 = vld [vmem:[%s1587_s0 + $0x84] ss:$20 sps:$4 sm:$0xff]  }
  0x10   :  { %985 = vmatpush3.bf16.msra.mxu0 %v1165_v14  ;;  %v1196_v42 = vld [vmem:[%s1587_s0 + $0x54] ss:$20 sps:$4 sm:$0xff]   ;;  %v1198_v44 = vld [vmem:[%s1587_s0 + $0x5c] ss:$20 sps:$4 sm:$0xff]   ;;  %v1207_v51 = vld [vmem:[%s1587_s0 + $0x78] ss:$20 sps:$4 sm:$0xff]  }
  0x11   :  { %1043 = vmatpush3.bf16.msra.mxu1 %v1166_v15  ;;  %986 = vmatprep.subr.bf16.mxu0 %v1167_v16  ;;  %v1201_v46 = vld [vmem:[%s1587_s0 + $0x50] ss:$20 sps:$4 sm:$0xff]   ;;  %v1222_v50 = vld [vmem:[%s1586_s1 + $0x118] sm:$0xff]   ;;  %v1208_v52 = vld [vmem:[%s1587_s0 + $0x80] ss:$20 sps:$4 sm:$0xff]  }
  0x12   :  { %1044 = vmatprep.subr.bf16.mxu1 %v1168_v17  ;;  %v1203_v48 = vld [vmem:[%s1587_s0 + $0x7c] ss:$20 sps:$4 sm:$0xff]   ;;  %v1210_v53 = vld [vmem:[%s1587_s0 + $0xa4] ss:$20 sps:$4 sm:$0xff]   ;;  %v1212_v54 = vld [vmem:[%s1587_s0 + $0xac] ss:$20 sps:$4 sm:$0xff]  }
  0x13   :  { %v1214_v55 = vld [vmem:[%s1587_s0 + $0xa0] ss:$20 sps:$4 sm:$0xff]   ;;  %v1215_v56 = vld [vmem:[%s1587_s0 + $0xa8] ss:$20 sps:$4 sm:$0xff]   ;;  %v1221_v62 = vld [vmem:[%s1587_s0 + $0xd0] ss:$20 sps:$4 sm:$0xff]  }
  0x14   :  { %987 = vmatpush3.bf16.msra.mxu0 %v1169_v18  ;;  %v1216_v57 = vld [vmem:[%s1587_s0 + $0xcc] ss:$20 sps:$4 sm:$0xff]   ;;  %v1218_v58 = vld [vmem:[%s1587_s0 + $0xd4] ss:$20 sps:$4 sm:$0xff]   ;;  %v52_v60 = vld [vmem:[%s1587_s0 + $0xf8] sm:$0xff] }
  0x15   :  { %1045 = vmatpush3.bf16.msra.mxu1 %v1170_v19  ;;  %988 = vmatprep.subr.bf16.mxu0 %v1171_v20  ;;  %v51_v59 = vld [vmem:[%s1587_s0 + $0xf0] sm:$0xff]  ;;  %v1220_v61 = vld [vmem:[%s1587_s0 + $0xc8] ss:$20 sps:$4 sm:$0xff]   ;;  %v907_v0 = vcombine.high %v52_v60, %v52_v60  ;;  %v906_v2 = vcombine.low %v52_v60, %v52_v60  ;;  %v1229_v5 = vld [vmem:[%s1587_s0 + $0x38] ss:$20 sps:$4 sm:$0xff]  }
  0x16   :  { %1046 = vmatprep.subr.bf16.mxu1 %v1172_v21  ;;  %v905_v63 = vcombine.high %v51_v59, %v51_v59  ;;  %v904_v1 = vcombine.low %v51_v59, %v51_v59  ;;  %v1227_v3 = vld [vmem:[%s1587_s0 + $0x10] ss:$20 sps:$4 sm:$0xff]   ;;  %v1230_v6 = vld [vmem:[%s1587_s0 + $0xd8] ss:$20 sps:$4 sm:$0xff]   ;;  %v1231_v7 = vld [vmem:[%s1587_s0 + $0x60] ss:$20 sps:$4 sm:$0xff]  }
  0x17   :  { %v1228_v4 = vld [vmem:[%s1587_s0 + $0xb0] ss:$20 sps:$4 sm:$0xff]   ;;  %v1232_v8 = vld [vmem:[%s1587_s0 + $0x100] ss:$0 sps:$4 sm:$0xff]   ;;  %v1233_v9 = vld [vmem:[%s1587_s0 + $0x88] ss:$20 sps:$4 sm:$0xff]  }
  0x18   :  { %989 = vmatpush3.bf16.msra.mxu0 %v1173_v22  ;;  %v1495_v11 = vld [vmem:[%s1588_s2] ss:$0 sm:$0xff] }
  0x19   :  { %1047 = vmatpush3.bf16.msra.mxu1 %v1174_v23  ;;  %990 = vmatprep.subr.bf16.mxu0 %v1175_v24 }
  0x1a   :  { %1048 = vmatprep.subr.bf16.mxu1 %v1176_v25 }
  0x1c   :  { %991 = vmatpush3.bf16.msra.mxu0 %v1177_v26 }
  0x1d   :  { %1049 = vmatpush3.bf16.msra.mxu1 %v1178_v27  ;;  %992 = vmatprep.subr.bf16.mxu0 %v1179_v28 }
  0x1e   :  { %1050 = vmatprep.subr.bf16.mxu1 %v1180_v29 }
  0x20   :  { %993 = vmatpush3.bf16.msra.mxu0 %v1181_v30 }
  0x21   :  { %1051 = vmatpush3.bf16.msra.mxu1 %v1182_v31  ;;  %1105 = vmatprep.subr.bf16.mxu0 %v1234_v34 }
  0x22   :  { %1141 = vmatprep.subr.bf16.mxu1 %v1234_v34 }
  0x23   :  { %571 = vmatmul.mubr.bf16.vlgmr.msra.gmra.mrb[0].mxu0 %v1183_v32 }
  0x24   :  { %659 = vmatmul.mubr.bf16.vlgmr.msra.gmra.mrb[0].mxu1 %v1186_v35  ;;  %1106 = vmatpush3.bf16.msra.mxu0 %v1189_v37 }
  0x25   :  { %578 = vmatprep.mubr.bf16.mxu0 %v1190_v38  ;;  %1145 = vmatpush3.bf16.msra.mxu1 %v1189_v37 }
  0x26   :  { %666 = vmatprep.mubr.bf16.mxu1 %v1192_v39  ;;  %1107 = vmatprep.subr.bf16.mxu0 %v1234_v34 }
  0x27   :  { %1142 = vmatprep.subr.bf16.mxu1 %v1234_v34 }
  0x28   :  { %1108 = vmatpush3.bf16.msra.mxu0 %v1200_v43 }
  0x29   :  { %1146 = vmatpush3.bf16.msra.mxu1 %v1200_v43  ;;  %1109 = vmatprep.subr.bf16.mxu0 %v1234_v34 }
  0x2a   :  { %1143 = vmatprep.subr.bf16.mxu1 %v1234_v34 }
  0x2b   :  { %579 = vmatmul.mubr.bf16.gmra.mrb[4].mxu0 %v1194_v40 }
  0x2c   :  { %667 = vmatmul.mubr.bf16.gmra.mrb[4].mxu1 %v1195_v41  ;;  %586 = vmatprep.mubr.bf16.mxu0 %v1196_v42 }
  0x2d   :  { %674 = vmatprep.mubr.bf16.mxu1 %v1198_v44  ;;  %1110 = vmatpush3.bf16.msra.mxu0 %v1209_v45 }
  0x2e   :  { %1147 = vmatpush3.bf16.msra.mxu1 %v1209_v45  ;;  %1111 = vmatprep.subr.bf16.mxu0 %v1234_v34 }
  0x2f   :  { %1144 = vmatprep.subr.bf16.mxu1 %v1234_v34 }
  0x31   :  { %1112 = vmatpush3.bf16.msra.mxu0 %v1222_v50 }
  0x32   :  { %1148 = vmatpush3.bf16.msra.mxu1 %v1222_v50 }
  0x33   :  { %587 = vmatmul.mubr.bf16.gmra.mrb[8].mxu0 %v1201_v46 }
  0x34   :  { %675 = vmatmul.mubr.bf16.gmra.mrb[8].mxu1 %v1202_v47  ;;  %594 = vmatprep.mubr.bf16.mxu0 %v1203_v48 }
  0x35   :  { %682 = vmatprep.mubr.bf16.mxu1 %v1205_v49 }
  0x3b   :  { %595 = vmatmul.mubr.bf16.gmra.mrb[12].mxu0 %v1207_v51 }
  0x3c   :  { %683 = vmatmul.mubr.bf16.gmra.mrb[12].mxu1 %v1208_v52  ;;  %602 = vmatprep.mubr.bf16.mxu0 %v1210_v53 }
  0x3d   :  { %690 = vmatprep.mubr.bf16.mxu1 %v1212_v54 }
  0x43   :  { %603 = vmatmul.mubr.bf16.gmra.mrb[16].mxu0 %v1214_v55 }
  0x44   :  { %691 = vmatmul.mubr.bf16.gmra.mrb[16].mxu1 %v1215_v56  ;;  %610 = vmatprep.mubr.bf16.mxu0 %v1216_v57 }
  0x45   :  { %698 = vmatprep.mubr.bf16.mxu1 %v1218_v58 }
  0x4b   :  { %611 = vmatmul.mubr.bf16.gmra.mrb[20].mxu0 %v1220_v61 }
  0x4c   :  { %699 = vmatmul.mubr.bf16.gmra.mrb[20].mxu1 %v1221_v62  ;;  %618 = vmatprep.mubr.bf16.mxu0 %v905_v63 }
  0x4d   :  { %706 = vmatprep.mubr.bf16.mxu1 %v907_v0 }
  0x53   :  { %619 = vmatmul.mubr.bf16.gmra.mrb[24].mxu0 %v904_v1 }
  0x54   :  { %707 = vmatmul.mubr.bf16.gmra.mrb[24].mxu1 %v906_v2  ;;  %1113 = vmatprep.mubr.msk.bf16.mxu0 %vm1235_vm0, %v1234_v34 }
  0x55   :  { %1129 = vmatprep.mubr.msk.bf16.mxu1 %vm1235_vm0, %v1234_v34 }
  0x5b   :  { %1114 = vmatmul.mubr.msk.bf16.vlgmr.msra.gmra.mrb[28].mxu0 %vm516_vm1, %v1227_v3 }
  0x5c   :  { %1130 = vmatmul.mubr.msk.bf16.vlgmr.msra.gmra.mrb[28].mxu1 %vm516_vm1, %v1228_v4  ;;  %1117 = vmatprep.mubr.msk.bf16.mxu0 %vm1235_vm0, %v1234_v34 }
  0x5d   :  { %1133 = vmatprep.mubr.msk.bf16.mxu1 %vm1235_vm0, %v1234_v34 }
  0x63   :  { %1118 = vmatmul.mubr.msk.bf16.gmra.mrb[32].mxu0 %vm516_vm1, %v1229_v5 }
  0x64   :  { %1134 = vmatmul.mubr.msk.bf16.gmra.mrb[32].mxu1 %vm516_vm1, %v1230_v6  ;;  %1121 = vmatprep.mubr.msk.bf16.mxu0 %vm1235_vm0, %v1234_v34 }
  0x65   :  { %1137 = vmatprep.mubr.msk.bf16.mxu1 %vm1235_vm0, %v1234_v34 }
  0x6b   :  { %1122 = vmatmul.mubr.msk.bf16.gmra.mrb[36].mxu0 %vm516_vm1, %v1231_v7 }
  0x6c   :  { %1138 = vmatmul.mubr.msk.bf16.gmra.mrb[36].mxu1 %vm516_vm1, %v1232_v8  ;;  %1125 = vmatprep.mubr.msk.bf16.mxu0 %vm1235_vm0, %v1234_v34 }
  0x73   :  { %1126 = vmatmul.mubr.msk.bf16.gmra.mrb[40].mxu0 %vm516_vm1, %v1233_v9 }
  0xf6   :  { %v994_v10 = vpop.f32.mrb[0].mxu0 }
  0xf7   :  { %v995_v12 = vpop.f32.mrb[1].mxu0  ;;  %v1052_v13 = vpop.f32.mrb[0].mxu1 }
  0xf8   :  { %v996_v14 = vadd.f32 %v995_v12, %v994_v10  ;;  %v997_v15 = vpop.f32.mrb[2].mxu0  ;;  %v1053_v16 = vpop.f32.mrb[1].mxu1 }
  0xf9   :  { %v998_v17 = vpop.f32.mrb[3].mxu0  ;;  %v1054_v18 = vadd.f32 %v1053_v16, %v1052_v13  ;;  %v1055_v19 = vpop.f32.mrb[2].mxu1 }
  0xfa   :  { %v573_v20 = vadd.f32 %v996_v14, %v1495_v11  ;;  %v999_v21 = vadd.f32 %v998_v17, %v997_v15  ;;  %v1056_v22 = vpop.f32.mrb[3].mxu1 }
  0xfb   :  { %v1057_v23 = vadd.f32 %v1056_v22, %v1055_v19 }
  0xfc   :  { %v576_v24 = vadd.f32 %v999_v21, %v1495_v11  ;;  %v1499_v25 = vadd.f32 %v1054_v18, %v573_v20 }
  0xfe   :  { %v1000_v26 = vpop.f32.mrb[4].mxu0  ;;  %v1501_v27 = vadd.f32 %v1057_v23, %v576_v24 }
  0xff   :  { %v1001_v28 = vpop.f32.mrb[5].mxu0  ;;  %v1058_v29 = vpop.f32.mrb[4].mxu1 }
 0x100   :  { %v1002_v30 = vadd.f32 %v1001_v28, %v1000_v26  ;;  %v1003_v31 = vpop.f32.mrb[6].mxu0  ;;  %v1059_v32 = vpop.f32.mrb[5].mxu1 }
 0x101   :  { %v1004_v33 = vpop.f32.mrb[7].mxu0  ;;  %v1060_v34 = vadd.f32 %v1059_v32, %v1058_v29  ;;  %v1061_v35 = vpop.f32.mrb[6].mxu1 }
 0x102   :  { %v581_v36 = vadd.f32 %v1002_v30, %v1495_v11  ;;  %v1005_v37 = vadd.f32 %v1004_v33, %v1003_v31  ;;  %v1062_v38 = vpop.f32.mrb[7].mxu1 }
 0x103   :  { %v1063_v39 = vadd.f32 %v1062_v38, %v1061_v35 }
 0x104   :  { %v584_v40 = vadd.f32 %v1005_v37, %v1495_v11  ;;  %v1505_v41 = vadd.f32 %v1060_v34, %v581_v36 }
 0x106   :  { %v1006_v42 = vpop.f32.mrb[8].mxu0  ;;  %v1507_v43 = vadd.f32 %v1063_v39, %v584_v40 }
 0x107   :  { %v1007_v44 = vpop.f32.mrb[9].mxu0  ;;  %v1064_v45 = vpop.f32.mrb[8].mxu1 }
 0x108   :  { %v1008_v46 = vadd.f32 %v1007_v44, %v1006_v42  ;;  %v1009_v47 = vpop.f32.mrb[10].mxu0  ;;  %v1065_v48 = vpop.f32.mrb[9].mxu1 }
 0x109   :  { %v1010_v49 = vpop.f32.mrb[11].mxu0  ;;  %v1066_v50 = vadd.f32 %v1065_v48, %v1064_v45  ;;  %v1067_v51 = vpop.f32.mrb[10].mxu1 }
 0x10a   :  { %v589_v52 = vadd.f32 %v1008_v46, %v1495_v11  ;;  %v1011_v53 = vadd.f32 %v1010_v49, %v1009_v47  ;;  %v1068_v54 = vpop.f32.mrb[11].mxu1 }
 0x10b   :  { %v1069_v55 = vadd.f32 %v1068_v54, %v1067_v51 }
 0x10c   :  { %v592_v56 = vadd.f32 %v1011_v53, %v1495_v11  ;;  %v1511_v57 = vadd.f32 %v1066_v50, %v589_v52 }
 0x10e   :  { %v1012_v58 = vpop.f32.mrb[12].mxu0  ;;  %v1513_v59 = vadd.f32 %v1069_v55, %v592_v56 }
 0x10f   :  { %v1013_v60 = vpop.f32.mrb[13].mxu0  ;;  %v1070_v61 = vpop.f32.mrb[12].mxu1 }
 0x110   :  { %v1014_v62 = vadd.f32 %v1013_v60, %v1012_v58  ;;  %v1015_v63 = vpop.f32.mrb[14].mxu0  ;;  %v1071_v0 = vpop.f32.mrb[13].mxu1 }
 0x111   :  { %v1016_v1 = vpop.f32.mrb[15].mxu0  ;;  %v1072_v2 = vadd.f32 %v1071_v0, %v1070_v61  ;;  %v1073_v3 = vpop.f32.mrb[14].mxu1 }
 0x112   :  { %v597_v4 = vadd.f32 %v1014_v62, %v1495_v11  ;;  %v1017_v5 = vadd.f32 %v1016_v1, %v1015_v63  ;;  %v1074_v6 = vpop.f32.mrb[15].mxu1 }
 0x113   :  { %v1075_v7 = vadd.f32 %v1074_v6, %v1073_v3 }
 0x114   :  { %v600_v8 = vadd.f32 %v1017_v5, %v1495_v11  ;;  %v1517_v9 = vadd.f32 %v1072_v2, %v597_v4 }
 0x116   :  { %v1018_v10 = vpop.f32.mrb[16].mxu0  ;;  %v1519_v12 = vadd.f32 %v1075_v7, %v600_v8 }
 0x117   :  { %v1019_v13 = vpop.f32.mrb[17].mxu0  ;;  %v1076_v14 = vpop.f32.mrb[16].mxu1 }
 0x118   :  { %v1020_v15 = vadd.f32 %v1019_v13, %v1018_v10  ;;  %v1021_v16 = vpop.f32.mrb[18].mxu0  ;;  %v1077_v17 = vpop.f32.mrb[17].mxu1 }
 0x119   :  { %v1022_v18 = vpop.f32.mrb[19].mxu0  ;;  %v1078_v19 = vadd.f32 %v1077_v17, %v1076_v14  ;;  %v1079_v20 = vpop.f32.mrb[18].mxu1 }
 0x11a   :  { %v605_v21 = vadd.f32 %v1020_v15, %v1495_v11  ;;  %v1023_v22 = vadd.f32 %v1022_v18, %v1021_v16  ;;  %v1080_v23 = vpop.f32.mrb[19].mxu1 }
 0x11b   :  { %v1081_v24 = vadd.f32 %v1080_v23, %v1079_v20 }
 0x11c   :  { %v608_v26 = vadd.f32 %v1023_v22, %v1495_v11  ;;  %v693_v28 = vadd.f32 %v1078_v19, %v605_v21 }
 0x11e   :  { %v1024_v29 = vpop.f32.mrb[20].mxu0  ;;  %v696_v30 = vadd.f32 %v1081_v24, %v608_v26 }
 0x11f   :  { %v1025_v31 = vpop.f32.mrb[21].mxu0  ;;  %v1082_v32 = vpop.f32.mrb[20].mxu1 }
 0x120   :  { %v1026_v33 = vadd.f32 %v1025_v31, %v1024_v29  ;;  %v1027_v34 = vpop.f32.mrb[22].mxu0  ;;  %v1083_v35 = vpop.f32.mrb[21].mxu1 }
 0x121   :  { %v1028_v36 = vpop.f32.mrb[23].mxu0  ;;  %v1084_v37 = vadd.f32 %v1083_v35, %v1082_v32  ;;  %v1085_v38 = vpop.f32.mrb[22].mxu1 }
 0x122   :  { %v613_v39 = vadd.f32 %v1026_v33, %v1495_v11  ;;  %v1029_v40 = vadd.f32 %v1028_v36, %v1027_v34  ;;  %v1086_v42 = vpop.f32.mrb[23].mxu1 }
 0x123   :  { %v1087_v44 = vadd.f32 %v1086_v42, %v1085_v38 }
 0x124   :  { %v616_v45 = vadd.f32 %v1029_v40, %v1495_v11  ;;  %v701_v46 = vadd.f32 %v1084_v37, %v613_v39 }
 0x126   :  { %v1030_v47 = vpop.f32.mrb[24].mxu0  ;;  %v704_v48 = vadd.f32 %v1087_v44, %v616_v45 }
 0x127   :  { %v1031_v49 = vpop.f32.mrb[25].mxu0  ;;  %v1088_v50 = vpop.f32.mrb[24].mxu1 }
 0x128   :  { %v1032_v51 = vadd.f32 %v1031_v49, %v1030_v47  ;;  %v1033_v52 = vpop.f32.mrb[26].mxu0  ;;  %v1089_v53 = vpop.f32.mrb[25].mxu1 }
 0x129   :  { %v1034_v54 = vpop.f32.mrb[27].mxu0  ;;  %v1090_v55 = vadd.f32 %v1089_v53, %v1088_v50  ;;  %v1091_v56 = vpop.f32.mrb[26].mxu1 }
 0x12a   :  { %v621_v58 = vadd.f32 %v1032_v51, %v1495_v11  ;;  %v1092_v60 = vpop.f32.mrb[27].mxu1 }
 0x12c   :  { %v709_v61 = vadd.f32 %v1090_v55, %v621_v58 }
 0x12e   :  { %v748_v62 = vpop.f32.mrb[28].mxu0 }
 0x12f   :  { %v749_v63 = vadd.f32 %v748_v62, %v1499_v25  ;;  %v780_v0 = vpop.f32.mrb[28].mxu1  ;;  %v1115_v1 = vpop.f32.mrb[29].mxu0 }
 0x130   :  { %v781_v2 = vadd.f32 %v780_v0, %v693_v28  ;;  %v1131_v3 = vpop.f32.mrb[29].mxu1  ;;  %v751_v4 = vpop.f32.mrb[30].mxu0 }
 0x131   :  { %v965_v5 = vpack.c.bf16 %v749_v63, %v749_v63  ;;  %v752_v6 = vadd.f32 %v751_v4, %v1501_v27  ;;  %v783_v7 = vpop.f32.mrb[30].mxu1  ;;  %v1116_v8 = vpop.f32.mrb[31].mxu0 }
 0x132   :  { %v973_v10 = vpack.c.bf16 %v781_v2, %v781_v2  ;;  %v784_v13 = vadd.f32 %v783_v7, %v696_v30  ;;  %v1132_v14 = vpop.f32.mrb[31].mxu1 }
 0x133   :  { %856 = vst.msk [vmem:[%s1589_s3] sm:$0xf] %vm855_vm2, %v965_v5  ;;  %v966_v11 = vpack.c.bf16 %v752_v6, %v752_v6 }
 0x134   :  { %864 = vst.msk [vmem:[%s1589_s3 + $0x20] sm:$0xf] %vm855_vm2, %v973_v10  ;;  %v974_v25 = vpack.c.bf16 %v784_v13, %v784_v13 }
 0x135   :  { %857 = vst.msk [vmem:[%s1589_s3 + $0x4] sm:$0xf] %vm855_vm2, %v966_v11 }
 0x136   :  { %865 = vst.msk [vmem:[%s1589_s3 + $0x24] sm:$0xf] %vm855_vm2, %v974_v25  ;;  %v756_v27 = vpop.f32.mrb[32].mxu0 }
 0x137   :  { %v757_v15 = vadd.f32 %v756_v27, %v1505_v41  ;;  %v788_v16 = vpop.f32.mrb[32].mxu1  ;;  %v1119_v17 = vpop.f32.mrb[33].mxu0 }
 0x138   :  { %v789_v18 = vadd.f32 %v788_v16, %v701_v46  ;;  %v1135_v19 = vpop.f32.mrb[33].mxu1  ;;  %v759_v20 = vpop.f32.mrb[34].mxu0 }
 0x139   :  { %v967_v21 = vpack.c.bf16 %v757_v15, %v757_v15  ;;  %v760_v22 = vadd.f32 %v759_v20, %v1507_v43  ;;  %v791_v23 = vpop.f32.mrb[34].mxu1  ;;  %v1120_v24 = vpop.f32.mrb[35].mxu0 }
 0x13a   :  { %v975_v26 = vpack.c.bf16 %v789_v18, %v789_v18  ;;  %v792_v28 = vadd.f32 %v791_v23, %v704_v48  ;;  %v1136_v29 = vpop.f32.mrb[35].mxu1 }
 0x13b   :  { %858 = vst.msk [vmem:[%s1589_s3 + $0x8] sm:$0xf] %vm855_vm2, %v967_v21  ;;  %v968_v30 = vpack.c.bf16 %v760_v22, %v760_v22 }
 0x13c   :  { %866 = vst.msk [vmem:[%s1589_s3 + $0x28] sm:$0xf] %vm855_vm2, %v975_v26  ;;  %v976_v41 = vpack.c.bf16 %v792_v28, %v792_v28 }
 0x13d   :  { %859 = vst.msk [vmem:[%s1589_s3 + $0xc] sm:$0xf] %vm855_vm2, %v968_v30 }
 0x13e   :  { %867 = vst.msk [vmem:[%s1589_s3 + $0x2c] sm:$0xf] %vm855_vm2, %v976_v41  ;;  %v764_v43 = vpop.f32.mrb[36].mxu0 }
 0x13f   :  { %v765_v31 = vadd.f32 %v764_v43, %v1511_v57  ;;  %v796_v32 = vpop.f32.mrb[36].mxu1  ;;  %v1123_v33 = vpop.f32.mrb[37].mxu0 }
 0x140   :  { %v797_v34 = vadd.f32 %v796_v32, %v709_v61  ;;  %v767_v35 = vpop.f32.mrb[38].mxu0  ;;  %v1139_v36 = vpop.f32.mrb[37].mxu1 }
 0x141   :  { %v969_v37 = vpack.c.bf16 %v765_v31, %v765_v31  ;;  %v768_v38 = vadd.f32 %v767_v35, %v1513_v59  ;;  %v1124_v39 = vpop.f32.mrb[39].mxu0  ;;  %v799_v40 = vpop.f32.mrb[38].mxu1 }
 0x142   :  { %v977_v42 = vpack.c.bf16 %v797_v34, %v797_v34  ;;  %v1140_v44 = vpop.f32.mrb[39].mxu1 }
 0x143   :  { %860 = vst.msk [vmem:[%s1589_s3 + $0x10] sm:$0xf] %vm855_vm2, %v969_v37  ;;  %v970_v45 = vpack.c.bf16 %v768_v38, %v768_v38 }
 0x144   :  { %868 = vst.msk [vmem:[%s1589_s3 + $0x30] sm:$0xf] %vm855_vm2, %v977_v42 }
 0x145   :  { %861 = vst.msk [vmem:[%s1589_s3 + $0x14] sm:$0xf] %vm855_vm2, %v970_v45 }
 0x146   :  { %v772_v57 = vpop.f32.mrb[40].mxu0 }
 0x147   :  { %v773_v59 = vadd.f32 %v772_v57, %v1517_v9  ;;  %v1127_v46 = vpop.f32.mrb[41].mxu0 }
 0x148   :  { %v775_v47 = vpop.f32.mrb[42].mxu0 }
 0x149   :  { %v971_v48 = vpack.c.bf16 %v773_v59, %v773_v59  ;;  %v776_v49 = vadd.f32 %v775_v47, %v1519_v12  ;;  %v1128_v50 = vpop.f32.mrb[43].mxu0 }
 0x14b   :  { %862 = vst.msk [vmem:[%s1589_s3 + $0x18] sm:$0xf] %vm855_vm2, %v971_v48  ;;  %v972_v51 = vpack.c.bf16 %v776_v49, %v776_v49 }
 0x14d   :  { %863 = vst.msk [vmem:[%s1589_s3 + $0x1c] sm:$0xf] %vm855_vm2, %v972_v51 }

// kernel: network_forward.7
= control target key start
LH: loop header
LB: loop body
LE: loop exit
PB: predicated region body
PF: predicated region fallthrough
CT: control target
= control target key end

     0   :  { %vm2485_vm0 = vcmask 523264   ;;  %s5704_s1 = inlined_call_operand.vmem [shape: bf16[3136,256], index: 1, kind: input, shape index: {}]   ;;  %s5705_s0 = inlined_call_operand.vmem [shape: bf16[8,3136], index: 0, kind: input, shape index: {}]   ;;  %s5706_s3 = inlined_call_operand.vmem [shape: bf16[256,128], index: 3, kind: input, shape index: {}]   ;;  %s5707_s2 = inlined_call_operand.vmem [shape: f32[1,256], index: 2, kind: input, shape index: {}]   ;;  %s5708_s4 = inlined_call_operand.vmem [shape: f32[1,128], index: 4, kind: input, shape index: {}]   ;;  %s5709_s5 = inlined_call_operand.vmem [shape: f32[8,128], index: 5, kind: output, shape index: {}]  }
   0x1   :  { %v3712_v0 = vld [vmem:[%s5704_s1 + $0x4] ss:$8 sps:$4 sm:$0xff]   ;;  %v3716_v2 = vld [vmem:[%s5704_s1] ss:$8 sps:$4 sm:$0xff]   ;;  %v3718_v4 = vld [vmem:[%s5704_s1 + $0x14] ss:$8 sps:$4 sm:$0xff]  }
   0x2   :  { %v3714_v1 = vld [vmem:[%s5704_s1 + $0x604] ss:$8 sps:$4 sm:$0xff]   ;;  %2489 = vmatprep.subr.bf16.mxu1 %v3712_v0  ;;  %v3717_v3 = vld [vmem:[%s5704_s1 + $0x600] ss:$8 sps:$4 sm:$0xff]   ;;  %v3720_v5 = vld [vmem:[%s5704_s1 + $0x614] ss:$8 sps:$4 sm:$0xff]  }
   0x3   :  { %2735 = vmatprep.subr.bf16.mxu0 %v3714_v1  ;;  %2490 = vmatpush1.bf16.msra.mxu1 %v3716_v2  ;;  %v3722_v6 = vld [vmem:[%s5704_s1 + $0x10] ss:$8 sps:$4 sm:$0xff]   ;;  %v3724_v8 = vld [vmem:[%s5704_s1 + $0x24] ss:$8 sps:$4 sm:$0xff]   ;;  %v3728_v10 = vld [vmem:[%s5704_s1 + $0x20] ss:$8 sps:$4 sm:$0xff]  }
   0x4   :  { %2736 = vmatpush1.bf16.msra.mxu0 %v3717_v3  ;;  %2491 = vmatprep.subr.bf16.mxu1 %v3718_v4  ;;  %v3723_v7 = vld [vmem:[%s5704_s1 + $0x610] ss:$8 sps:$4 sm:$0xff]   ;;  %v3726_v9 = vld [vmem:[%s5704_s1 + $0x624] ss:$8 sps:$4 sm:$0xff]   ;;  %v3729_v11 = vld [vmem:[%s5704_s1 + $0x620] ss:$8 sps:$4 sm:$0xff]  }
   0x5   :  { %2737 = vmatprep.subr.bf16.mxu0 %v3720_v5  ;;  %v3730_v12 = vld [vmem:[%s5704_s1 + $0x34] ss:$8 sps:$4 sm:$0xff]   ;;  %v3734_v14 = vld [vmem:[%s5704_s1 + $0x30] ss:$8 sps:$4 sm:$0xff]   ;;  %v3736_v16 = vld [vmem:[%s5704_s1 + $0x44] ss:$8 sps:$4 sm:$0xff]  }
   0x6   :  { %v3732_v13 = vld [vmem:[%s5704_s1 + $0x634] ss:$8 sps:$4 sm:$0xff]   ;;  %v3735_v15 = vld [vmem:[%s5704_s1 + $0x630] ss:$8 sps:$4 sm:$0xff]   ;;  %v3738_v17 = vld [vmem:[%s5704_s1 + $0x644] ss:$8 sps:$4 sm:$0xff]  }
   0x7   :  { %2492 = vmatpush1.bf16.msra.mxu1 %v3722_v6  ;;  %v3740_v18 = vld [vmem:[%s5704_s1 + $0x40] ss:$8 sps:$4 sm:$0xff]   ;;  %v3742_v20 = vld [vmem:[%s5704_s1 + $0x54] ss:$8 sps:$4 sm:$0xff]   ;;  %v3746_v22 = vld [vmem:[%s5704_s1 + $0x50] ss:$8 sps:$4 sm:$0xff]  }
   0x8   :  { %2738 = vmatpush1.bf16.msra.mxu0 %v3723_v7  ;;  %2493 = vmatprep.subr.bf16.mxu1 %v3724_v8  ;;  %v3741_v19 = vld [vmem:[%s5704_s1 + $0x640] ss:$8 sps:$4 sm:$0xff]   ;;  %v3744_v21 = vld [vmem:[%s5704_s1 + $0x654] ss:$8 sps:$4 sm:$0xff]   ;;  %v3747_v23 = vld [vmem:[%s5704_s1 + $0x650] ss:$8 sps:$4 sm:$0xff]  }
   0x9   :  { %2739 = vmatprep.subr.bf16.mxu0 %v3726_v9  ;;  %v3748_v24 = vld [vmem:[%s5704_s1 + $0x64] ss:$8 sps:$4 sm:$0xff]   ;;  %v3752_v26 = vld [vmem:[%s5704_s1 + $0x60] ss:$8 sps:$4 sm:$0xff]   ;;  %v3754_v28 = vld [vmem:[%s5704_s1 + $0x74] ss:$8 sps:$4 sm:$0xff]  }
   0xa   :  { %v3750_v25 = vld [vmem:[%s5704_s1 + $0x664] ss:$8 sps:$4 sm:$0xff]   ;;  %v3753_v27 = vld [vmem:[%s5704_s1 + $0x660] ss:$8 sps:$4 sm:$0xff]   ;;  %v3756_v29 = vld [vmem:[%s5704_s1 + $0x674] ss:$8 sps:$4 sm:$0xff]  }
   0xb   :  { %2494 = vmatpush1.bf16.msra.mxu1 %v3728_v10  ;;  %v3758_v30 = vld [vmem:[%s5704_s1 + $0x70] ss:$8 sps:$4 sm:$0xff]   ;;  %v3760_v32 = vld [vmem:[%s5704_s1 + $0x84] ss:$8 sps:$4 sm:$0xff]   ;;  %v3764_v34 = vld [vmem:[%s5704_s1 + $0x80] ss:$8 sps:$4 sm:$0xff]  }
   0xc   :  { %2740 = vmatpush1.bf16.msra.mxu0 %v3729_v11  ;;  %2495 = vmatprep.subr.bf16.mxu1 %v3730_v12  ;;  %v3759_v31 = vld [vmem:[%s5704_s1 + $0x670] ss:$8 sps:$4 sm:$0xff]   ;;  %v3762_v33 = vld [vmem:[%s5704_s1 + $0x684] ss:$8 sps:$4 sm:$0xff]   ;;  %v3765_v35 = vld [vmem:[%s5704_s1 + $0x680] ss:$8 sps:$4 sm:$0xff]  }
   0xd   :  { %2741 = vmatprep.subr.bf16.mxu0 %v3732_v13  ;;  %v3766_v36 = vld [vmem:[%s5704_s1 + $0x94] ss:$8 sps:$4 sm:$0xff]   ;;  %v3770_v38 = vld [vmem:[%s5704_s1 + $0x90] ss:$8 sps:$4 sm:$0xff]   ;;  %v3772_v40 = vld [vmem:[%s5704_s1 + $0xa4] ss:$8 sps:$4 sm:$0xff]  }
   0xe   :  { %v3768_v37 = vld [vmem:[%s5704_s1 + $0x694] ss:$8 sps:$4 sm:$0xff]   ;;  %v3771_v39 = vld [vmem:[%s5704_s1 + $0x690] ss:$8 sps:$4 sm:$0xff]   ;;  %v3774_v41 = vld [vmem:[%s5704_s1 + $0x6a4] ss:$8 sps:$4 sm:$0xff]  }
   0xf   :  { %2496 = vmatpush1.bf16.msra.mxu1 %v3734_v14  ;;  %v3776_v42 = vld [vmem:[%s5704_s1 + $0xa0] ss:$8 sps:$4 sm:$0xff]   ;;  %v3778_v44 = vld [vmem:[%s5704_s1 + $0xb4] ss:$8 sps:$4 sm:$0xff]   ;;  %v3782_v47 = vld [vmem:[%s5704_s1 + $0xb0] ss:$8 sps:$4 sm:$0xff]  }
  0x10   :  { %2742 = vmatpush1.bf16.msra.mxu0 %v3735_v15  ;;  %2497 = vmatprep.subr.bf16.mxu1 %v3736_v16  ;;  %v3777_v43 = vld [vmem:[%s5704_s1 + $0x6a0] ss:$8 sps:$4 sm:$0xff]   ;;  %v3780_v45 = vld [vmem:[%s5704_s1 + $0x6b4] ss:$8 sps:$4 sm:$0xff]   ;;  %v3783_v49 = vld [vmem:[%s5704_s1 + $0x6b0] ss:$8 sps:$4 sm:$0xff]  }
  0x11   :  { %2743 = vmatprep.subr.bf16.mxu0 %v3738_v17  ;;  %v21_v46 = vld [vmem:[%s5705_s0] sm:$0xff]  ;;  %v27_v50 = vld [vmem:[%s5705_s0 + $0x30] sm:$0xff] }
  0x12   :  { %v3207_v48 = vcombine.high %v21_v46, %v21_v46  ;;  %v3784_v51 = vld [vmem:[%s5704_s1 + $0xc4] ss:$8 sps:$4 sm:$0xff]   ;;  %v3219_v53 = vcombine.high %v27_v50, %v27_v50  ;;  %v3788_v54 = vld [vmem:[%s5704_s1 + $0xc0] ss:$8 sps:$4 sm:$0xff]   ;;  %v3790_v56 = vld [vmem:[%s5704_s1 + $0xd4] ss:$8 sps:$4 sm:$0xff]   ;;  %v3206_v6 = vcombine.low %v21_v46, %v21_v46  ;;  %v3218_v7 = vcombine.low %v27_v50, %v27_v50 }
  0x13   :  { %2498 = vmatpush1.bf16.msra.mxu1 %v3740_v18  ;;  %v3786_v52 = vld [vmem:[%s5704_s1 + $0x6c4] ss:$8 sps:$4 sm:$0xff]   ;;  %v3789_v55 = vld [vmem:[%s5704_s1 + $0x6c0] ss:$8 sps:$4 sm:$0xff]   ;;  %v3792_v57 = vld [vmem:[%s5704_s1 + $0x6d4] ss:$8 sps:$4 sm:$0xff]  }
  0x14   :  { %2744 = vmatpush1.bf16.msra.mxu0 %v3741_v19  ;;  %2499 = vmatprep.subr.bf16.mxu1 %v3742_v20  ;;  %v3794_v58 = vld [vmem:[%s5704_s1 + $0xd0] ss:$8 sps:$4 sm:$0xff]   ;;  %v3796_v60 = vld [vmem:[%s5704_s1 + $0xe4] ss:$8 sps:$4 sm:$0xff]   ;;  %v3800_v62 = vld [vmem:[%s5704_s1 + $0xe0] ss:$8 sps:$4 sm:$0xff]  }
  0x15   :  { %2745 = vmatprep.subr.bf16.mxu0 %v3744_v21  ;;  %2521 = vmatprep.mubr.bf16.mxu1 %v3207_v48  ;;  %v3795_v59 = vld [vmem:[%s5704_s1 + $0x6d0] ss:$8 sps:$4 sm:$0xff]   ;;  %v3798_v61 = vld [vmem:[%s5704_s1 + $0x6e4] ss:$8 sps:$4 sm:$0xff]   ;;  %v3801_v63 = vld [vmem:[%s5704_s1 + $0x6e0] ss:$8 sps:$4 sm:$0xff]  }
  0x16   :  { %2767 = vmatprep.mubr.bf16.mxu0 %v3219_v53  ;;  %v3802_v0 = vld [vmem:[%s5704_s1 + $0xf4] ss:$8 sps:$4 sm:$0xff]   ;;  %v3806_v2 = vld [vmem:[%s5704_s1 + $0xf0] ss:$8 sps:$4 sm:$0xff]   ;;  %v3812_v4 = vld [vmem:[%s5704_s1 + $0x104] ss:$8 sps:$4 sm:$0xff]  }
  0x17   :  { %2500 = vmatpush1.bf16.msra.mxu1 %v3746_v22  ;;  %v3804_v1 = vld [vmem:[%s5704_s1 + $0x6f4] ss:$8 sps:$4 sm:$0xff]   ;;  %v3807_v3 = vld [vmem:[%s5704_s1 + $0x6f0] ss:$8 sps:$4 sm:$0xff]   ;;  %v3817_v5 = vld [vmem:[%s5704_s1 + $0x704] ss:$8 sps:$4 sm:$0xff]  }
  0x18   :  { %2746 = vmatpush1.bf16.msra.mxu0 %v3747_v23  ;;  %2501 = vmatprep.subr.bf16.mxu1 %v3748_v24  ;;  %v3810_v8 = vld [vmem:[%s5704_s1 + $0x100] ss:$8 sps:$4 sm:$0xff]   ;;  %v3820_v10 = vld [vmem:[%s5704_s1 + $0x114] ss:$8 sps:$4 sm:$0xff]   ;;  %v3818_v12 = vld [vmem:[%s5704_s1 + $0x110] ss:$8 sps:$4 sm:$0xff]  }
  0x19   :  { %2747 = vmatprep.subr.bf16.mxu0 %v3750_v25  ;;  %v3815_v9 = vld [vmem:[%s5704_s1 + $0x700] ss:$8 sps:$4 sm:$0xff]   ;;  %v3823_v11 = vld [vmem:[%s5704_s1 + $0x714] ss:$8 sps:$4 sm:$0xff]   ;;  %v3821_v13 = vld [vmem:[%s5704_s1 + $0x710] ss:$8 sps:$4 sm:$0xff]  }
  0x1a   :  { %v3826_v14 = vld [vmem:[%s5704_s1 + $0x124] ss:$8 sps:$4 sm:$0xff]   ;;  %v3824_v16 = vld [vmem:[%s5704_s1 + $0x120] ss:$8 sps:$4 sm:$0xff]   ;;  %v3832_v18 = vld [vmem:[%s5704_s1 + $0x134] ss:$8 sps:$4 sm:$0xff]  }
  0x1b   :  { %2502 = vmatpush1.bf16.msra.mxu1 %v3752_v26  ;;  %v3829_v15 = vld [vmem:[%s5704_s1 + $0x724] ss:$8 sps:$4 sm:$0xff]   ;;  %v3827_v17 = vld [vmem:[%s5704_s1 + $0x720] ss:$8 sps:$4 sm:$0xff]   ;;  %v3835_v19 = vld [vmem:[%s5704_s1 + $0x734] ss:$8 sps:$4 sm:$0xff]  }
  0x1c   :  { %2748 = vmatpush1.bf16.msra.mxu0 %v3753_v27  ;;  %2503 = vmatprep.subr.bf16.mxu1 %v3754_v28  ;;  %v3830_v20 = vld [vmem:[%s5704_s1 + $0x130] ss:$8 sps:$4 sm:$0xff]   ;;  %v3838_v22 = vld [vmem:[%s5704_s1 + $0x144] ss:$8 sps:$4 sm:$0xff]   ;;  %v3836_v24 = vld [vmem:[%s5704_s1 + $0x140] ss:$8 sps:$4 sm:$0xff]  }
  0x1d   :  { %2749 = vmatprep.subr.bf16.mxu0 %v3756_v29  ;;  %v3833_v21 = vld [vmem:[%s5704_s1 + $0x730] ss:$8 sps:$4 sm:$0xff]   ;;  %v3841_v23 = vld [vmem:[%s5704_s1 + $0x744] ss:$8 sps:$4 sm:$0xff]   ;;  %v3839_v25 = vld [vmem:[%s5704_s1 + $0x740] ss:$8 sps:$4 sm:$0xff]  }
  0x1e   :  { %v3844_v26 = vld [vmem:[%s5704_s1 + $0x154] ss:$8 sps:$4 sm:$0xff]   ;;  %v3842_v28 = vld [vmem:[%s5704_s1 + $0x150] ss:$8 sps:$4 sm:$0xff]   ;;  %v3874_v50 = vld [vmem:[%s5704_s1 + $0x1a4] ss:$8 sps:$4 sm:$0xff]  }
  0x1f   :  { %2504 = vmatpush1.bf16.msra.mxu1 %v3758_v30  ;;  %v3847_v27 = vld [vmem:[%s5704_s1 + $0x754] ss:$8 sps:$4 sm:$0xff]   ;;  %v3845_v29 = vld [vmem:[%s5704_s1 + $0x750] ss:$8 sps:$4 sm:$0xff]   ;;  %v3850_v30 = vld [vmem:[%s5704_s1 + $0x164] ss:$8 sps:$4 sm:$0xff]  }
  0x20   :  { %2750 = vmatpush1.bf16.msra.mxu0 %v3759_v31  ;;  %2505 = vmatprep.subr.bf16.mxu1 %v3760_v32  ;;  %v3853_v31 = vld [vmem:[%s5704_s1 + $0x764] ss:$8 sps:$4 sm:$0xff]   ;;  %v3868_v46 = vld [vmem:[%s5704_s1 + $0x194] ss:$8 sps:$4 sm:$0xff]   ;;  %v3866_v48 = vld [vmem:[%s5704_s1 + $0x190] ss:$8 sps:$4 sm:$0xff]  }
  0x21   :  { %2751 = vmatprep.subr.bf16.mxu0 %v3762_v33  ;;  %v4651_v32 = vld [vmem:[%s5705_s0 + $0x8] sm:$0xff] }
  0x22   :  { %v3848_v33 = vld [vmem:[%s5704_s1 + $0x160] ss:$8 sps:$4 sm:$0xff]  }
  0x23   :  { %2506 = vmatpush1.bf16.msra.mxu1 %v3764_v34  ;;  %v3851_v34 = vld [vmem:[%s5704_s1 + $0x760] ss:$8 sps:$4 sm:$0xff]  }
  0x24   :  { %2752 = vmatpush1.bf16.msra.mxu0 %v3765_v35  ;;  %2507 = vmatprep.subr.bf16.mxu1 %v3766_v36  ;;  %v3209_v35 = vcombine.high %v4651_v32, %v4651_v32  ;;  %v4664_v36 = vld [vmem:[%s5705_s0 + $0x38] sm:$0xff]  ;;  %v3875_v53 = vld [vmem:[%s5704_s1 + $0x7a0] ss:$8 sps:$4 sm:$0xff]  }
  0x25   :  { %2753 = vmatprep.subr.bf16.mxu0 %v3768_v37  ;;  %v3856_v37 = vld [vmem:[%s5704_s1 + $0x174] ss:$8 sps:$4 sm:$0xff]  }
  0x27   :  { %2508 = vmatpush1.bf16.msra.mxu1 %v3770_v38  ;;  %v3221_v38 = vcombine.high %v4664_v36, %v4664_v36 }
  0x28   :  { %2754 = vmatpush1.bf16.msra.mxu0 %v3771_v39  ;;  %2509 = vmatprep.subr.bf16.mxu1 %v3772_v40  ;;  %v3859_v39 = vld [vmem:[%s5704_s1 + $0x774] ss:$8 sps:$4 sm:$0xff]   ;;  %v3854_v40 = vld [vmem:[%s5704_s1 + $0x170] ss:$8 sps:$4 sm:$0xff]  }
  0x29   :  { %2755 = vmatprep.subr.bf16.mxu0 %v3774_v41  ;;  %v3857_v41 = vld [vmem:[%s5704_s1 + $0x770] ss:$8 sps:$4 sm:$0xff]  }
  0x2b   :  { %2510 = vmatpush1.bf16.msra.mxu1 %v3776_v42  ;;  %v3862_v42 = vld [vmem:[%s5704_s1 + $0x184] ss:$8 sps:$4 sm:$0xff]  }
  0x2c   :  { %2756 = vmatpush1.bf16.msra.mxu0 %v3777_v43  ;;  %2511 = vmatprep.subr.bf16.mxu1 %v3778_v44  ;;  %v3865_v43 = vld [vmem:[%s5704_s1 + $0x784] ss:$8 sps:$4 sm:$0xff]   ;;  %v3860_v44 = vld [vmem:[%s5704_s1 + $0x180] ss:$8 sps:$4 sm:$0xff]  }
  0x2d   :  { %2757 = vmatprep.subr.bf16.mxu0 %v3780_v45  ;;  %v3863_v45 = vld [vmem:[%s5704_s1 + $0x780] ss:$8 sps:$4 sm:$0xff]  }
  0x2f   :  { %2512 = vmatpush1.bf16.msra.mxu1 %v3782_v47  ;;  %v3871_v47 = vld [vmem:[%s5704_s1 + $0x794] ss:$8 sps:$4 sm:$0xff]  }
  0x30   :  { %2758 = vmatpush1.bf16.msra.mxu0 %v3783_v49  ;;  %2513 = vmatprep.subr.bf16.mxu1 %v3784_v51  ;;  %v3869_v49 = vld [vmem:[%s5704_s1 + $0x790] ss:$8 sps:$4 sm:$0xff]   ;;  %v3877_v51 = vld [vmem:[%s5704_s1 + $0x7a4] ss:$8 sps:$4 sm:$0xff]  }
  0x31   :  { %2759 = vmatprep.subr.bf16.mxu0 %v3786_v52  ;;  %v3872_v52 = vld [vmem:[%s5704_s1 + $0x1a0] ss:$8 sps:$4 sm:$0xff]  }
  0x33   :  { %2514 = vmatpush1.bf16.msra.mxu1 %v3788_v54  ;;  %v3880_v54 = vld [vmem:[%s5704_s1 + $0x1b4] ss:$8 sps:$4 sm:$0xff]  }
  0x34   :  { %2760 = vmatpush1.bf16.msra.mxu0 %v3789_v55  ;;  %2515 = vmatprep.subr.bf16.mxu1 %v3790_v56  ;;  %v3883_v55 = vld [vmem:[%s5704_s1 + $0x7b4] ss:$8 sps:$4 sm:$0xff]   ;;  %v3878_v56 = vld [vmem:[%s5704_s1 + $0x1b0] ss:$8 sps:$4 sm:$0xff]  }
  0x35   :  { %2761 = vmatprep.subr.bf16.mxu0 %v3792_v57  ;;  %v3881_v57 = vld [vmem:[%s5704_s1 + $0x7b0] ss:$8 sps:$4 sm:$0xff]  }
  0x37   :  { %2516 = vmatpush1.bf16.msra.mxu1 %v3794_v58  ;;  %v3886_v58 = vld [vmem:[%s5704_s1 + $0x1c4] ss:$8 sps:$4 sm:$0xff]  }
  0x38   :  { %2762 = vmatpush1.bf16.msra.mxu0 %v3795_v59  ;;  %2517 = vmatprep.subr.bf16.mxu1 %v3796_v60  ;;  %v3889_v59 = vld [vmem:[%s5704_s1 + $0x7c4] ss:$8 sps:$4 sm:$0xff]   ;;  %v3884_v60 = vld [vmem:[%s5704_s1 + $0x1c0] ss:$8 sps:$4 sm:$0xff]  }
  0x39   :  { %2763 = vmatprep.subr.bf16.mxu0 %v3798_v61  ;;  %v3887_v61 = vld [vmem:[%s5704_s1 + $0x7c0] ss:$8 sps:$4 sm:$0xff]  }
  0x3b   :  { %2518 = vmatpush1.bf16.msra.mxu1 %v3800_v62  ;;  %v3892_v62 = vld [vmem:[%s5704_s1 + $0x1d4] ss:$8 sps:$4 sm:$0xff]  }
  0x3c   :  { %2764 = vmatpush1.bf16.msra.mxu0 %v3801_v63  ;;  %2519 = vmatprep.subr.bf16.mxu1 %v3802_v0  ;;  %v3895_v63 = vld [vmem:[%s5704_s1 + $0x7d4] ss:$8 sps:$4 sm:$0xff]   ;;  %v3890_v0 = vld [vmem:[%s5704_s1 + $0x1d0] ss:$8 sps:$4 sm:$0xff]  }
  0x3d   :  { %2765 = vmatprep.subr.bf16.mxu0 %v3804_v1  ;;  %v3893_v1 = vld [vmem:[%s5704_s1 + $0x7d0] ss:$8 sps:$4 sm:$0xff]  }
  0x3f   :  { %2520 = vmatpush1.bf16.msra.mxu1 %v3806_v2  ;;  %v3898_v2 = vld [vmem:[%s5704_s1 + $0x1e4] ss:$8 sps:$4 sm:$0xff]  }
  0x40   :  { %2766 = vmatpush1.bf16.msra.mxu0 %v3807_v3  ;;  %2530 = vmatprep.subr.bf16.mxu1 %v3812_v4  ;;  %v3901_v3 = vld [vmem:[%s5704_s1 + $0x7e4] ss:$8 sps:$4 sm:$0xff]   ;;  %v3896_v4 = vld [vmem:[%s5704_s1 + $0x1e0] ss:$8 sps:$4 sm:$0xff]  }
  0x41   :  { %2776 = vmatprep.subr.bf16.mxu0 %v3817_v5  ;;  %v3899_v5 = vld [vmem:[%s5704_s1 + $0x7e0] ss:$8 sps:$4 sm:$0xff]  }
  0x42   :  { %2522 = vmatmul.mubr.bf16.vlgmr.msra.gmra.mrb[0].mxu1 %v3206_v6  ;;  %v3904_v6 = vld [vmem:[%s5704_s1 + $0x1f4] ss:$8 sps:$4 sm:$0xff]  }
  0x43   :  { %2768 = vmatmul.mubr.bf16.vlgmr.msra.gmra.mrb[0].mxu0 %v3218_v7  ;;  %2531 = vmatpush1.bf16.msra.mxu1 %v3810_v8  ;;  %v3907_v7 = vld [vmem:[%s5704_s1 + $0x7f4] ss:$8 sps:$4 sm:$0xff]   ;;  %v3902_v8 = vld [vmem:[%s5704_s1 + $0x1f0] ss:$8 sps:$4 sm:$0xff]  }
  0x44   :  { %2777 = vmatpush1.bf16.msra.mxu0 %v3815_v9  ;;  %2532 = vmatprep.subr.bf16.mxu1 %v3820_v10  ;;  %v3905_v9 = vld [vmem:[%s5704_s1 + $0x7f0] ss:$8 sps:$4 sm:$0xff]   ;;  %v3912_v10 = vld [vmem:[%s5704_s1 + $0x204] ss:$8 sps:$4 sm:$0xff]  }
  0x45   :  { %2778 = vmatprep.subr.bf16.mxu0 %v3823_v11  ;;  %2562 = vmatprep.mubr.bf16.mxu1 %v3209_v35  ;;  %v3917_v11 = vld [vmem:[%s5704_s1 + $0x804] ss:$8 sps:$4 sm:$0xff]   ;;  %v3939_v35 = vld [vmem:[%s5704_s1 + $0x840] ss:$8 sps:$4 sm:$0xff]  }
  0x46   :  { %2808 = vmatprep.mubr.bf16.mxu0 %v3221_v38  ;;  %v3942_v38 = vld [vmem:[%s5704_s1 + $0x250] ss:$8 sps:$4 sm:$0xff]  }
  0x47   :  { %2533 = vmatpush1.bf16.msra.mxu1 %v3818_v12  ;;  %v3208_v12 = vcombine.low %v4651_v32, %v4651_v32  ;;  %v3938_v32 = vld [vmem:[%s5704_s1 + $0x244] ss:$8 sps:$4 sm:$0xff]  }
  0x48   :  { %2779 = vmatpush1.bf16.msra.mxu0 %v3821_v13  ;;  %2534 = vmatprep.subr.bf16.mxu1 %v3826_v14  ;;  %v3910_v13 = vld [vmem:[%s5704_s1 + $0x200] ss:$8 sps:$4 sm:$0xff]   ;;  %v3220_v14 = vcombine.low %v4664_v36, %v4664_v36  ;;  %v3944_v36 = vld [vmem:[%s5704_s1 + $0x254] ss:$8 sps:$4 sm:$0xff]  }
  0x49   :  { %2780 = vmatprep.subr.bf16.mxu0 %v3829_v15  ;;  %v3915_v15 = vld [vmem:[%s5704_s1 + $0x800] ss:$8 sps:$4 sm:$0xff]  }
  0x4b   :  { %2535 = vmatpush1.bf16.msra.mxu1 %v3824_v16  ;;  %v3920_v16 = vld [vmem:[%s5704_s1 + $0x214] ss:$8 sps:$4 sm:$0xff]  }
  0x4c   :  { %2781 = vmatpush1.bf16.msra.mxu0 %v3827_v17  ;;  %2536 = vmatprep.subr.bf16.mxu1 %v3832_v18  ;;  %v3923_v17 = vld [vmem:[%s5704_s1 + $0x814] ss:$8 sps:$4 sm:$0xff]  }
  0x4d   :  { %2782 = vmatprep.subr.bf16.mxu0 %v3835_v19  ;;  %v4801_v18 = vld [vmem:[%s5705_s0 + $0x10] sm:$0xff] }
  0x4e   :  { %v3211_v19 = vcombine.high %v4801_v18, %v4801_v18 }
  0x4f   :  { %2537 = vmatpush1.bf16.msra.mxu1 %v3830_v20  ;;  %v4808_v20 = vld [vmem:[%s5705_s0 + $0x40] sm:$0xff] }
  0x50   :  { %2783 = vmatpush1.bf16.msra.mxu0 %v3833_v21  ;;  %2538 = vmatprep.subr.bf16.mxu1 %v3838_v22  ;;  %v3918_v21 = vld [vmem:[%s5704_s1 + $0x210] ss:$8 sps:$4 sm:$0xff]  }
  0x51   :  { %2784 = vmatprep.subr.bf16.mxu0 %v3841_v23  ;;  %v3921_v22 = vld [vmem:[%s5704_s1 + $0x810] ss:$8 sps:$4 sm:$0xff]   ;;  %v3223_v23 = vcombine.high %v4808_v20, %v4808_v20 }
  0x53   :  { %2539 = vmatpush1.bf16.msra.mxu1 %v3836_v24  ;;  %v3926_v24 = vld [vmem:[%s5704_s1 + $0x224] ss:$8 sps:$4 sm:$0xff]  }
  0x54   :  { %2785 = vmatpush1.bf16.msra.mxu0 %v3839_v25  ;;  %2540 = vmatprep.subr.bf16.mxu1 %v3844_v26  ;;  %v3929_v25 = vld [vmem:[%s5704_s1 + $0x824] ss:$8 sps:$4 sm:$0xff]   ;;  %v3924_v26 = vld [vmem:[%s5704_s1 + $0x220] ss:$8 sps:$4 sm:$0xff]  }
  0x55   :  { %2786 = vmatprep.subr.bf16.mxu0 %v3847_v27  ;;  %v3927_v27 = vld [vmem:[%s5704_s1 + $0x820] ss:$8 sps:$4 sm:$0xff]  }
  0x57   :  { %2541 = vmatpush1.bf16.msra.mxu1 %v3842_v28  ;;  %v3932_v28 = vld [vmem:[%s5704_s1 + $0x234] ss:$8 sps:$4 sm:$0xff]  }
  0x58   :  { %2787 = vmatpush1.bf16.msra.mxu0 %v3845_v29  ;;  %2542 = vmatprep.subr.bf16.mxu1 %v3850_v30  ;;  %v3935_v29 = vld [vmem:[%s5704_s1 + $0x834] ss:$8 sps:$4 sm:$0xff]   ;;  %v3930_v30 = vld [vmem:[%s5704_s1 + $0x230] ss:$8 sps:$4 sm:$0xff]  }
  0x59   :  { %2788 = vmatprep.subr.bf16.mxu0 %v3853_v31  ;;  %v3933_v31 = vld [vmem:[%s5704_s1 + $0x830] ss:$8 sps:$4 sm:$0xff]  }
  0x5b   :  { %2543 = vmatpush1.bf16.msra.mxu1 %v3848_v33  ;;  %v3941_v33 = vld [vmem:[%s5704_s1 + $0x844] ss:$8 sps:$4 sm:$0xff]  }
  0x5c   :  { %2789 = vmatpush1.bf16.msra.mxu0 %v3851_v34  ;;  %2544 = vmatprep.subr.bf16.mxu1 %v3856_v37  ;;  %v3936_v34 = vld [vmem:[%s5704_s1 + $0x240] ss:$8 sps:$4 sm:$0xff]   ;;  %v3947_v37 = vld [vmem:[%s5704_s1 + $0x854] ss:$8 sps:$4 sm:$0xff]  }
  0x5d   :  { %2790 = vmatprep.subr.bf16.mxu0 %v3859_v39  ;;  %v3945_v39 = vld [vmem:[%s5704_s1 + $0x850] ss:$8 sps:$4 sm:$0xff]  }
  0x5f   :  { %2545 = vmatpush1.bf16.msra.mxu1 %v3854_v40  ;;  %v3950_v40 = vld [vmem:[%s5704_s1 + $0x264] ss:$8 sps:$4 sm:$0xff]  }
  0x60   :  { %2791 = vmatpush1.bf16.msra.mxu0 %v3857_v41  ;;  %2546 = vmatprep.subr.bf16.mxu1 %v3862_v42  ;;  %v3953_v41 = vld [vmem:[%s5704_s1 + $0x864] ss:$8 sps:$4 sm:$0xff]   ;;  %v3948_v42 = vld [vmem:[%s5704_s1 + $0x260] ss:$8 sps:$4 sm:$0xff]  }
  0x61   :  { %2792 = vmatprep.subr.bf16.mxu0 %v3865_v43  ;;  %v3951_v43 = vld [vmem:[%s5704_s1 + $0x860] ss:$8 sps:$4 sm:$0xff]  }
  0x63   :  { %2547 = vmatpush1.bf16.msra.mxu1 %v3860_v44  ;;  %v3956_v44 = vld [vmem:[%s5704_s1 + $0x274] ss:$8 sps:$4 sm:$0xff]  }
  0x64   :  { %2793 = vmatpush1.bf16.msra.mxu0 %v3863_v45  ;;  %2548 = vmatprep.subr.bf16.mxu1 %v3868_v46  ;;  %v3959_v45 = vld [vmem:[%s5704_s1 + $0x874] ss:$8 sps:$4 sm:$0xff]   ;;  %v3954_v46 = vld [vmem:[%s5704_s1 + $0x270] ss:$8 sps:$4 sm:$0xff]  }
  0x65   :  { %2794 = vmatprep.subr.bf16.mxu0 %v3871_v47  ;;  %v3957_v47 = vld [vmem:[%s5704_s1 + $0x870] ss:$8 sps:$4 sm:$0xff]  }
  0x67   :  { %2549 = vmatpush1.bf16.msra.mxu1 %v3866_v48  ;;  %v3962_v48 = vld [vmem:[%s5704_s1 + $0x284] ss:$8 sps:$4 sm:$0xff]  }
  0x68   :  { %2795 = vmatpush1.bf16.msra.mxu0 %v3869_v49  ;;  %2550 = vmatprep.subr.bf16.mxu1 %v3874_v50  ;;  %v3965_v49 = vld [vmem:[%s5704_s1 + $0x884] ss:$8 sps:$4 sm:$0xff]   ;;  %v3960_v50 = vld [vmem:[%s5704_s1 + $0x280] ss:$8 sps:$4 sm:$0xff]  }
  0x69   :  { %2796 = vmatprep.subr.bf16.mxu0 %v3877_v51  ;;  %v3963_v51 = vld [vmem:[%s5704_s1 + $0x880] ss:$8 sps:$4 sm:$0xff]  }
  0x6b   :  { %2551 = vmatpush1.bf16.msra.mxu1 %v3872_v52  ;;  %v3968_v52 = vld [vmem:[%s5704_s1 + $0x294] ss:$8 sps:$4 sm:$0xff]  }
  0x6c   :  { %2797 = vmatpush1.bf16.msra.mxu0 %v3875_v53  ;;  %2552 = vmatprep.subr.bf16.mxu1 %v3880_v54  ;;  %v3971_v53 = vld [vmem:[%s5704_s1 + $0x894] ss:$8 sps:$4 sm:$0xff]   ;;  %v3966_v54 = vld [vmem:[%s5704_s1 + $0x290] ss:$8 sps:$4 sm:$0xff]  }
  0x6d   :  { %2798 = vmatprep.subr.bf16.mxu0 %v3883_v55  ;;  %v3969_v55 = vld [vmem:[%s5704_s1 + $0x890] ss:$8 sps:$4 sm:$0xff]  }
  0x6f   :  { %2553 = vmatpush1.bf16.msra.mxu1 %v3878_v56  ;;  %v3974_v56 = vld [vmem:[%s5704_s1 + $0x2a4] ss:$8 sps:$4 sm:$0xff]  }
  0x70   :  { %2799 = vmatpush1.bf16.msra.mxu0 %v3881_v57  ;;  %2554 = vmatprep.subr.bf16.mxu1 %v3886_v58  ;;  %v3977_v57 = vld [vmem:[%s5704_s1 + $0x8a4] ss:$8 sps:$4 sm:$0xff]   ;;  %v3972_v58 = vld [vmem:[%s5704_s1 + $0x2a0] ss:$8 sps:$4 sm:$0xff]  }
  0x71   :  { %2800 = vmatprep.subr.bf16.mxu0 %v3889_v59  ;;  %v3975_v59 = vld [vmem:[%s5704_s1 + $0x8a0] ss:$8 sps:$4 sm:$0xff]  }
  0x73   :  { %2555 = vmatpush1.bf16.msra.mxu1 %v3884_v60  ;;  %v3980_v60 = vld [vmem:[%s5704_s1 + $0x2b4] ss:$8 sps:$4 sm:$0xff]  }
  0x74   :  { %2801 = vmatpush1.bf16.msra.mxu0 %v3887_v61  ;;  %2556 = vmatprep.subr.bf16.mxu1 %v3892_v62  ;;  %v3983_v61 = vld [vmem:[%s5704_s1 + $0x8b4] ss:$8 sps:$4 sm:$0xff]   ;;  %v3978_v62 = vld [vmem:[%s5704_s1 + $0x2b0] ss:$8 sps:$4 sm:$0xff]  }
  0x75   :  { %2802 = vmatprep.subr.bf16.mxu0 %v3895_v63  ;;  %v3981_v63 = vld [vmem:[%s5704_s1 + $0x8b0] ss:$8 sps:$4 sm:$0xff]  }
  0x77   :  { %2557 = vmatpush1.bf16.msra.mxu1 %v3890_v0  ;;  %v3986_v0 = vld [vmem:[%s5704_s1 + $0x2c4] ss:$8 sps:$4 sm:$0xff]  }
  0x78   :  { %2803 = vmatpush1.bf16.msra.mxu0 %v3893_v1  ;;  %2558 = vmatprep.subr.bf16.mxu1 %v3898_v2  ;;  %v3989_v1 = vld [vmem:[%s5704_s1 + $0x8c4] ss:$8 sps:$4 sm:$0xff]   ;;  %v3984_v2 = vld [vmem:[%s5704_s1 + $0x2c0] ss:$8 sps:$4 sm:$0xff]  }
  0x79   :  { %2804 = vmatprep.subr.bf16.mxu0 %v3901_v3  ;;  %v3987_v3 = vld [vmem:[%s5704_s1 + $0x8c0] ss:$8 sps:$4 sm:$0xff]  }
  0x7b   :  { %2559 = vmatpush1.bf16.msra.mxu1 %v3896_v4  ;;  %v3992_v4 = vld [vmem:[%s5704_s1 + $0x2d4] ss:$8 sps:$4 sm:$0xff]  }
  0x7c   :  { %2805 = vmatpush1.bf16.msra.mxu0 %v3899_v5  ;;  %2560 = vmatprep.subr.bf16.mxu1 %v3904_v6  ;;  %v3995_v5 = vld [vmem:[%s5704_s1 + $0x8d4] ss:$8 sps:$4 sm:$0xff]   ;;  %v3990_v6 = vld [vmem:[%s5704_s1 + $0x2d0] ss:$8 sps:$4 sm:$0xff]  }
  0x7d   :  { %2806 = vmatprep.subr.bf16.mxu0 %v3907_v7  ;;  %v3993_v7 = vld [vmem:[%s5704_s1 + $0x8d0] ss:$8 sps:$4 sm:$0xff]  }
  0x7f   :  { %2561 = vmatpush1.bf16.msra.mxu1 %v3902_v8  ;;  %v3998_v8 = vld [vmem:[%s5704_s1 + $0x2e4] ss:$8 sps:$4 sm:$0xff]  }
  0x80   :  { %2807 = vmatpush1.bf16.msra.mxu0 %v3905_v9  ;;  %2571 = vmatprep.subr.bf16.mxu1 %v3912_v10  ;;  %v4001_v9 = vld [vmem:[%s5704_s1 + $0x8e4] ss:$8 sps:$4 sm:$0xff]   ;;  %v3996_v10 = vld [vmem:[%s5704_s1 + $0x2e0] ss:$8 sps:$4 sm:$0xff]  }
  0x81   :  { %2817 = vmatprep.subr.bf16.mxu0 %v3917_v11  ;;  %v3999_v11 = vld [vmem:[%s5704_s1 + $0x8e0] ss:$8 sps:$4 sm:$0xff]  }
  0x82   :  { %2563 = vmatmul.mubr.bf16.vlgmr.msra.gmra.mrb[0].mxu1 %v3208_v12  ;;  %v4004_v12 = vld [vmem:[%s5704_s1 + $0x2f4] ss:$8 sps:$4 sm:$0xff]  }
  0x83   :  { %2809 = vmatmul.mubr.bf16.vlgmr.msra.gmra.mrb[0].mxu0 %v3220_v14  ;;  %2572 = vmatpush1.bf16.msra.mxu1 %v3910_v13  ;;  %v4007_v13 = vld [vmem:[%s5704_s1 + $0x8f4] ss:$8 sps:$4 sm:$0xff]   ;;  %v4002_v14 = vld [vmem:[%s5704_s1 + $0x2f0] ss:$8 sps:$4 sm:$0xff]  }
  0x84   :  { %2818 = vmatpush1.bf16.msra.mxu0 %v3915_v15  ;;  %2573 = vmatprep.subr.bf16.mxu1 %v3920_v16  ;;  %v4005_v15 = vld [vmem:[%s5704_s1 + $0x8f0] ss:$8 sps:$4 sm:$0xff]   ;;  %v4012_v16 = vld [vmem:[%s5704_s1 + $0x304] ss:$8 sps:$4 sm:$0xff]  }
  0x85   :  { %2819 = vmatprep.subr.bf16.mxu0 %v3923_v17  ;;  %2603 = vmatprep.mubr.bf16.mxu1 %v3211_v19  ;;  %v4017_v17 = vld [vmem:[%s5704_s1 + $0x904] ss:$8 sps:$4 sm:$0xff]   ;;  %v4010_v19 = vld [vmem:[%s5704_s1 + $0x300] ss:$8 sps:$4 sm:$0xff]  }
  0x86   :  { %2849 = vmatprep.mubr.bf16.mxu0 %v3223_v23  ;;  %v3222_v23 = vcombine.low %v4808_v20, %v4808_v20 }
  0x87   :  { %2574 = vmatpush1.bf16.msra.mxu1 %v3918_v21  ;;  %v4015_v21 = vld [vmem:[%s5704_s1 + $0x900] ss:$8 sps:$4 sm:$0xff]  }
  0x88   :  { %2820 = vmatpush1.bf16.msra.mxu0 %v3921_v22  ;;  %2575 = vmatprep.subr.bf16.mxu1 %v3926_v24  ;;  %v3210_v22 = vcombine.low %v4801_v18, %v4801_v18  ;;  %v5005_v24 = vld [vmem:[%s5705_s0 + $0x18] sm:$0xff] }
  0x89   :  { %2821 = vmatprep.subr.bf16.mxu0 %v3929_v25  ;;  %v5010_v25 = vld [vmem:[%s5705_s0 + $0x48] sm:$0xff]  ;;  %v4023_v18 = vld [vmem:[%s5704_s1 + $0x914] ss:$8 sps:$4 sm:$0xff]   ;;  %v3213_v20 = vcombine.high %v5005_v24, %v5005_v24 }
  0x8b   :  { %2576 = vmatpush1.bf16.msra.mxu1 %v3924_v26  ;;  %v4020_v26 = vld [vmem:[%s5704_s1 + $0x314] ss:$8 sps:$4 sm:$0xff]  }
  0x8c   :  { %2822 = vmatpush1.bf16.msra.mxu0 %v3927_v27  ;;  %2577 = vmatprep.subr.bf16.mxu1 %v3932_v28  ;;  %v3225_v27 = vcombine.high %v5010_v25, %v5010_v25  ;;  %v4018_v28 = vld [vmem:[%s5704_s1 + $0x310] ss:$8 sps:$4 sm:$0xff]  }
  0x8d   :  { %2823 = vmatprep.subr.bf16.mxu0 %v3935_v29  ;;  %v4021_v29 = vld [vmem:[%s5704_s1 + $0x910] ss:$8 sps:$4 sm:$0xff]  }
  0x8f   :  { %2578 = vmatpush1.bf16.msra.mxu1 %v3930_v30  ;;  %v4026_v30 = vld [vmem:[%s5704_s1 + $0x324] ss:$8 sps:$4 sm:$0xff]  }
  0x90   :  { %2824 = vmatpush1.bf16.msra.mxu0 %v3933_v31  ;;  %2579 = vmatprep.subr.bf16.mxu1 %v3938_v32  ;;  %v4029_v31 = vld [vmem:[%s5704_s1 + $0x924] ss:$8 sps:$4 sm:$0xff]   ;;  %v4024_v32 = vld [vmem:[%s5704_s1 + $0x320] ss:$8 sps:$4 sm:$0xff]  }
  0x91   :  { %2825 = vmatprep.subr.bf16.mxu0 %v3941_v33  ;;  %v4027_v33 = vld [vmem:[%s5704_s1 + $0x920] ss:$8 sps:$4 sm:$0xff]  }
  0x93   :  { %2580 = vmatpush1.bf16.msra.mxu1 %v3936_v34  ;;  %v4032_v34 = vld [vmem:[%s5704_s1 + $0x334] ss:$8 sps:$4 sm:$0xff]  }
  0x94   :  { %2826 = vmatpush1.bf16.msra.mxu0 %v3939_v35  ;;  %2581 = vmatprep.subr.bf16.mxu1 %v3944_v36  ;;  %v4035_v35 = vld [vmem:[%s5704_s1 + $0x934] ss:$8 sps:$4 sm:$0xff]   ;;  %v4030_v36 = vld [vmem:[%s5704_s1 + $0x330] ss:$8 sps:$4 sm:$0xff]  }
  0x95   :  { %2827 = vmatprep.subr.bf16.mxu0 %v3947_v37  ;;  %v4033_v37 = vld [vmem:[%s5704_s1 + $0x930] ss:$8 sps:$4 sm:$0xff]  }
  0x97   :  { %2582 = vmatpush1.bf16.msra.mxu1 %v3942_v38  ;;  %v4038_v38 = vld [vmem:[%s5704_s1 + $0x344] ss:$8 sps:$4 sm:$0xff]  }
  0x98   :  { %2828 = vmatpush1.bf16.msra.mxu0 %v3945_v39  ;;  %2583 = vmatprep.subr.bf16.mxu1 %v3950_v40  ;;  %v4041_v39 = vld [vmem:[%s5704_s1 + $0x944] ss:$8 sps:$4 sm:$0xff]   ;;  %v4036_v40 = vld [vmem:[%s5704_s1 + $0x340] ss:$8 sps:$4 sm:$0xff]  }
  0x99   :  { %2829 = vmatprep.subr.bf16.mxu0 %v3953_v41  ;;  %v4039_v41 = vld [vmem:[%s5704_s1 + $0x940] ss:$8 sps:$4 sm:$0xff]  }
  0x9b   :  { %2584 = vmatpush1.bf16.msra.mxu1 %v3948_v42  ;;  %v4044_v42 = vld [vmem:[%s5704_s1 + $0x354] ss:$8 sps:$4 sm:$0xff]  }
  0x9c   :  { %2830 = vmatpush1.bf16.msra.mxu0 %v3951_v43  ;;  %2585 = vmatprep.subr.bf16.mxu1 %v3956_v44  ;;  %v4047_v43 = vld [vmem:[%s5704_s1 + $0x954] ss:$8 sps:$4 sm:$0xff]   ;;  %v4042_v44 = vld [vmem:[%s5704_s1 + $0x350] ss:$8 sps:$4 sm:$0xff]  }
  0x9d   :  { %2831 = vmatprep.subr.bf16.mxu0 %v3959_v45  ;;  %v4045_v45 = vld [vmem:[%s5704_s1 + $0x950] ss:$8 sps:$4 sm:$0xff]  }
  0x9f   :  { %2586 = vmatpush1.bf16.msra.mxu1 %v3954_v46  ;;  %v4050_v46 = vld [vmem:[%s5704_s1 + $0x364] ss:$8 sps:$4 sm:$0xff]  }
  0xa0   :  { %2832 = vmatpush1.bf16.msra.mxu0 %v3957_v47  ;;  %2587 = vmatprep.subr.bf16.mxu1 %v3962_v48  ;;  %v4053_v47 = vld [vmem:[%s5704_s1 + $0x964] ss:$8 sps:$4 sm:$0xff]   ;;  %v4048_v48 = vld [vmem:[%s5704_s1 + $0x360] ss:$8 sps:$4 sm:$0xff]  }
  0xa1   :  { %2833 = vmatprep.subr.bf16.mxu0 %v3965_v49  ;;  %v4051_v49 = vld [vmem:[%s5704_s1 + $0x960] ss:$8 sps:$4 sm:$0xff]  }
  0xa3   :  { %2588 = vmatpush1.bf16.msra.mxu1 %v3960_v50  ;;  %v4056_v50 = vld [vmem:[%s5704_s1 + $0x374] ss:$8 sps:$4 sm:$0xff]  }
  0xa4   :  { %2834 = vmatpush1.bf16.msra.mxu0 %v3963_v51  ;;  %2589 = vmatprep.subr.bf16.mxu1 %v3968_v52  ;;  %v4059_v51 = vld [vmem:[%s5704_s1 + $0x974] ss:$8 sps:$4 sm:$0xff]   ;;  %v4054_v52 = vld [vmem:[%s5704_s1 + $0x370] ss:$8 sps:$4 sm:$0xff]  }
  0xa5   :  { %2835 = vmatprep.subr.bf16.mxu0 %v3971_v53  ;;  %v4057_v53 = vld [vmem:[%s5704_s1 + $0x970] ss:$8 sps:$4 sm:$0xff]  }
  0xa7   :  { %2590 = vmatpush1.bf16.msra.mxu1 %v3966_v54  ;;  %v4062_v54 = vld [vmem:[%s5704_s1 + $0x384] ss:$8 sps:$4 sm:$0xff]  }
  0xa8   :  { %2836 = vmatpush1.bf16.msra.mxu0 %v3969_v55  ;;  %2591 = vmatprep.subr.bf16.mxu1 %v3974_v56  ;;  %v4065_v55 = vld [vmem:[%s5704_s1 + $0x984] ss:$8 sps:$4 sm:$0xff]   ;;  %v4060_v56 = vld [vmem:[%s5704_s1 + $0x380] ss:$8 sps:$4 sm:$0xff]  }
  0xa9   :  { %2837 = vmatprep.subr.bf16.mxu0 %v3977_v57  ;;  %v4063_v57 = vld [vmem:[%s5704_s1 + $0x980] ss:$8 sps:$4 sm:$0xff]  }
  0xab   :  { %2592 = vmatpush1.bf16.msra.mxu1 %v3972_v58  ;;  %v4068_v58 = vld [vmem:[%s5704_s1 + $0x394] ss:$8 sps:$4 sm:$0xff]  }
  0xac   :  { %2838 = vmatpush1.bf16.msra.mxu0 %v3975_v59  ;;  %2593 = vmatprep.subr.bf16.mxu1 %v3980_v60  ;;  %v4071_v59 = vld [vmem:[%s5704_s1 + $0x994] ss:$8 sps:$4 sm:$0xff]   ;;  %v4066_v60 = vld [vmem:[%s5704_s1 + $0x390] ss:$8 sps:$4 sm:$0xff]  }
  0xad   :  { %2839 = vmatprep.subr.bf16.mxu0 %v3983_v61  ;;  %v4069_v61 = vld [vmem:[%s5704_s1 + $0x990] ss:$8 sps:$4 sm:$0xff]  }
  0xaf   :  { %2594 = vmatpush1.bf16.msra.mxu1 %v3978_v62  ;;  %v4074_v62 = vld [vmem:[%s5704_s1 + $0x3a4] ss:$8 sps:$4 sm:$0xff]  }
  0xb0   :  { %2840 = vmatpush1.bf16.msra.mxu0 %v3981_v63  ;;  %2595 = vmatprep.subr.bf16.mxu1 %v3986_v0  ;;  %v4077_v63 = vld [vmem:[%s5704_s1 + $0x9a4] ss:$8 sps:$4 sm:$0xff]   ;;  %v4072_v0 = vld [vmem:[%s5704_s1 + $0x3a0] ss:$8 sps:$4 sm:$0xff]  }
  0xb1   :  { %2841 = vmatprep.subr.bf16.mxu0 %v3989_v1  ;;  %v4075_v1 = vld [vmem:[%s5704_s1 + $0x9a0] ss:$8 sps:$4 sm:$0xff]  }
  0xb3   :  { %2596 = vmatpush1.bf16.msra.mxu1 %v3984_v2  ;;  %v4080_v2 = vld [vmem:[%s5704_s1 + $0x3b4] ss:$8 sps:$4 sm:$0xff]  }
  0xb4   :  { %2842 = vmatpush1.bf16.msra.mxu0 %v3987_v3  ;;  %2597 = vmatprep.subr.bf16.mxu1 %v3992_v4  ;;  %v4083_v3 = vld [vmem:[%s5704_s1 + $0x9b4] ss:$8 sps:$4 sm:$0xff]   ;;  %v4078_v4 = vld [vmem:[%s5704_s1 + $0x3b0] ss:$8 sps:$4 sm:$0xff]  }
  0xb5   :  { %2843 = vmatprep.subr.bf16.mxu0 %v3995_v5  ;;  %v4081_v5 = vld [vmem:[%s5704_s1 + $0x9b0] ss:$8 sps:$4 sm:$0xff]  }
  0xb7   :  { %2598 = vmatpush1.bf16.msra.mxu1 %v3990_v6  ;;  %v4086_v6 = vld [vmem:[%s5704_s1 + $0x3c4] ss:$8 sps:$4 sm:$0xff]  }
  0xb8   :  { %2844 = vmatpush1.bf16.msra.mxu0 %v3993_v7  ;;  %2599 = vmatprep.subr.bf16.mxu1 %v3998_v8  ;;  %v4089_v7 = vld [vmem:[%s5704_s1 + $0x9c4] ss:$8 sps:$4 sm:$0xff]   ;;  %v4084_v8 = vld [vmem:[%s5704_s1 + $0x3c0] ss:$8 sps:$4 sm:$0xff]  }
  0xb9   :  { %2845 = vmatprep.subr.bf16.mxu0 %v4001_v9  ;;  %v4087_v9 = vld [vmem:[%s5704_s1 + $0x9c0] ss:$8 sps:$4 sm:$0xff]  }
  0xbb   :  { %2600 = vmatpush1.bf16.msra.mxu1 %v3996_v10  ;;  %v4092_v10 = vld [vmem:[%s5704_s1 + $0x3d4] ss:$8 sps:$4 sm:$0xff]  }
  0xbc   :  { %2846 = vmatpush1.bf16.msra.mxu0 %v3999_v11  ;;  %2601 = vmatprep.subr.bf16.mxu1 %v4004_v12  ;;  %v4095_v11 = vld [vmem:[%s5704_s1 + $0x9d4] ss:$8 sps:$4 sm:$0xff]   ;;  %v4090_v12 = vld [vmem:[%s5704_s1 + $0x3d0] ss:$8 sps:$4 sm:$0xff]  }
  0xbd   :  { %2847 = vmatprep.subr.bf16.mxu0 %v4007_v13  ;;  %v4093_v13 = vld [vmem:[%s5704_s1 + $0x9d0] ss:$8 sps:$4 sm:$0xff]  }
  0xbf   :  { %2602 = vmatpush1.bf16.msra.mxu1 %v4002_v14  ;;  %v4098_v14 = vld [vmem:[%s5704_s1 + $0x3e4] ss:$8 sps:$4 sm:$0xff]  }
  0xc0   :  { %2848 = vmatpush1.bf16.msra.mxu0 %v4005_v15  ;;  %2612 = vmatprep.subr.bf16.mxu1 %v4012_v16  ;;  %v4101_v15 = vld [vmem:[%s5704_s1 + $0x9e4] ss:$8 sps:$4 sm:$0xff]   ;;  %v4096_v16 = vld [vmem:[%s5704_s1 + $0x3e0] ss:$8 sps:$4 sm:$0xff]  }
  0xc1   :  { %2858 = vmatprep.subr.bf16.mxu0 %v4017_v17  ;;  %v4099_v17 = vld [vmem:[%s5704_s1 + $0x9e0] ss:$8 sps:$4 sm:$0xff]  }
  0xc2   :  { %2604 = vmatmul.mubr.bf16.vlgmr.msra.gmra.mrb[0].mxu1 %v3210_v22  ;;  %v4102_v22 = vld [vmem:[%s5704_s1 + $0x3f0] ss:$8 sps:$4 sm:$0xff]  }
  0xc3   :  { %2850 = vmatmul.mubr.bf16.vlgmr.msra.gmra.mrb[0].mxu0 %v3222_v23  ;;  %2613 = vmatpush1.bf16.msra.mxu1 %v4010_v19  ;;  %v4104_v19 = vld [vmem:[%s5704_s1 + $0x3f4] ss:$8 sps:$4 sm:$0xff]   ;;  %v4105_v23 = vld [vmem:[%s5704_s1 + $0x9f0] ss:$8 sps:$4 sm:$0xff]  }
  0xc4   :  { %2859 = vmatpush1.bf16.msra.mxu0 %v4015_v21  ;;  %2614 = vmatprep.subr.bf16.mxu1 %v4020_v26  ;;  %v4107_v21 = vld [vmem:[%s5704_s1 + $0x9f4] ss:$8 sps:$4 sm:$0xff]   ;;  %v4112_v26 = vld [vmem:[%s5704_s1 + $0x404] ss:$8 sps:$4 sm:$0xff]  }
  0xc5   :  { %2860 = vmatprep.subr.bf16.mxu0 %v4023_v18  ;;  %2644 = vmatprep.mubr.bf16.mxu1 %v3213_v20  ;;  %v4117_v18 = vld [vmem:[%s5704_s1 + $0xa04] ss:$8 sps:$4 sm:$0xff]  }
  0xc6   :  { %2890 = vmatprep.mubr.bf16.mxu0 %v3225_v27  ;;  %v5205_v20 = vld [vmem:[%s5705_s0 + $0x20] sm:$0xff]  ;;  %v3212_v27 = vcombine.low %v5005_v24, %v5005_v24  ;;  %v4120_v24 = vld [vmem:[%s5704_s1 + $0x414] ss:$8 sps:$4 sm:$0xff]  }
  0xc7   :  { %2615 = vmatpush1.bf16.msra.mxu1 %v4018_v28  ;;  %v3224_v28 = vcombine.low %v5010_v25, %v5010_v25  ;;  %v4123_v25 = vld [vmem:[%s5704_s1 + $0xa14] ss:$8 sps:$4 sm:$0xff]  }
  0xc8   :  { %2861 = vmatpush1.bf16.msra.mxu0 %v4021_v29  ;;  %2616 = vmatprep.subr.bf16.mxu1 %v4026_v30  ;;  %v5214_v29 = vld [vmem:[%s5705_s0 + $0x50] sm:$0xff]  ;;  %v4110_v30 = vld [vmem:[%s5704_s1 + $0x400] ss:$8 sps:$4 sm:$0xff]  }
  0xc9   :  { %2862 = vmatprep.subr.bf16.mxu0 %v4029_v31  ;;  %v4115_v31 = vld [vmem:[%s5704_s1 + $0xa00] ss:$8 sps:$4 sm:$0xff]  }
  0xcb   :  { %2617 = vmatpush1.bf16.msra.mxu1 %v4024_v32  ;;  %v3215_v32 = vcombine.high %v5205_v20, %v5205_v20 }
  0xcc   :  { %2863 = vmatpush1.bf16.msra.mxu0 %v4027_v33  ;;  %2618 = vmatprep.subr.bf16.mxu1 %v4032_v34  ;;  %v3227_v33 = vcombine.high %v5214_v29, %v5214_v29  ;;  %v4118_v34 = vld [vmem:[%s5704_s1 + $0x410] ss:$8 sps:$4 sm:$0xff]  }
  0xcd   :  { %2864 = vmatprep.subr.bf16.mxu0 %v4035_v35  ;;  %v4121_v35 = vld [vmem:[%s5704_s1 + $0xa10] ss:$8 sps:$4 sm:$0xff]  }
  0xcf   :  { %2619 = vmatpush1.bf16.msra.mxu1 %v4030_v36  ;;  %v4126_v36 = vld [vmem:[%s5704_s1 + $0x424] ss:$8 sps:$4 sm:$0xff]  }
  0xd0   :  { %2865 = vmatpush1.bf16.msra.mxu0 %v4033_v37  ;;  %2620 = vmatprep.subr.bf16.mxu1 %v4038_v38  ;;  %v4129_v37 = vld [vmem:[%s5704_s1 + $0xa24] ss:$8 sps:$4 sm:$0xff]   ;;  %v4124_v38 = vld [vmem:[%s5704_s1 + $0x420] ss:$8 sps:$4 sm:$0xff]  }
  0xd1   :  { %2866 = vmatprep.subr.bf16.mxu0 %v4041_v39  ;;  %v4127_v39 = vld [vmem:[%s5704_s1 + $0xa20] ss:$8 sps:$4 sm:$0xff]  }
  0xd3   :  { %2621 = vmatpush1.bf16.msra.mxu1 %v4036_v40  ;;  %v4132_v40 = vld [vmem:[%s5704_s1 + $0x434] ss:$8 sps:$4 sm:$0xff]  }
  0xd4   :  { %2867 = vmatpush1.bf16.msra.mxu0 %v4039_v41  ;;  %2622 = vmatprep.subr.bf16.mxu1 %v4044_v42  ;;  %v4135_v41 = vld [vmem:[%s5704_s1 + $0xa34] ss:$8 sps:$4 sm:$0xff]   ;;  %v4130_v42 = vld [vmem:[%s5704_s1 + $0x430] ss:$8 sps:$4 sm:$0xff]  }
  0xd5   :  { %2868 = vmatprep.subr.bf16.mxu0 %v4047_v43  ;;  %v4133_v43 = vld [vmem:[%s5704_s1 + $0xa30] ss:$8 sps:$4 sm:$0xff]  }
  0xd7   :  { %2623 = vmatpush1.bf16.msra.mxu1 %v4042_v44  ;;  %v4138_v44 = vld [vmem:[%s5704_s1 + $0x444] ss:$8 sps:$4 sm:$0xff]  }
  0xd8   :  { %2869 = vmatpush1.bf16.msra.mxu0 %v4045_v45  ;;  %2624 = vmatprep.subr.bf16.mxu1 %v4050_v46  ;;  %v4141_v45 = vld [vmem:[%s5704_s1 + $0xa44] ss:$8 sps:$4 sm:$0xff]   ;;  %v4136_v46 = vld [vmem:[%s5704_s1 + $0x440] ss:$8 sps:$4 sm:$0xff]  }
  0xd9   :  { %2870 = vmatprep.subr.bf16.mxu0 %v4053_v47  ;;  %v4139_v47 = vld [vmem:[%s5704_s1 + $0xa40] ss:$8 sps:$4 sm:$0xff]  }
  0xdb   :  { %2625 = vmatpush1.bf16.msra.mxu1 %v4048_v48  ;;  %v4144_v48 = vld [vmem:[%s5704_s1 + $0x454] ss:$8 sps:$4 sm:$0xff]  }
  0xdc   :  { %2871 = vmatpush1.bf16.msra.mxu0 %v4051_v49  ;;  %2626 = vmatprep.subr.bf16.mxu1 %v4056_v50  ;;  %v4147_v49 = vld [vmem:[%s5704_s1 + $0xa54] ss:$8 sps:$4 sm:$0xff]   ;;  %v4142_v50 = vld [vmem:[%s5704_s1 + $0x450] ss:$8 sps:$4 sm:$0xff]  }
  0xdd   :  { %2872 = vmatprep.subr.bf16.mxu0 %v4059_v51  ;;  %v4145_v51 = vld [vmem:[%s5704_s1 + $0xa50] ss:$8 sps:$4 sm:$0xff]  }
  0xdf   :  { %2627 = vmatpush1.bf16.msra.mxu1 %v4054_v52  ;;  %v4150_v52 = vld [vmem:[%s5704_s1 + $0x464] ss:$8 sps:$4 sm:$0xff]  }
  0xe0   :  { %2873 = vmatpush1.bf16.msra.mxu0 %v4057_v53  ;;  %2628 = vmatprep.subr.bf16.mxu1 %v4062_v54  ;;  %v4153_v53 = vld [vmem:[%s5704_s1 + $0xa64] ss:$8 sps:$4 sm:$0xff]   ;;  %v4148_v54 = vld [vmem:[%s5704_s1 + $0x460] ss:$8 sps:$4 sm:$0xff]  }
  0xe1   :  { %2874 = vmatprep.subr.bf16.mxu0 %v4065_v55  ;;  %v4151_v55 = vld [vmem:[%s5704_s1 + $0xa60] ss:$8 sps:$4 sm:$0xff]  }
  0xe3   :  { %2629 = vmatpush1.bf16.msra.mxu1 %v4060_v56  ;;  %v4156_v56 = vld [vmem:[%s5704_s1 + $0x474] ss:$8 sps:$4 sm:$0xff]  }
  0xe4   :  { %2875 = vmatpush1.bf16.msra.mxu0 %v4063_v57  ;;  %2630 = vmatprep.subr.bf16.mxu1 %v4068_v58  ;;  %v4159_v57 = vld [vmem:[%s5704_s1 + $0xa74] ss:$8 sps:$4 sm:$0xff]   ;;  %v4154_v58 = vld [vmem:[%s5704_s1 + $0x470] ss:$8 sps:$4 sm:$0xff]  }
  0xe5   :  { %2876 = vmatprep.subr.bf16.mxu0 %v4071_v59  ;;  %v4157_v59 = vld [vmem:[%s5704_s1 + $0xa70] ss:$8 sps:$4 sm:$0xff]  }
  0xe7   :  { %2631 = vmatpush1.bf16.msra.mxu1 %v4066_v60  ;;  %v4162_v60 = vld [vmem:[%s5704_s1 + $0x484] ss:$8 sps:$4 sm:$0xff]  }
  0xe8   :  { %2877 = vmatpush1.bf16.msra.mxu0 %v4069_v61  ;;  %2632 = vmatprep.subr.bf16.mxu1 %v4074_v62  ;;  %v4165_v61 = vld [vmem:[%s5704_s1 + $0xa84] ss:$8 sps:$4 sm:$0xff]   ;;  %v4160_v62 = vld [vmem:[%s5704_s1 + $0x480] ss:$8 sps:$4 sm:$0xff]  }
  0xe9   :  { %2878 = vmatprep.subr.bf16.mxu0 %v4077_v63  ;;  %v4163_v63 = vld [vmem:[%s5704_s1 + $0xa80] ss:$8 sps:$4 sm:$0xff]  }
  0xeb   :  { %2633 = vmatpush1.bf16.msra.mxu1 %v4072_v0  ;;  %v4168_v0 = vld [vmem:[%s5704_s1 + $0x494] ss:$8 sps:$4 sm:$0xff]  }
  0xec   :  { %2879 = vmatpush1.bf16.msra.mxu0 %v4075_v1  ;;  %2634 = vmatprep.subr.bf16.mxu1 %v4080_v2  ;;  %v4171_v1 = vld [vmem:[%s5704_s1 + $0xa94] ss:$8 sps:$4 sm:$0xff]   ;;  %v4166_v2 = vld [vmem:[%s5704_s1 + $0x490] ss:$8 sps:$4 sm:$0xff]  }
  0xed   :  { %2880 = vmatprep.subr.bf16.mxu0 %v4083_v3  ;;  %v4169_v3 = vld [vmem:[%s5704_s1 + $0xa90] ss:$8 sps:$4 sm:$0xff]  }
  0xef   :  { %2635 = vmatpush1.bf16.msra.mxu1 %v4078_v4  ;;  %v4174_v4 = vld [vmem:[%s5704_s1 + $0x4a4] ss:$8 sps:$4 sm:$0xff]  }
  0xf0   :  { %2881 = vmatpush1.bf16.msra.mxu0 %v4081_v5  ;;  %2636 = vmatprep.subr.bf16.mxu1 %v4086_v6  ;;  %v4177_v5 = vld [vmem:[%s5704_s1 + $0xaa4] ss:$8 sps:$4 sm:$0xff]   ;;  %v4172_v6 = vld [vmem:[%s5704_s1 + $0x4a0] ss:$8 sps:$4 sm:$0xff]  }
  0xf1   :  { %2882 = vmatprep.subr.bf16.mxu0 %v4089_v7  ;;  %v4175_v7 = vld [vmem:[%s5704_s1 + $0xaa0] ss:$8 sps:$4 sm:$0xff]  }
  0xf3   :  { %2637 = vmatpush1.bf16.msra.mxu1 %v4084_v8  ;;  %v4180_v8 = vld [vmem:[%s5704_s1 + $0x4b4] ss:$8 sps:$4 sm:$0xff]  }
  0xf4   :  { %2883 = vmatpush1.bf16.msra.mxu0 %v4087_v9  ;;  %2638 = vmatprep.subr.bf16.mxu1 %v4092_v10  ;;  %v4183_v9 = vld [vmem:[%s5704_s1 + $0xab4] ss:$8 sps:$4 sm:$0xff]   ;;  %v4178_v10 = vld [vmem:[%s5704_s1 + $0x4b0] ss:$8 sps:$4 sm:$0xff]  }
  0xf5   :  { %2884 = vmatprep.subr.bf16.mxu0 %v4095_v11  ;;  %v4181_v11 = vld [vmem:[%s5704_s1 + $0xab0] ss:$8 sps:$4 sm:$0xff]  }
  0xf7   :  { %2639 = vmatpush1.bf16.msra.mxu1 %v4090_v12  ;;  %v4186_v12 = vld [vmem:[%s5704_s1 + $0x4c4] ss:$8 sps:$4 sm:$0xff]  }
  0xf8   :  { %2885 = vmatpush1.bf16.msra.mxu0 %v4093_v13  ;;  %2640 = vmatprep.subr.bf16.mxu1 %v4098_v14  ;;  %v4189_v13 = vld [vmem:[%s5704_s1 + $0xac4] ss:$8 sps:$4 sm:$0xff]   ;;  %v4184_v14 = vld [vmem:[%s5704_s1 + $0x4c0] ss:$8 sps:$4 sm:$0xff]  }
  0xf9   :  { %2886 = vmatprep.subr.bf16.mxu0 %v4101_v15  ;;  %v4187_v15 = vld [vmem:[%s5704_s1 + $0xac0] ss:$8 sps:$4 sm:$0xff]  }
  0xfb   :  { %2641 = vmatpush1.bf16.msra.mxu1 %v4096_v16  ;;  %v4192_v16 = vld [vmem:[%s5704_s1 + $0x4d4] ss:$8 sps:$4 sm:$0xff]  }
  0xfc   :  { %2887 = vmatpush1.bf16.msra.mxu0 %v4099_v17  ;;  %2642 = vmatprep.subr.bf16.mxu1 %v4104_v19  ;;  %v4195_v17 = vld [vmem:[%s5704_s1 + $0xad4] ss:$8 sps:$4 sm:$0xff]   ;;  %v4190_v19 = vld [vmem:[%s5704_s1 + $0x4d0] ss:$8 sps:$4 sm:$0xff]  }
  0xfd   :  { %2888 = vmatprep.subr.bf16.mxu0 %v4107_v21  ;;  %v4193_v21 = vld [vmem:[%s5704_s1 + $0xad0] ss:$8 sps:$4 sm:$0xff]  }
  0xff   :  { %2643 = vmatpush1.bf16.msra.mxu1 %v4102_v22  ;;  %v4198_v22 = vld [vmem:[%s5704_s1 + $0x4e4] ss:$8 sps:$4 sm:$0xff]  }
 0x100   :  { %2889 = vmatpush1.bf16.msra.mxu0 %v4105_v23  ;;  %2653 = vmatprep.subr.bf16.mxu1 %v4112_v26  ;;  %v4201_v23 = vld [vmem:[%s5704_s1 + $0xae4] ss:$8 sps:$4 sm:$0xff]   ;;  %v4196_v26 = vld [vmem:[%s5704_s1 + $0x4e0] ss:$8 sps:$4 sm:$0xff]  }
 0x101   :  { %2899 = vmatprep.subr.bf16.mxu0 %v4117_v18  ;;  %v4199_v18 = vld [vmem:[%s5704_s1 + $0xae0] ss:$8 sps:$4 sm:$0xff]  }
 0x102   :  { %2645 = vmatmul.mubr.bf16.vlgmr.msra.gmra.mrb[0].mxu1 %v3212_v27  ;;  %v4204_v27 = vld [vmem:[%s5704_s1 + $0x4f4] ss:$8 sps:$4 sm:$0xff]  }
 0x103   :  { %2891 = vmatmul.mubr.bf16.vlgmr.msra.gmra.mrb[0].mxu0 %v3224_v28  ;;  %2654 = vmatpush1.bf16.msra.mxu1 %v4110_v30  ;;  %v4207_v28 = vld [vmem:[%s5704_s1 + $0xaf4] ss:$8 sps:$4 sm:$0xff]   ;;  %v4202_v30 = vld [vmem:[%s5704_s1 + $0x4f0] ss:$8 sps:$4 sm:$0xff]  }
 0x104   :  { %2900 = vmatpush1.bf16.msra.mxu0 %v4115_v31  ;;  %2655 = vmatprep.subr.bf16.mxu1 %v4120_v24  ;;  %v4205_v31 = vld [vmem:[%s5704_s1 + $0xaf0] ss:$8 sps:$4 sm:$0xff]   ;;  %v4212_v24 = vld [vmem:[%s5704_s1 + $0x504] ss:$8 sps:$4 sm:$0xff]  }
 0x105   :  { %2901 = vmatprep.subr.bf16.mxu0 %v4123_v25  ;;  %2685 = vmatprep.mubr.bf16.mxu1 %v3215_v32  ;;  %v4217_v25 = vld [vmem:[%s5704_s1 + $0xb04] ss:$8 sps:$4 sm:$0xff]   ;;  %v3214_v32 = vcombine.low %v5205_v20, %v5205_v20  ;;  %v4215_v20 = vld [vmem:[%s5704_s1 + $0xb00] ss:$8 sps:$4 sm:$0xff]  }
 0x106   :  { %2931 = vmatprep.mubr.bf16.mxu0 %v3227_v33  ;;  %v3226_v33 = vcombine.low %v5214_v29, %v5214_v29  ;;  %v4220_v29 = vld [vmem:[%s5704_s1 + $0x514] ss:$8 sps:$4 sm:$0xff]  }
 0x107   :  { %2656 = vmatpush1.bf16.msra.mxu1 %v4118_v34  ;;  %v5419_v34 = vld [vmem:[%s5705_s0 + $0x28] sm:$0xff] }
 0x108   :  { %2902 = vmatpush1.bf16.msra.mxu0 %v4121_v35  ;;  %2657 = vmatprep.subr.bf16.mxu1 %v4126_v36  ;;  %v5424_v35 = vld [vmem:[%s5705_s0 + $0x58] sm:$0xff]  ;;  %v4210_v36 = vld [vmem:[%s5704_s1 + $0x500] ss:$8 sps:$4 sm:$0xff]  }
 0x109   :  { %2903 = vmatprep.subr.bf16.mxu0 %v4129_v37  ;;  %v4223_v37 = vld [vmem:[%s5704_s1 + $0xb14] ss:$8 sps:$4 sm:$0xff]  }
 0x10b   :  { %2658 = vmatpush1.bf16.msra.mxu1 %v4124_v38  ;;  %v3217_v38 = vcombine.high %v5419_v34, %v5419_v34 }
 0x10c   :  { %2904 = vmatpush1.bf16.msra.mxu0 %v4127_v39  ;;  %2659 = vmatprep.subr.bf16.mxu1 %v4132_v40  ;;  %v3229_v39 = vcombine.high %v5424_v35, %v5424_v35  ;;  %v4218_v40 = vld [vmem:[%s5704_s1 + $0x510] ss:$8 sps:$4 sm:$0xff]  }
 0x10d   :  { %2905 = vmatprep.subr.bf16.mxu0 %v4135_v41  ;;  %v4221_v41 = vld [vmem:[%s5704_s1 + $0xb10] ss:$8 sps:$4 sm:$0xff]  }
 0x10f   :  { %2660 = vmatpush1.bf16.msra.mxu1 %v4130_v42  ;;  %v4226_v42 = vld [vmem:[%s5704_s1 + $0x524] ss:$8 sps:$4 sm:$0xff]  }
 0x110   :  { %2906 = vmatpush1.bf16.msra.mxu0 %v4133_v43  ;;  %2661 = vmatprep.subr.bf16.mxu1 %v4138_v44  ;;  %v4229_v43 = vld [vmem:[%s5704_s1 + $0xb24] ss:$8 sps:$4 sm:$0xff]   ;;  %v4224_v44 = vld [vmem:[%s5704_s1 + $0x520] ss:$8 sps:$4 sm:$0xff]  }
 0x111   :  { %2907 = vmatprep.subr.bf16.mxu0 %v4141_v45  ;;  %v4227_v45 = vld [vmem:[%s5704_s1 + $0xb20] ss:$8 sps:$4 sm:$0xff]  }
 0x113   :  { %2662 = vmatpush1.bf16.msra.mxu1 %v4136_v46  ;;  %v4232_v46 = vld [vmem:[%s5704_s1 + $0x534] ss:$8 sps:$4 sm:$0xff]  }
 0x114   :  { %2908 = vmatpush1.bf16.msra.mxu0 %v4139_v47  ;;  %2663 = vmatprep.subr.bf16.mxu1 %v4144_v48  ;;  %v4235_v47 = vld [vmem:[%s5704_s1 + $0xb34] ss:$8 sps:$4 sm:$0xff]   ;;  %v4230_v48 = vld [vmem:[%s5704_s1 + $0x530] ss:$8 sps:$4 sm:$0xff]  }
 0x115   :  { %2909 = vmatprep.subr.bf16.mxu0 %v4147_v49  ;;  %v4233_v49 = vld [vmem:[%s5704_s1 + $0xb30] ss:$8 sps:$4 sm:$0xff]  }
 0x117   :  { %2664 = vmatpush1.bf16.msra.mxu1 %v4142_v50  ;;  %v4238_v50 = vld [vmem:[%s5704_s1 + $0x544] ss:$8 sps:$4 sm:$0xff]  }
 0x118   :  { %2910 = vmatpush1.bf16.msra.mxu0 %v4145_v51  ;;  %2665 = vmatprep.subr.bf16.mxu1 %v4150_v52  ;;  %v4241_v51 = vld [vmem:[%s5704_s1 + $0xb44] ss:$8 sps:$4 sm:$0xff]   ;;  %v4236_v52 = vld [vmem:[%s5704_s1 + $0x540] ss:$8 sps:$4 sm:$0xff]  }
 0x119   :  { %2911 = vmatprep.subr.bf16.mxu0 %v4153_v53  ;;  %v4239_v53 = vld [vmem:[%s5704_s1 + $0xb40] ss:$8 sps:$4 sm:$0xff]  }
 0x11b   :  { %2666 = vmatpush1.bf16.msra.mxu1 %v4148_v54  ;;  %v4244_v54 = vld [vmem:[%s5704_s1 + $0x554] ss:$8 sps:$4 sm:$0xff]  }
 0x11c   :  { %2912 = vmatpush1.bf16.msra.mxu0 %v4151_v55  ;;  %2667 = vmatprep.subr.bf16.mxu1 %v4156_v56  ;;  %v4247_v55 = vld [vmem:[%s5704_s1 + $0xb54] ss:$8 sps:$4 sm:$0xff]   ;;  %v4242_v56 = vld [vmem:[%s5704_s1 + $0x550] ss:$8 sps:$4 sm:$0xff]  }
 0x11d   :  { %2913 = vmatprep.subr.bf16.mxu0 %v4159_v57  ;;  %v4245_v57 = vld [vmem:[%s5704_s1 + $0xb50] ss:$8 sps:$4 sm:$0xff]  }
 0x11f   :  { %2668 = vmatpush1.bf16.msra.mxu1 %v4154_v58  ;;  %v4250_v58 = vld [vmem:[%s5704_s1 + $0x564] ss:$8 sps:$4 sm:$0xff]  }
 0x120   :  { %2914 = vmatpush1.bf16.msra.mxu0 %v4157_v59  ;;  %2669 = vmatprep.subr.bf16.mxu1 %v4162_v60  ;;  %v4253_v59 = vld [vmem:[%s5704_s1 + $0xb64] ss:$8 sps:$4 sm:$0xff]   ;;  %v4248_v60 = vld [vmem:[%s5704_s1 + $0x560] ss:$8 sps:$4 sm:$0xff]  }
 0x121   :  { %2915 = vmatprep.subr.bf16.mxu0 %v4165_v61  ;;  %v4251_v61 = vld [vmem:[%s5704_s1 + $0xb60] ss:$8 sps:$4 sm:$0xff]  }
 0x123   :  { %2670 = vmatpush1.bf16.msra.mxu1 %v4160_v62  ;;  %v4256_v62 = vld [vmem:[%s5704_s1 + $0x574] ss:$8 sps:$4 sm:$0xff]  }
 0x124   :  { %2916 = vmatpush1.bf16.msra.mxu0 %v4163_v63  ;;  %2671 = vmatprep.subr.bf16.mxu1 %v4168_v0  ;;  %v4259_v63 = vld [vmem:[%s5704_s1 + $0xb74] ss:$8 sps:$4 sm:$0xff]   ;;  %v4254_v0 = vld [vmem:[%s5704_s1 + $0x570] ss:$8 sps:$4 sm:$0xff]  }
 0x125   :  { %2917 = vmatprep.subr.bf16.mxu0 %v4171_v1  ;;  %v4257_v1 = vld [vmem:[%s5704_s1 + $0xb70] ss:$8 sps:$4 sm:$0xff]  }
 0x127   :  { %2672 = vmatpush1.bf16.msra.mxu1 %v4166_v2  ;;  %v4262_v2 = vld [vmem:[%s5704_s1 + $0x584] ss:$8 sps:$4 sm:$0xff]  }
 0x128   :  { %2918 = vmatpush1.bf16.msra.mxu0 %v4169_v3  ;;  %2673 = vmatprep.subr.bf16.mxu1 %v4174_v4  ;;  %v4265_v3 = vld [vmem:[%s5704_s1 + $0xb84] ss:$8 sps:$4 sm:$0xff]   ;;  %v4260_v4 = vld [vmem:[%s5704_s1 + $0x580] ss:$8 sps:$4 sm:$0xff]  }
 0x129   :  { %2919 = vmatprep.subr.bf16.mxu0 %v4177_v5  ;;  %v4263_v5 = vld [vmem:[%s5704_s1 + $0xb80] ss:$8 sps:$4 sm:$0xff]  }
 0x12b   :  { %2674 = vmatpush1.bf16.msra.mxu1 %v4172_v6  ;;  %v4268_v6 = vld [vmem:[%s5704_s1 + $0x594] ss:$8 sps:$4 sm:$0xff]  }
 0x12c   :  { %2920 = vmatpush1.bf16.msra.mxu0 %v4175_v7  ;;  %2675 = vmatprep.subr.bf16.mxu1 %v4180_v8  ;;  %v4271_v7 = vld [vmem:[%s5704_s1 + $0xb94] ss:$8 sps:$4 sm:$0xff]   ;;  %v4266_v8 = vld [vmem:[%s5704_s1 + $0x590] ss:$8 sps:$4 sm:$0xff]  }
 0x12d   :  { %2921 = vmatprep.subr.bf16.mxu0 %v4183_v9  ;;  %v4269_v9 = vld [vmem:[%s5704_s1 + $0xb90] ss:$8 sps:$4 sm:$0xff]  }
 0x12f   :  { %2676 = vmatpush1.bf16.msra.mxu1 %v4178_v10  ;;  %v4274_v10 = vld [vmem:[%s5704_s1 + $0x5a4] ss:$8 sps:$4 sm:$0xff]  }
 0x130   :  { %2922 = vmatpush1.bf16.msra.mxu0 %v4181_v11  ;;  %2677 = vmatprep.subr.bf16.mxu1 %v4186_v12  ;;  %v4277_v11 = vld [vmem:[%s5704_s1 + $0xba4] ss:$8 sps:$4 sm:$0xff]   ;;  %v4272_v12 = vld [vmem:[%s5704_s1 + $0x5a0] ss:$8 sps:$4 sm:$0xff]  }
 0x131   :  { %2923 = vmatprep.subr.bf16.mxu0 %v4189_v13  ;;  %v4275_v13 = vld [vmem:[%s5704_s1 + $0xba0] ss:$8 sps:$4 sm:$0xff]  }
 0x133   :  { %2678 = vmatpush1.bf16.msra.mxu1 %v4184_v14  ;;  %v4280_v14 = vld [vmem:[%s5704_s1 + $0x5b4] ss:$8 sps:$4 sm:$0xff]  }
 0x134   :  { %2924 = vmatpush1.bf16.msra.mxu0 %v4187_v15  ;;  %2679 = vmatprep.subr.bf16.mxu1 %v4192_v16  ;;  %v4283_v15 = vld [vmem:[%s5704_s1 + $0xbb4] ss:$8 sps:$4 sm:$0xff]   ;;  %v4278_v16 = vld [vmem:[%s5704_s1 + $0x5b0] ss:$8 sps:$4 sm:$0xff]  }
 0x135   :  { %2925 = vmatprep.subr.bf16.mxu0 %v4195_v17  ;;  %v4281_v17 = vld [vmem:[%s5704_s1 + $0xbb0] ss:$8 sps:$4 sm:$0xff]  }
 0x137   :  { %2680 = vmatpush1.bf16.msra.mxu1 %v4190_v19  ;;  %v4286_v19 = vld [vmem:[%s5704_s1 + $0x5c4] ss:$8 sps:$4 sm:$0xff]  }
 0x138   :  { %2926 = vmatpush1.bf16.msra.mxu0 %v4193_v21  ;;  %2681 = vmatprep.subr.bf16.mxu1 %v4198_v22  ;;  %v4289_v21 = vld [vmem:[%s5704_s1 + $0xbc4] ss:$8 sps:$4 sm:$0xff]   ;;  %v4284_v22 = vld [vmem:[%s5704_s1 + $0x5c0] ss:$8 sps:$4 sm:$0xff]  }
 0x139   :  { %2927 = vmatprep.subr.bf16.mxu0 %v4201_v23  ;;  %v4287_v23 = vld [vmem:[%s5704_s1 + $0xbc0] ss:$8 sps:$4 sm:$0xff]  }
 0x13b   :  { %2682 = vmatpush1.bf16.msra.mxu1 %v4196_v26  ;;  %v4292_v26 = vld [vmem:[%s5704_s1 + $0x5d4] ss:$8 sps:$4 sm:$0xff]  }
 0x13c   :  { %2928 = vmatpush1.bf16.msra.mxu0 %v4199_v18  ;;  %2683 = vmatprep.subr.bf16.mxu1 %v4204_v27  ;;  %v4295_v18 = vld [vmem:[%s5704_s1 + $0xbd4] ss:$8 sps:$4 sm:$0xff]   ;;  %v4290_v27 = vld [vmem:[%s5704_s1 + $0x5d0] ss:$8 sps:$4 sm:$0xff]  }
 0x13d   :  { %2929 = vmatprep.subr.bf16.mxu0 %v4207_v28  ;;  %v4293_v28 = vld [vmem:[%s5704_s1 + $0xbd0] ss:$8 sps:$4 sm:$0xff]  }
 0x13f   :  { %2684 = vmatpush1.bf16.msra.mxu1 %v4202_v30  ;;  %v4298_v30 = vld [vmem:[%s5704_s1 + $0x5e4] ss:$8 sps:$4 sm:$0xff]  }
 0x140   :  { %2930 = vmatpush1.bf16.msra.mxu0 %v4205_v31  ;;  %2694 = vmatprep.subr.bf16.mxu1 %v4212_v24  ;;  %v4301_v31 = vld [vmem:[%s5704_s1 + $0xbe4] ss:$8 sps:$4 sm:$0xff]   ;;  %v4296_v24 = vld [vmem:[%s5704_s1 + $0x5e0] ss:$8 sps:$4 sm:$0xff]  }
 0x141   :  { %2940 = vmatprep.subr.bf16.mxu0 %v4217_v25  ;;  %v4299_v25 = vld [vmem:[%s5704_s1 + $0xbe0] ss:$8 sps:$4 sm:$0xff]  }
 0x142   :  { %2686 = vmatmul.mubr.bf16.vlgmr.msra.gmra.mrb[0].mxu1 %v3214_v32  ;;  %v4304_v32 = vld [vmem:[%s5704_s1 + $0x5f4] ss:$8 sps:$4 sm:$0xff]  }
 0x143   :  { %2932 = vmatmul.mubr.bf16.vlgmr.msra.gmra.mrb[0].mxu0 %v3226_v33  ;;  %2695 = vmatpush1.bf16.msra.mxu1 %v4210_v36  ;;  %v4307_v33 = vld [vmem:[%s5704_s1 + $0xbf4] ss:$8 sps:$4 sm:$0xff]   ;;  %v4302_v36 = vld [vmem:[%s5704_s1 + $0x5f0] ss:$8 sps:$4 sm:$0xff]  }
 0x144   :  { %2941 = vmatpush1.bf16.msra.mxu0 %v4215_v20  ;;  %2696 = vmatprep.subr.bf16.mxu1 %v4220_v29  ;;  %v4305_v20 = vld [vmem:[%s5704_s1 + $0xbf0] ss:$8 sps:$4 sm:$0xff]   ;;  %v4314_v29 = vld [vmem:[%s5704_s1 + $0xc04] ss:$8 sps:$4 sm:$0xff]  }
 0x145   :  { %2942 = vmatprep.subr.bf16.mxu0 %v4223_v37  ;;  %2726 = vmatprep.mubr.bf16.mxu1 %v3217_v38  ;;  %v4325_v37 = vld [vmem:[%s5706_s3 + $0x40] sm:$0xff]   ;;  %v3216_v38 = vcombine.low %v5419_v34, %v5419_v34  ;;  %v4327_v34 = vld [vmem:[%s5706_s3 + $0x48] sm:$0xff]  }
 0x146   :  { %2972 = vmatprep.mubr.bf16.mxu0 %v3229_v39  ;;  %v3228_v39 = vcombine.low %v5424_v35, %v5424_v35  ;;  %v4315_v35 = vld [vmem:[%s5704_s1 + $0xc10] ss:$8 sps:$4 sm:$0xff]  }
 0x147   :  { %2697 = vmatpush1.bf16.msra.mxu1 %v4218_v40  ;;  %v4312_v40 = vld [vmem:[%s5704_s1 + $0xc00] ss:$8 sps:$4 sm:$0xff]  }
 0x148   :  { %2943 = vmatpush1.bf16.msra.mxu0 %v4221_v41  ;;  %2698 = vmatprep.subr.bf16.mxu1 %v4226_v42  ;;  %v4317_v41 = vld [vmem:[%s5704_s1 + $0xc14] ss:$8 sps:$4 sm:$0xff]   ;;  %v4326_v42 = vld [vmem:[%s5706_s3] sm:$0xff]  }
 0x149   :  { %2944 = vmatprep.subr.bf16.mxu0 %v4229_v43  ;;  %v4341_v43 = vmov 0  }
 0x14b   :  { %2699 = vmatpush1.bf16.msra.mxu1 %v4224_v44  ;;  %v4320_v44 = vld [vmem:[%s5704_s1 + $0xc24] ss:$8 sps:$4 sm:$0xff]  }
 0x14c   :  { %2945 = vmatpush1.bf16.msra.mxu0 %v4227_v45  ;;  %2700 = vmatprep.subr.bf16.mxu1 %v4232_v46  ;;  %v4328_v45 = vld [vmem:[%s5706_s3 + $0x8] sm:$0xff]  }
 0x14d   :  { %2946 = vmatprep.subr.bf16.mxu0 %v4235_v47  ;;  %v4318_v46 = vld [vmem:[%s5704_s1 + $0xc20] ss:$8 sps:$4 sm:$0xff]   ;;  %v4323_v47 = vld [vmem:[%s5704_s1 + $0xc34] ss:$8 sps:$4 sm:$0xff]  }
 0x14f   :  { %2701 = vmatpush1.bf16.msra.mxu1 %v4230_v48  ;;  %v4321_v48 = vld [vmem:[%s5704_s1 + $0xc30] ss:$8 sps:$4 sm:$0xff]  }
 0x150   :  { %2947 = vmatpush1.bf16.msra.mxu0 %v4233_v49  ;;  %2702 = vmatprep.subr.bf16.mxu1 %v4238_v50  ;;  %v4324_v49 = vld [vmem:[%s5705_s0 + $0x60] ss:$0 sps:$4 sm:$0xff]   ;;  %v4329_v50 = vld [vmem:[%s5706_s3 + $0x50] sm:$0xff]  }
 0x151   :  { %2948 = vmatprep.subr.bf16.mxu0 %v4241_v51  ;;  %v4330_v51 = vld [vmem:[%s5706_s3 + $0x10] sm:$0xff]  }
 0x153   :  { %2703 = vmatpush1.bf16.msra.mxu1 %v4236_v52  ;;  %v4331_v52 = vld [vmem:[%s5706_s3 + $0x58] sm:$0xff]  }
 0x154   :  { %2949 = vmatpush1.bf16.msra.mxu0 %v4239_v53  ;;  %2704 = vmatprep.subr.bf16.mxu1 %v4244_v54  ;;  %v4332_v53 = vld [vmem:[%s5706_s3 + $0x18] sm:$0xff]   ;;  %v4333_v54 = vld [vmem:[%s5706_s3 + $0x60] sm:$0xff]  }
 0x155   :  { %2950 = vmatprep.subr.bf16.mxu0 %v4247_v55  ;;  %v4334_v55 = vld [vmem:[%s5706_s3 + $0x20] sm:$0xff]  }
 0x157   :  { %2705 = vmatpush1.bf16.msra.mxu1 %v4242_v56  ;;  %v4335_v56 = vld [vmem:[%s5706_s3 + $0x68] sm:$0xff]  }
 0x158   :  { %2951 = vmatpush1.bf16.msra.mxu0 %v4245_v57  ;;  %2706 = vmatprep.subr.bf16.mxu1 %v4250_v58  ;;  %v4336_v57 = vld [vmem:[%s5706_s3 + $0x28] sm:$0xff]   ;;  %v4337_v58 = vld [vmem:[%s5706_s3 + $0x70] sm:$0xff]  }
 0x159   :  { %2952 = vmatprep.subr.bf16.mxu0 %v4253_v59  ;;  %v4338_v59 = vld [vmem:[%s5706_s3 + $0x30] sm:$0xff]  }
 0x15b   :  { %2707 = vmatpush1.bf16.msra.mxu1 %v4248_v60  ;;  %v4339_v60 = vld [vmem:[%s5706_s3 + $0x78] sm:$0xff]  }
 0x15c   :  { %2953 = vmatpush1.bf16.msra.mxu0 %v4251_v61  ;;  %2708 = vmatprep.subr.bf16.mxu1 %v4256_v62  ;;  %v4340_v61 = vld [vmem:[%s5706_s3 + $0x38] sm:$0xff]   ;;  %v428_v62 = vlaneseq }
 0x15d   :  { %2954 = vmatprep.subr.bf16.mxu0 %v4259_v63 }
 0x15f   :  { %2709 = vmatpush1.bf16.msra.mxu1 %v4254_v0 }
 0x160   :  { %2955 = vmatpush1.bf16.msra.mxu0 %v4257_v1  ;;  %2710 = vmatprep.subr.bf16.mxu1 %v4262_v2  ;;  %v429_v2 = vshrl.u32 %v428_v62, 7 }
 0x161   :  { %2956 = vmatprep.subr.bf16.mxu0 %v4265_v3 }
 0x163   :  { %2711 = vmatpush1.bf16.msra.mxu1 %v4260_v4  ;;  %v430_v4 = vsub.s32 0, %v429_v2 }
 0x164   :  { %2957 = vmatpush1.bf16.msra.mxu0 %v4263_v5  ;;  %2712 = vmatprep.subr.bf16.mxu1 %v4268_v6  ;;  %v426_v5 = vld [vmem:[%s5707_s2] sm:$0x3]  ;;  %v434_v6 = vsub.s32 1, %v429_v2 }
 0x165   :  { %2958 = vmatprep.subr.bf16.mxu0 %v4271_v7  ;;  %v431_v7 = vrot.slane %v426_v5, %v430_v4 }
 0x167   :  { %2713 = vmatpush1.bf16.msra.mxu1 %v4266_v8  ;;  %v435_v8 = vrot.slane %v426_v5, %v434_v6 }
 0x168   :  { %2959 = vmatpush1.bf16.msra.mxu0 %v4269_v9  ;;  %2714 = vmatprep.subr.bf16.mxu1 %v4274_v10 }
 0x169   :  { %2960 = vmatprep.subr.bf16.mxu0 %v4277_v11 }
 0x16b   :  { %2715 = vmatpush1.bf16.msra.mxu1 %v4272_v12 }
 0x16c   :  { %2961 = vmatpush1.bf16.msra.mxu0 %v4275_v13  ;;  %2716 = vmatprep.subr.bf16.mxu1 %v4280_v14 }
 0x16d   :  { %2962 = vmatprep.subr.bf16.mxu0 %v4283_v15 }
 0x16f   :  { %2717 = vmatpush1.bf16.msra.mxu1 %v4278_v16 }
 0x170   :  { %2963 = vmatpush1.bf16.msra.mxu0 %v4281_v17  ;;  %2718 = vmatprep.subr.bf16.mxu1 %v4286_v19 }
 0x171   :  { %2964 = vmatprep.subr.bf16.mxu0 %v4289_v21 }
 0x173   :  { %2719 = vmatpush1.bf16.msra.mxu1 %v4284_v22 }
 0x174   :  { %2965 = vmatpush1.bf16.msra.mxu0 %v4287_v23  ;;  %2720 = vmatprep.subr.bf16.mxu1 %v4292_v26  ;;  %v3624_v26 = vld [vmem:[%s5708_s4] ss:$0 sm:$0xff] }
 0x175   :  { %2966 = vmatprep.subr.bf16.mxu0 %v4295_v18 }
 0x177   :  { %2721 = vmatpush1.bf16.msra.mxu1 %v4290_v27 }
 0x178   :  { %2967 = vmatpush1.bf16.msra.mxu0 %v4293_v28  ;;  %2722 = vmatprep.subr.bf16.mxu1 %v4298_v30 }
 0x179   :  { %2968 = vmatprep.subr.bf16.mxu0 %v4301_v31 }
 0x17b   :  { %2723 = vmatpush1.bf16.msra.mxu1 %v4296_v24 }
 0x17c   :  { %2969 = vmatpush1.bf16.msra.mxu0 %v4299_v25  ;;  %2724 = vmatprep.subr.bf16.mxu1 %v4304_v32 }
 0x17d   :  { %2970 = vmatprep.subr.bf16.mxu0 %v4307_v33 }
 0x17f   :  { %2725 = vmatpush1.bf16.msra.mxu1 %v4302_v36 }
 0x180   :  { %2971 = vmatpush1.bf16.msra.mxu0 %v4305_v20  ;;  %3641 = vmatprep.subr.bf16.mxu1 %v4325_v37 }
 0x181   :  { %2981 = vmatprep.subr.bf16.mxu0 %v4314_v29 }
 0x182   :  { %2727 = vmatmul.mubr.bf16.vlgmr.msra.gmra.mrb[0].mxu1 %v3216_v38 }
 0x183   :  { %2973 = vmatmul.mubr.bf16.vlgmr.msra.gmra.mrb[0].mxu0 %v3228_v39  ;;  %3642 = vmatpush3.bf16.msra.mxu1 %v4326_v42 }
 0x184   :  { %2982 = vmatpush1.bf16.msra.mxu0 %v4312_v40  ;;  %3013 = vmatprep.mubr.bf16.mxu0 %v4341_v43 }
 0x185   :  { %2983 = vmatprep.subr.bf16.mxu0 %v4317_v41  ;;  %3643 = vmatprep.subr.bf16.mxu1 %v4327_v34 }
 0x187   :  { %3644 = vmatpush3.bf16.msra.mxu1 %v4328_v45 }
 0x188   :  { %2984 = vmatpush1.bf16.msra.mxu0 %v4315_v35  ;;  %3645 = vmatprep.subr.bf16.mxu1 %v4329_v50 }
 0x189   :  { %2985 = vmatprep.subr.bf16.mxu0 %v4320_v44 }
 0x18b   :  { %3646 = vmatpush3.bf16.msra.mxu1 %v4330_v51 }
 0x18c   :  { %2986 = vmatpush1.bf16.msra.mxu0 %v4318_v46  ;;  %3647 = vmatprep.subr.bf16.mxu1 %v4331_v52 }
 0x18d   :  { %2987 = vmatprep.subr.bf16.mxu0 %v4323_v47 }
 0x18f   :  { %3648 = vmatpush3.bf16.msra.mxu1 %v4332_v53 }
 0x190   :  { %2988 = vmatpush1.bf16.msra.mxu0 %v4321_v48  ;;  %3649 = vmatprep.subr.bf16.mxu1 %v4333_v54 }
 0x193   :  { %3623 = vmatmul.mubr.msk.bf16.vlgmr.msra.gmra.mrb[0].mxu0 %vm2485_vm0, %v4324_v49  ;;  %3650 = vmatpush3.bf16.msra.mxu1 %v4334_v55 }
 0x194   :  { %3651 = vmatprep.subr.bf16.mxu1 %v4335_v56 }
 0x197   :  { %3652 = vmatpush3.bf16.msra.mxu1 %v4336_v57 }
 0x198   :  { %3653 = vmatprep.subr.bf16.mxu1 %v4337_v58 }
 0x19b   :  { %3654 = vmatpush3.bf16.msra.mxu1 %v4338_v59 }
 0x19c   :  { %3655 = vmatprep.subr.bf16.mxu1 %v4339_v60 }
 0x19f   :  { %3656 = vmatpush3.bf16.msra.mxu1 %v4340_v61 }
 0x255   :  { %v2728_v63 = vpop.f32.mrb[0].mxu1 }
 0x256   :  { %v2730_v0 = vpop.f32.mrb[1].mxu1  ;;  %v3663_v9 = vadd.f32 %v2728_v63, %v431_v7 }
 0x257   :  { %v2732_v1 = vpop.f32.mrb[2].mxu1  ;;  %v3665_v10 = vadd.f32 %v2730_v0, %v435_v8 }
 0x258   :  { %v2733_v3 = vpop.f32.mrb[3].mxu1 }
 0x266   :  { %v3015_v11 = vpop.f32.mrb[0].mxu0 }
 0x267   :  { %v3664_v12 = vadd.f32 %v3663_v9, %v3015_v11  ;;  %v3017_v13 = vpop.f32.mrb[1].mxu0 }
 0x268   :  { %v3666_v14 = vadd.f32 %v3665_v10, %v3017_v13  ;;  %v3019_v15 = vpop.f32.mrb[2].mxu0 }
 0x269   :  { %v3022_v16 = vmax.f32 %v3664_v12, 0.0  ;;  %v3020_v17 = vpop.f32.mrb[3].mxu0 }
 0x26a   :  { %v3023_v19 = vmax.f32 %v3666_v14, 0.0 }
 0x26b   :  { %v3024_v22 = vpack.c.bf16 %v3022_v16, %v3022_v16 }
 0x26c   :  { %v3025_v21 = vpack.c.bf16 %v3023_v19, %v3023_v19 }
 0x26e   :  { %3193 = vmatprep.mubr.bf16.mxu1 %v3025_v21 }
 0x26f   :  { %3194 = vmatmul.mubr.bf16.vlgmr.msra.gmra.mrb[4].mxu1 %v3024_v22 }
 0x342   :  { %v3657_v23 = vpop.f32.mrb[4].mxu1 }
 0x343   :  { %v3658_v18 = vpop.f32.mrb[5].mxu1 }
 0x344   :  { %v3659_v27 = vadd.f32 %v3658_v18, %v3657_v23  ;;  %v3660_v28 = vpop.f32.mrb[6].mxu1 }
 0x345   :  { %v3661_v30 = vpop.f32.mrb[7].mxu1 }
 0x346   :  { %v3196_v31 = vadd.f32 %v3659_v27, %v3624_v26 }
 0x348   :  { %3201 = vst [vmem:[%s5709_s5] sm:$0xff] %v3196_v31 }

</bundles_post_ra>
